<compile_context>
chip_gen: v7x
topology: tpu7x:2x2x1
jax: 0.10.0
libtpu: 0.0.40
codegen_flags: <defaults>
</compile_context>

<pallas_src>
import functools

import jax
import jax.numpy as jnp
from jax.experimental import pallas as pl
from jax.experimental.pallas import tpu as pltpu


def _round_up(a: int, b: int) -> int:
    return (a + b - 1) // b * b


def basic_block_kernel(colmask_ref, xp_ref, w1_ref, b1_ref, w2_ref, b2_ref,
                       out_ref, pm_ref, mid_ref, *, Wp, TH, Cp, MR):
    """One (batch, row-strip) tile per grid step.

    colmask_ref: (rows1, 1) f32   1.0 on valid image columns, 0.0 on width-pad
                                  columns (strip-invariant).
    xp_ref     : (1, ROWS, Cp) f32  zero-padded input image, rows flattened.
    w1_ref     : (9*Cp, Cp)       conv1 weights (im2col layout, BN1 scale folded).
    b1_ref     : (1, Cp) f32      folded BN1 bias.
    w2_ref     : (9*Cp, Cp)       conv2 weights (im2col layout, BN2 scale folded).
    b2_ref     : (1, Cp) f32      folded BN2 bias.
    out_ref    : (1, rows2, Cp) f32  lifted output strip.
    pm_ref     : (rows1, 9*Cp)    im2col patch matrix (shared by both convs).
    mid_ref    : (MR, Cp)         intermediate strip + guard rows.
    """
    rows1 = (TH + 2) * Wp          # intermediate rows incl. 1-row halo each side
    rows2 = TH * Wp                # output rows of this strip
    cdt = mid_ref.dtype            # matmul compute dtype (bf16 or f32)

    sid = pl.program_id(1)
    nstrips = pl.num_programs(1)
    base = pl.multiple_of(sid * rows2, 8)     # lifted row offset of this strip

    # ---- conv1: 3 per-kh partial im2col matmuls (K = 3*Cp each) ------------
    # Chunk t = 3*kh + kw of the patch matrix holds the row slice at flattened
    # offset kh*Wp + kw; each kh chunk is written into its own column range so
    # the copies for kh+1 are independent of the dot for kh (overlappable).
    acc1 = jnp.zeros((rows1, Cp), jnp.float32)
    for kh in range(3):
        for kw in range(3):
            t = 3 * kh + kw
            pm_ref[pl.ds(0, rows1), pl.ds(t * Cp, Cp)] = (
                xp_ref[0, pl.ds(base + kh * Wp + kw, rows1), :].astype(cdt))
        acc1 = acc1 + jnp.dot(
            pm_ref[pl.ds(0, rows1), pl.ds(3 * kh * Cp, 3 * Cp)],
            w1_ref[pl.ds(3 * kh * Cp, 3 * Cp), :],
            preferred_element_type=jnp.float32)

    # BN1 (scale already folded into w1) bias + ReLU in f32; the column mask
    # zeroes the width-pad ("wrap") columns so they act as conv2's zero padding.
    h1 = jnp.maximum(acc1 + b1_ref[...], 0.0) * colmask_ref[...]

    # Stage the intermediate strip.  Only tiny guard rows are memset; the
    # interior is fully overwritten (no full-scratch zeroing per step).
    mid_ref[pl.ds(0, 1), :] = jnp.zeros((1, Cp), cdt)
    mid_ref[pl.ds(1, rows1), :] = h1.astype(cdt)
    mid_ref[pl.ds(1 + rows1, MR - 1 - rows1), :] = jnp.zeros(
        (MR - 1 - rows1, Cp), cdt)

    # Out-of-image halo rows (top of the first strip / bottom of the last
    # strip) must be zero so they act as conv2's vertical zero padding.
    @pl.when(sid == 0)
    def _():
        mid_ref[pl.ds(1, Wp), :] = jnp.zeros((Wp, Cp), cdt)

    @pl.when(sid == nstrips - 1)
    def _():
        mid_ref[pl.ds(1 + (TH + 1) * Wp, Wp), :] = jnp.zeros((Wp, Cp), cdt)

    # ---- conv2: 3 per-kh partial im2col matmuls -----------------------------
    acc2 = jnp.zeros((rows2, Cp), jnp.float32)
    for kh in range(3):
        for kw in range(3):
            t = 3 * kh + kw
            pm_ref[pl.ds(0, rows2), pl.ds(t * Cp, Cp)] = (
                mid_ref[pl.ds(kh * Wp + kw, rows2), :])
        acc2 = acc2 + jnp.dot(
            pm_ref[pl.ds(0, rows2), pl.ds(3 * kh * Cp, 3 * Cp)],
            w2_ref[pl.ds(3 * kh * Cp, 3 * Cp), :],
            preferred_element_type=jnp.float32)

    # Residual comes from the already-resident f32 padded input (no extra
    # activation stream, no bf16 rounding of the skip connection).
    res = xp_ref[0, pl.ds(base + 2 * Wp + 1, rows2), :].astype(jnp.float32)
    out_ref[0] = jnp.maximum(acc2 + b2_ref[...] + res, 0.0)


def basic_block_forward(x_nchw, params, *, eps=1e-5,
                        compute_dtype=jnp.bfloat16, row_tile=8):
    """x_nchw: (N, Cin, H, W) float32. Returns (N, Cout, H, W) float32."""
    N, Cin, H, W = x_nchw.shape
    Cout = params["w1"].shape[0]
    assert Cin == Cout, "stride=1 / downsample=None requires inplanes == planes"
    C = Cin

    LANE = 128
    Cp = _round_up(max(C, LANE), LANE)     # lane-dense channel padding
    Wp = _round_up(W + 2, 8)               # 1 left + >=1 right zero cols; 8-aligned
    # Largest divisor of H that is <= row_tile (keeps exact strips for any H).
    TH = 1
    for d in range(1, min(int(row_tile), H) + 1):
        if H % d == 0:
            TH = d
    S = H // TH
    rows1 = (TH + 2) * Wp                  # intermediate rows per strip (+halo)
    rows2 = TH * Wp                        # output rows per strip
    ROWS = (H + 5) * Wp                    # 2 top + 3 bottom zero-pad rows
    MR = _round_up(rows1 + 2, 8)           # intermediate scratch rows (+guards)

    # NCHW -> NHWC, pad channels to Cp and spatial to the lifted layout, then
    # flatten rows.  Kept in f32 (residual precision); matmul operands are
    # cast to compute_dtype only when filling the patch matrix.
    x = jnp.transpose(x_nchw, (0, 2, 3, 1)).astype(jnp.float32)
    xp = jnp.pad(x, ((0, 0), (2, 3), (1, Wp - W - 1), (0, Cp - C)))
    xp = xp.reshape(N, ROWS, Cp)

    # Fold inference-mode BatchNorm into per-channel scale/bias.
    def fold_bn(gamma, beta, mean, var):
        sc = gamma / jnp.sqrt(var + eps)
        bi = beta - mean * sc
        return sc, bi

    s1, b1 = fold_bn(params["bn1_gamma"], params["bn1_beta"],
                     params["bn1_mean"], params["bn1_var"])
    s2, b2 = fold_bn(params["bn2_gamma"], params["bn2_beta"],
                     params["bn2_mean"], params["bn2_var"])

    # PyTorch conv weights (Cout, Cin, kh, kw) -> im2col layout (9*Cp, Cp) with
    # the BN scale folded into the output-channel columns.
    def im2col_weights(w, scale):
        w = jnp.transpose(w, (2, 3, 1, 0)).astype(jnp.float32)   # (kh,kw,cin,cout)
        w = w * scale[None, None, None, :]
        w = jnp.pad(w, ((0, 0), (0, 0), (0, Cp - C), (0, Cp - C)))
        return w.reshape(9 * Cp, Cp).astype(compute_dtype)

    w1m = im2col_weights(params["w1"], s1)
    w2m = im2col_weights(params["w2"], s2)
    b1p = jnp.pad(b1, (0, Cp - C)).reshape(1, Cp).astype(jnp.float32)
    b2p = jnp.pad(b2, (0, Cp - C)).reshape(1, Cp).astype(jnp.float32)

    # Strip-invariant column-validity mask (width-pad columns behave as
    # conv2's zero padding).  Constant block index -> fetched once.
    colmask = (jnp.arange(rows1) % Wp < W).astype(jnp.float32).reshape(rows1, 1)

    # VMEM budget computed from the actual working set (double-buffered inputs
    # / output, plus scratch), clamped to sane bounds.
    cb = jnp.dtype(compute_dtype).itemsize
    vmem_need = (
        2 * ROWS * Cp * 4            # padded input block (f32), double-buffered
        + 2 * 2 * 9 * Cp * Cp * cb   # two im2col weight blocks, double-buffered
        + 2 * 2 * Cp * 4             # biases
        + 2 * rows1 * 4              # column mask
        + 2 * rows2 * Cp * 4         # output block (f32), double-buffered
        + rows1 * 9 * Cp * cb        # im2col patch scratch
        + MR * Cp * cb               # intermediate scratch
    )
    vmem_limit = max(32 << 20, min(int(1.5 * vmem_need) + (4 << 20), 128 << 20))

    kernel = functools.partial(basic_block_kernel, Wp=Wp, TH=TH, Cp=Cp, MR=MR)

    out_lifted = pl.pallas_call(
        kernel,
        out_shape=jax.ShapeDtypeStruct((N, H * Wp, Cp), jnp.float32),
        grid_spec=pltpu.PrefetchScalarGridSpec(
            num_scalar_prefetch=0,
            grid=(N, S),
            in_specs=[
                pl.BlockSpec((rows1, 1), lambda n, s: (0, 0)),          # column mask
                pl.BlockSpec((1, ROWS, Cp), lambda n, s: (n, 0, 0)),    # padded input
                pl.BlockSpec((9 * Cp, Cp), lambda n, s: (0, 0)),        # w1 (im2col*s1)
                pl.BlockSpec((1, Cp), lambda n, s: (0, 0)),             # bn1 bias
                pl.BlockSpec((9 * Cp, Cp), lambda n, s: (0, 0)),        # w2 (im2col*s2)
                pl.BlockSpec((1, Cp), lambda n, s: (0, 0)),             # bn2 bias
            ],
            out_specs=pl.BlockSpec((1, rows2, Cp), lambda n, s: (n, s, 0)),
            scratch_shapes=[
                pltpu.VMEM((rows1, 9 * Cp), compute_dtype),  # im2col patch matrix
                pltpu.VMEM((MR, Cp), compute_dtype),         # intermediate strip
            ],
        ),
        compiler_params=pltpu.CompilerParams(
            dimension_semantics=("parallel", "parallel"),
            vmem_limit_bytes=vmem_limit),
    )(colmask, xp, w1m, b1p, w2m, b2p)

    # Strip the lifted / channel-padded layout back to NCHW.
    out = out_lifted.reshape(N, H, Wp, Cp)[:, :, :W, :C]
    return jnp.transpose(out, (0, 3, 1, 2))


def init_params(key, inplanes, planes):
    k1, k2 = jax.random.split(key, 2)
    return {
        "w1": 0.1 * jax.random.normal(k1, (planes, inplanes, 3, 3), jnp.float32),
        "bn1_gamma": jnp.ones((planes,), jnp.float32),
        "bn1_beta": jnp.zeros((planes,), jnp.float32),
        "bn1_mean": jnp.zeros((planes,), jnp.float32),
        "bn1_var": jnp.ones((planes,), jnp.float32),
        "w2": 0.1 * jax.random.normal(k2, (planes, planes, 3, 3), jnp.float32),
        "bn2_gamma": jnp.ones((planes,), jnp.float32),
        "bn2_beta": jnp.zeros((planes,), jnp.float32),
        "bn2_mean": jnp.zeros((planes,), jnp.float32),
        "bn2_var": jnp.ones((planes,), jnp.float32),
    }


def _reference_forward(x_nchw, params, eps=1e-5):
    """Pure-JAX reference (lax.conv) for correctness check."""
    def conv(x, w):
        return jax.lax.conv_general_dilated(
            x, w, window_strides=(1, 1), padding=((1, 1), (1, 1)),
            dimension_numbers=("NCHW", "OIHW", "NCHW"))

    def bn(x, g, b, m, v):
        g = g[None, :, None, None]; b = b[None, :, None, None]
        m = m[None, :, None, None]; v = v[None, :, None, None]
        return (x - m) / jnp.sqrt(v + eps) * g + b

    out = conv(x_nchw, params["w1"])
    out = bn(out, params["bn1_gamma"], params["bn1_beta"],
             params["bn1_mean"], params["bn1_var"])
    out = jnp.maximum(out, 0.0)
    out = conv(out, params["w2"])
    out = bn(out, params["bn2_gamma"], params["bn2_beta"],
             params["bn2_mean"], params["bn2_var"])
    out = out + x_nchw
    return jnp.maximum(out, 0.0)


if __name__ == "__main__":
    key = jax.random.PRNGKey(0)
    kx, kp = jax.random.split(key)

    N, C, H, W = 2, 4, 16, 16          # inplanes == planes == 4, stride=1
    x = jax.random.normal(kx, (N, C, H, W), jnp.float32)
    params = init_params(kp, C, C)

    ref = _reference_forward(x, params)

    # Default path: bf16 MXU operands, f32 accumulation + f32 epilogue.
    out = jax.block_until_ready(basic_block_forward(x, params))
    assert out.shape == ref.shape
    assert jnp.allclose(out, ref, rtol=5e-2, atol=5e-2), "bf16 kernel mismatch vs reference"

    # f32 operand path: tight match against the f32 reference.
    out_f32 = jax.block_until_ready(
        basic_block_forward(x, params, compute_dtype=jnp.float32))
    assert jnp.allclose(out_f32, ref, rtol=1e-4, atol=1e-4), "f32 kernel mismatch vs reference"

    print("KERNEL_OK")
</pallas_src>

<mosaic_0001>
module attributes {stable_mosaic.version = 11 : i64} {
  func.func @basic_block_kernel(%arg0: i32, %arg1: i32, %arg2: memref<240x1xf32, #tpu.memory_space<vmem>>, %arg3: memref<1x504x128xf32, #tpu.memory_space<vmem>>, %arg4: memref<1152x128xbf16, #tpu.memory_space<vmem>>, %arg5: memref<1x128xf32, #tpu.memory_space<vmem>>, %arg6: memref<1152x128xbf16, #tpu.memory_space<vmem>>, %arg7: memref<1x128xf32, #tpu.memory_space<vmem>>, %arg8: memref<1x192x128xf32, #tpu.memory_space<vmem>>, %arg9: memref<240x1152xbf16, #tpu.memory_space<vmem>>, %arg10: memref<248x128xbf16, #tpu.memory_space<vmem>>) attributes {dimension_semantics = [#tpu.dimension_semantics<parallel>, #tpu.dimension_semantics<parallel>], iteration_bounds = array<i64: 2, 2>, scalar_prefetch = 0 : i64, scratch_operands = 2 : i64, tpu.core_type = #tpu.core_type<tc>, window_params = [{pipeline_mode = #tpu.pipeline_mode<synchronous>, transform_indices = @transform_0, window_bounds = array<i64: 240, 1>}, {transform_indices = @transform_1, window_bounds = array<i64: 1, 504, 128>}, {pipeline_mode = #tpu.pipeline_mode<synchronous>, transform_indices = @transform_2, window_bounds = array<i64: 1152, 128>}, {pipeline_mode = #tpu.pipeline_mode<synchronous>, transform_indices = @transform_3, window_bounds = array<i64: 1, 128>}, {pipeline_mode = #tpu.pipeline_mode<synchronous>, transform_indices = @transform_4, window_bounds = array<i64: 1152, 128>}, {pipeline_mode = #tpu.pipeline_mode<synchronous>, transform_indices = @transform_5, window_bounds = array<i64: 1, 128>}, {transform_indices = @transform_6, window_bounds = array<i64: 1, 192, 128>}]} {
    %c192_i32 = arith.constant 192 : i32
    %0 = arith.muli %arg1, %c192_i32 : i32
    %1 = tpu.assume_multiple %0, 8 : i32
    %cst = arith.constant 0.000000e+00 : f32
    %2 = vector.broadcast %cst : f32 to vector<240x128xf32>
    %c0_i32 = arith.constant 0 : i32
    %3 = arith.addi %1, %c0_i32 : i32
    %c0_i32_0 = arith.constant 0 : i32
    %4 = arith.addi %3, %c0_i32_0 : i32
    %c0 = arith.constant 0 : index
    %5 = arith.index_cast %4 : i32 to index
    %c0_1 = arith.constant 0 : index
    %6 = vector.load %arg3[%c0, %5, %c0_1] : memref<1x504x128xf32, #tpu.memory_space<vmem>>, vector<1x240x128xf32>
    %7 = vector.shape_cast %6 : vector<1x240x128xf32> to vector<240x128xf32>
    %8 = arith.truncf %7 : vector<240x128xf32> to vector<240x128xbf16>
    %c0_2 = arith.constant 0 : index
    %c0_3 = arith.constant 0 : index
    %9 = vector.load %arg9[%c0_2, %c0_3] : memref<240x1152xbf16, #tpu.memory_space<vmem>>, vector<240x128xbf16>
    tpu.vector_store %arg9[%c0_2, %c0_3], %8 {strides = array<i32>} : memref<240x1152xbf16, #tpu.memory_space<vmem>>, vector<240x128xbf16>,
    %c0_i32_4 = arith.constant 0 : i32
    %10 = arith.addi %1, %c0_i32_4 : i32
    %c1_i32 = arith.constant 1 : i32
    %11 = arith.addi %10, %c1_i32 : i32
    %c0_5 = arith.constant 0 : index
    %12 = arith.index_cast %11 : i32 to index
    %c0_6 = arith.constant 0 : index
    %13 = vector.load %arg3[%c0_5, %12, %c0_6] : memref<1x504x128xf32, #tpu.memory_space<vmem>>, vector<1x240x128xf32>
    %14 = vector.shape_cast %13 : vector<1x240x128xf32> to vector<240x128xf32>
    %15 = arith.truncf %14 : vector<240x128xf32> to vector<240x128xbf16>
    %c0_7 = arith.constant 0 : index
    %c128 = arith.constant 128 : index
    %16 = vector.load %arg9[%c0_7, %c128] : memref<240x1152xbf16, #tpu.memory_space<vmem>>, vector<240x128xbf16>
    tpu.vector_store %arg9[%c0_7, %c128], %15 {strides = array<i32>} : memref<240x1152xbf16, #tpu.memory_space<vmem>>, vector<240x128xbf16>,
    %c0_i32_8 = arith.constant 0 : i32
    %17 = arith.addi %1, %c0_i32_8 : i32
    %c2_i32 = arith.constant 2 : i32
    %18 = arith.addi %17, %c2_i32 : i32
    %c0_9 = arith.constant 0 : index
    %19 = arith.index_cast %18 : i32 to index
    %c0_10 = arith.constant 0 : index
    %20 = vector.load %arg3[%c0_9, %19, %c0_10] : memref<1x504x128xf32, #tpu.memory_space<vmem>>, vector<1x240x128xf32>
    %21 = vector.shape_cast %20 : vector<1x240x128xf32> to vector<240x128xf32>
    %22 = arith.truncf %21 : vector<240x128xf32> to vector<240x128xbf16>
    %c0_11 = arith.constant 0 : index
    %c256 = arith.constant 256 : index
    %23 = vector.load %arg9[%c0_11, %c256] : memref<240x1152xbf16, #tpu.memory_space<vmem>>, vector<240x128xbf16>
    tpu.vector_store %arg9[%c0_11, %c256], %22 {strides = array<i32>} : memref<240x1152xbf16, #tpu.memory_space<vmem>>, vector<240x128xbf16>,
    %c0_12 = arith.constant 0 : index
    %c0_13 = arith.constant 0 : index
    %24 = vector.load %arg9[%c0_12, %c0_13] : memref<240x1152xbf16, #tpu.memory_space<vmem>>, vector<240x384xbf16>
    %c0_14 = arith.constant 0 : index
    %c0_15 = arith.constant 0 : index
    %25 = vector.load %arg4[%c0_14, %c0_15] : memref<1152x128xbf16, #tpu.memory_space<vmem>>, vector<384x128xbf16>
    %cst_16 = arith.constant dense<0.000000e+00> : vector<240x128xf32>
    %26 = tpu.matmul %24, %25, %cst_16 {dimension_numbers = #tpu.dot_dimension_numbers<[1], [0], [0], [1], [0, 0, 1, 1], [], []>} : vector<240x384xbf16>, vector<384x128xbf16>, vector<240x128xf32> -> vector<240x128xf32>
    %27 = arith.addf %2, %26 : vector<240x128xf32>
    %c24_i32 = arith.constant 24 : i32
    %28 = arith.addi %1, %c24_i32 : i32
    %c0_i32_17 = arith.constant 0 : i32
    %29 = arith.addi %28, %c0_i32_17 : i32
    %c0_18 = arith.constant 0 : index
    %30 = arith.index_cast %29 : i32 to index
    %c0_19 = arith.constant 0 : index
    %31 = vector.load %arg3[%c0_18, %30, %c0_19] : memref<1x504x128xf32, #tpu.memory_space<vmem>>, vector<1x240x128xf32>
    %32 = vector.shape_cast %31 : vector<1x240x128xf32> to vector<240x128xf32>
    %33 = arith.truncf %32 : vector<240x128xf32> to vector<240x128xbf16>
    %c0_20 = arith.constant 0 : index
    %c384 = arith.constant 384 : index
    %34 = vector.load %arg9[%c0_20, %c384] : memref<240x1152xbf16, #tpu.memory_space<vmem>>, vector<240x128xbf16>
    tpu.vector_store %arg9[%c0_20, %c384], %33 {strides = array<i32>} : memref<240x1152xbf16, #tpu.memory_space<vmem>>, vector<240x128xbf16>,
    %c24_i32_21 = arith.constant 24 : i32
    %35 = arith.addi %1, %c24_i32_21 : i32
    %c1_i32_22 = arith.constant 1 : i32
    %36 = arith.addi %35, %c1_i32_22 : i32
    %c0_23 = arith.constant 0 : index
    %37 = arith.index_cast %36 : i32 to index
    %c0_24 = arith.constant 0 : index
    %38 = vector.load %arg3[%c0_23, %37, %c0_24] : memref<1x504x128xf32, #tpu.memory_space<vmem>>, vector<1x240x128xf32>
    %39 = vector.shape_cast %38 : vector<1x240x128xf32> to vector<240x128xf32>
    %40 = arith.truncf %39 : vector<240x128xf32> to vector<240x128xbf16>
    %c0_25 = arith.constant 0 : index
    %c512 = arith.constant 512 : index
    %41 = vector.load %arg9[%c0_25, %c512] : memref<240x1152xbf16, #tpu.memory_space<vmem>>, vector<240x128xbf16>
    tpu.vector_store %arg9[%c0_25, %c512], %40 {strides = array<i32>} : memref<240x1152xbf16, #tpu.memory_space<vmem>>, vector<240x128xbf16>,
    %c24_i32_26 = arith.constant 24 : i32
    %42 = arith.addi %1, %c24_i32_26 : i32
    %c2_i32_27 = arith.constant 2 : i32
    %43 = arith.addi %42, %c2_i32_27 : i32
    %c0_28 = arith.constant 0 : index
    %44 = arith.index_cast %43 : i32 to index
    %c0_29 = arith.constant 0 : index
    %45 = vector.load %arg3[%c0_28, %44, %c0_29] : memref<1x504x128xf32, #tpu.memory_space<vmem>>, vector<1x240x128xf32>
    %46 = vector.shape_cast %45 : vector<1x240x128xf32> to vector<240x128xf32>
    %47 = arith.truncf %46 : vector<240x128xf32> to vector<240x128xbf16>
    %c0_30 = arith.constant 0 : index
    %c640 = arith.constant 640 : index
    %48 = vector.load %arg9[%c0_30, %c640] : memref<240x1152xbf16, #tpu.memory_space<vmem>>, vector<240x128xbf16>
    tpu.vector_store %arg9[%c0_30, %c640], %47 {strides = array<i32>} : memref<240x1152xbf16, #tpu.memory_space<vmem>>, vector<240x128xbf16>,
    %c0_31 = arith.constant 0 : index
    %c384_32 = arith.constant 384 : index
    %49 = vector.load %arg9[%c0_31, %c384_32] : memref<240x1152xbf16, #tpu.memory_space<vmem>>, vector<240x384xbf16>
    %c384_33 = arith.constant 384 : index
    %c0_34 = arith.constant 0 : index
    %50 = vector.load %arg4[%c384_33, %c0_34] : memref<1152x128xbf16, #tpu.memory_space<vmem>>, vector<384x128xbf16>
    %cst_35 = arith.constant dense<0.000000e+00> : vector<240x128xf32>
    %51 = tpu.matmul %49, %50, %cst_35 {dimension_numbers = #tpu.dot_dimension_numbers<[1], [0], [0], [1], [0, 0, 1, 1], [], []>} : vector<240x384xbf16>, vector<384x128xbf16>, vector<240x128xf32> -> vector<240x128xf32>
    %52 = arith.addf %27, %51 : vector<240x128xf32>
    %c48_i32 = arith.constant 48 : i32
    %53 = arith.addi %1, %c48_i32 : i32
    %c0_i32_36 = arith.constant 0 : i32
    %54 = arith.addi %53, %c0_i32_36 : i32
    %c0_37 = arith.constant 0 : index
    %55 = arith.index_cast %54 : i32 to index
    %c0_38 = arith.constant 0 : index
    %56 = vector.load %arg3[%c0_37, %55, %c0_38] : memref<1x504x128xf32, #tpu.memory_space<vmem>>, vector<1x240x128xf32>
    %57 = vector.shape_cast %56 : vector<1x240x128xf32> to vector<240x128xf32>
    %58 = arith.truncf %57 : vector<240x128xf32> to vector<240x128xbf16>
    %c0_39 = arith.constant 0 : index
    %c768 = arith.constant 768 : index
    %59 = vector.load %arg9[%c0_39, %c768] : memref<240x1152xbf16, #tpu.memory_space<vmem>>, vector<240x128xbf16>
    tpu.vector_store %arg9[%c0_39, %c768], %58 {strides = array<i32>} : memref<240x1152xbf16, #tpu.memory_space<vmem>>, vector<240x128xbf16>,
    %c48_i32_40 = arith.constant 48 : i32
    %60 = arith.addi %1, %c48_i32_40 : i32
    %c1_i32_41 = arith.constant 1 : i32
    %61 = arith.addi %60, %c1_i32_41 : i32
    %c0_42 = arith.constant 0 : index
    %62 = arith.index_cast %61 : i32 to index
    %c0_43 = arith.constant 0 : index
    %63 = vector.load %arg3[%c0_42, %62, %c0_43] : memref<1x504x128xf32, #tpu.memory_space<vmem>>, vector<1x240x128xf32>
    %64 = vector.shape_cast %63 : vector<1x240x128xf32> to vector<240x128xf32>
    %65 = arith.truncf %64 : vector<240x128xf32> to vector<240x128xbf16>
    %c0_44 = arith.constant 0 : index
    %c896 = arith.constant 896 : index
    %66 = vector.load %arg9[%c0_44, %c896] : memref<240x1152xbf16, #tpu.memory_space<vmem>>, vector<240x128xbf16>
    tpu.vector_store %arg9[%c0_44, %c896], %65 {strides = array<i32>} : memref<240x1152xbf16, #tpu.memory_space<vmem>>, vector<240x128xbf16>,
    %c48_i32_45 = arith.constant 48 : i32
    %67 = arith.addi %1, %c48_i32_45 : i32
    %c2_i32_46 = arith.constant 2 : i32
    %68 = arith.addi %67, %c2_i32_46 : i32
    %c0_47 = arith.constant 0 : index
    %69 = arith.index_cast %68 : i32 to index
    %c0_48 = arith.constant 0 : index
    %70 = vector.load %arg3[%c0_47, %69, %c0_48] : memref<1x504x128xf32, #tpu.memory_space<vmem>>, vector<1x240x128xf32>
    %71 = vector.shape_cast %70 : vector<1x240x128xf32> to vector<240x128xf32>
    %72 = arith.truncf %71 : vector<240x128xf32> to vector<240x128xbf16>
    %c0_49 = arith.constant 0 : index
    %c1024 = arith.constant 1024 : index
    %73 = vector.load %arg9[%c0_49, %c1024] : memref<240x1152xbf16, #tpu.memory_space<vmem>>, vector<240x128xbf16>
    tpu.vector_store %arg9[%c0_49, %c1024], %72 {strides = array<i32>} : memref<240x1152xbf16, #tpu.memory_space<vmem>>, vector<240x128xbf16>,
    %c0_50 = arith.constant 0 : index
    %c768_51 = arith.constant 768 : index
    %74 = vector.load %arg9[%c0_50, %c768_51] : memref<240x1152xbf16, #tpu.memory_space<vmem>>, vector<240x384xbf16>
    %c768_52 = arith.constant 768 : index
    %c0_53 = arith.constant 0 : index
    %75 = vector.load %arg4[%c768_52, %c0_53] : memref<1152x128xbf16, #tpu.memory_space<vmem>>, vector<384x128xbf16>
    %cst_54 = arith.constant dense<0.000000e+00> : vector<240x128xf32>
    %76 = tpu.matmul %74, %75, %cst_54 {dimension_numbers = #tpu.dot_dimension_numbers<[1], [0], [0], [1], [0, 0, 1, 1], [], []>} : vector<240x384xbf16>, vector<384x128xbf16>, vector<240x128xf32> -> vector<240x128xf32>
    %77 = arith.addf %52, %76 : vector<240x128xf32>
    %c0_55 = arith.constant 0 : index
    %c0_56 = arith.constant 0 : index
    %78 = vector.load %arg5[%c0_55, %c0_56] : memref<1x128xf32, #tpu.memory_space<vmem>>, vector<1x128xf32>
    %79 = vector.broadcast %78 : vector<1x128xf32> to vector<240x128xf32>
    %80 = arith.addf %77, %79 : vector<240x128xf32>
    %cst_57 = arith.constant 0.000000e+00 : f32
    %81 = vector.broadcast %cst_57 : f32 to vector<240x128xf32>
    %82 = arith.maximumf %80, %81 : vector<240x128xf32>
    %c0_58 = arith.constant 0 : index
    %c0_59 = arith.constant 0 : index
    %83 = vector.load %arg2[%c0_58, %c0_59] : memref<240x1xf32, #tpu.memory_space<vmem>>, vector<240x1xf32>
    %84 = vector.broadcast %83 : vector<240x1xf32> to vector<240x128xf32>
    %85 = arith.mulf %82, %84 : vector<240x128xf32>
    %cst_60 = arith.constant 0.000000e+00 : bf16
    %86 = vector.broadcast %cst_60 : bf16 to vector<1x128xbf16>
    %c0_61 = arith.constant 0 : index
    %c0_62 = arith.constant 0 : index
    %87 = vector.load %arg10[%c0_61, %c0_62] : memref<248x128xbf16, #tpu.memory_space<vmem>>, vector<1x128xbf16>
    tpu.vector_store %arg10[%c0_61, %c0_62], %86 {strides = array<i32>} : memref<248x128xbf16, #tpu.memory_space<vmem>>, vector<1x128xbf16>,
    %88 = arith.truncf %85 : vector<240x128xf32> to vector<240x128xbf16>
    %c1 = arith.constant 1 : index
    %c0_63 = arith.constant 0 : index
    %89 = vector.load %arg10[%c1, %c0_63] : memref<248x128xbf16, #tpu.memory_space<vmem>>, vector<240x128xbf16>
    tpu.vector_store %arg10[%c1, %c0_63], %88 {strides = array<i32>} : memref<248x128xbf16, #tpu.memory_space<vmem>>, vector<240x128xbf16>,
    %cst_64 = arith.constant 0.000000e+00 : bf16
    %90 = vector.broadcast %cst_64 : bf16 to vector<7x128xbf16>
    %c241 = arith.constant 241 : index
    %c0_65 = arith.constant 0 : index
    %91 = vector.load %arg10[%c241, %c0_65] : memref<248x128xbf16, #tpu.memory_space<vmem>>, vector<7x128xbf16>
    tpu.vector_store %arg10[%c241, %c0_65], %90 {strides = array<i32>} : memref<248x128xbf16, #tpu.memory_space<vmem>>, vector<7x128xbf16>,
    %c0_i32_66 = arith.constant 0 : i32
    %92 = arith.cmpi eq, %arg1, %c0_i32_66 : i32
    %93 = arith.extui %92 : i1 to i32
    %c0_i32_67 = arith.constant 0 : i32
    %94 = arith.cmpi ne, %93, %c0_i32_67 : i32
    scf.if %94 {
      %cst_125 = arith.constant 0.000000e+00 : bf16
      %143 = vector.broadcast %cst_125 : bf16 to vector<24x128xbf16>
      %c1_126 = arith.constant 1 : index
      %c0_127 = arith.constant 0 : index
      %144 = vector.load %arg10[%c1_126, %c0_127] : memref<248x128xbf16, #tpu.memory_space<vmem>>, vector<24x128xbf16>
      tpu.vector_store %arg10[%c1_126, %c0_127], %143 {strides = array<i32>} : memref<248x128xbf16, #tpu.memory_space<vmem>>, vector<24x128xbf16>,
    } else {
    }
    %c1_i32_68 = arith.constant 1 : i32
    %95 = arith.cmpi eq, %arg1, %c1_i32_68 : i32
    %96 = arith.extui %95 : i1 to i32
    %c0_i32_69 = arith.constant 0 : i32
    %97 = arith.cmpi ne, %96, %c0_i32_69 : i32
    scf.if %97 {
      %cst_125 = arith.constant 0.000000e+00 : bf16
      %143 = vector.broadcast %cst_125 : bf16 to vector<24x128xbf16>
      %c217 = arith.constant 217 : index
      %c0_126 = arith.constant 0 : index
      %144 = vector.load %arg10[%c217, %c0_126] : memref<248x128xbf16, #tpu.memory_space<vmem>>, vector<24x128xbf16>
      tpu.vector_store %arg10[%c217, %c0_126], %143 {strides = array<i32>} : memref<248x128xbf16, #tpu.memory_space<vmem>>, vector<24x128xbf16>,
    } else {
    }
    %cst_70 = arith.constant 0.000000e+00 : f32
    %98 = vector.broadcast %cst_70 : f32 to vector<192x128xf32>
    %c0_71 = arith.constant 0 : index
    %c0_72 = arith.constant 0 : index
    %99 = vector.load %arg10[%c0_71, %c0_72] : memref<248x128xbf16, #tpu.memory_space<vmem>>, vector<192x128xbf16>
    %c0_73 = arith.constant 0 : index
    %c0_74 = arith.constant 0 : index
    %100 = vector.load %arg9[%c0_73, %c0_74] : memref<240x1152xbf16, #tpu.memory_space<vmem>>, vector<192x128xbf16>
    tpu.vector_store %arg9[%c0_73, %c0_74], %99 {strides = array<i32>} : memref<240x1152xbf16, #tpu.memory_space<vmem>>, vector<192x128xbf16>,
    %c1_75 = arith.constant 1 : index
    %c0_76 = arith.constant 0 : index
    %101 = vector.load %arg10[%c1_75, %c0_76] : memref<248x128xbf16, #tpu.memory_space<vmem>>, vector<192x128xbf16>
    %c0_77 = arith.constant 0 : index
    %c128_78 = arith.constant 128 : index
    %102 = vector.load %arg9[%c0_77, %c128_78] : memref<240x1152xbf16, #tpu.memory_space<vmem>>, vector<192x128xbf16>
    tpu.vector_store %arg9[%c0_77, %c128_78], %101 {strides = array<i32>} : memref<240x1152xbf16, #tpu.memory_space<vmem>>, vector<192x128xbf16>,
    %c2 = arith.constant 2 : index
    %c0_79 = arith.constant 0 : index
    %103 = vector.load %arg10[%c2, %c0_79] : memref<248x128xbf16, #tpu.memory_space<vmem>>, vector<192x128xbf16>
    %c0_80 = arith.constant 0 : index
    %c256_81 = arith.constant 256 : index
    %104 = vector.load %arg9[%c0_80, %c256_81] : memref<240x1152xbf16, #tpu.memory_space<vmem>>, vector<192x128xbf16>
    tpu.vector_store %arg9[%c0_80, %c256_81], %103 {strides = array<i32>} : memref<240x1152xbf16, #tpu.memory_space<vmem>>, vector<192x128xbf16>,
    %c0_82 = arith.constant 0 : index
    %c0_83 = arith.constant 0 : index
    %105 = vector.load %arg9[%c0_82, %c0_83] : memref<240x1152xbf16, #tpu.memory_space<vmem>>, vector<192x384xbf16>
    %c0_84 = arith.constant 0 : index
    %c0_85 = arith.constant 0 : index
    %106 = vector.load %arg6[%c0_84, %c0_85] : memref<1152x128xbf16, #tpu.memory_space<vmem>>, vector<384x128xbf16>
    %cst_86 = arith.constant dense<0.000000e+00> : vector<192x128xf32>
    %107 = tpu.matmul %105, %106, %cst_86 {dimension_numbers = #tpu.dot_dimension_numbers<[1], [0], [0], [1], [0, 0, 1, 1], [], []>} : vector<192x384xbf16>, vector<384x128xbf16>, vector<192x128xf32> -> vector<192x128xf32>
    %108 = arith.addf %98, %107 : vector<192x128xf32>
    %c24 = arith.constant 24 : index
    %c0_87 = arith.constant 0 : index
    %109 = vector.load %arg10[%c24, %c0_87] : memref<248x128xbf16, #tpu.memory_space<vmem>>, vector<192x128xbf16>
    %c0_88 = arith.constant 0 : index
    %c384_89 = arith.constant 384 : index
    %110 = vector.load %arg9[%c0_88, %c384_89] : memref<240x1152xbf16, #tpu.memory_space<vmem>>, vector<192x128xbf16>
    tpu.vector_store %arg9[%c0_88, %c384_89], %109 {strides = array<i32>} : memref<240x1152xbf16, #tpu.memory_space<vmem>>, vector<192x128xbf16>,
    %c25 = arith.constant 25 : index
    %c0_90 = arith.constant 0 : index
    %111 = vector.load %arg10[%c25, %c0_90] : memref<248x128xbf16, #tpu.memory_space<vmem>>, vector<192x128xbf16>
    %c0_91 = arith.constant 0 : index
    %c512_92 = arith.constant 512 : index
    %112 = vector.load %arg9[%c0_91, %c512_92] : memref<240x1152xbf16, #tpu.memory_space<vmem>>, vector<192x128xbf16>
    tpu.vector_store %arg9[%c0_91, %c512_92], %111 {strides = array<i32>} : memref<240x1152xbf16, #tpu.memory_space<vmem>>, vector<192x128xbf16>,
    %c26 = arith.constant 26 : index
    %c0_93 = arith.constant 0 : index
    %113 = vector.load %arg10[%c26, %c0_93] : memref<248x128xbf16, #tpu.memory_space<vmem>>, vector<192x128xbf16>
    %c0_94 = arith.constant 0 : index
    %c640_95 = arith.constant 640 : index
    %114 = vector.load %arg9[%c0_94, %c640_95] : memref<240x1152xbf16, #tpu.memory_space<vmem>>, vector<192x128xbf16>
    tpu.vector_store %arg9[%c0_94, %c640_95], %113 {strides = array<i32>} : memref<240x1152xbf16, #tpu.memory_space<vmem>>, vector<192x128xbf16>,
    %c0_96 = arith.constant 0 : index
    %c384_97 = arith.constant 384 : index
    %115 = vector.load %arg9[%c0_96, %c384_97] : memref<240x1152xbf16, #tpu.memory_space<vmem>>, vector<192x384xbf16>
    %c384_98 = arith.constant 384 : index
    %c0_99 = arith.constant 0 : index
    %116 = vector.load %arg6[%c384_98, %c0_99] : memref<1152x128xbf16, #tpu.memory_space<vmem>>, vector<384x128xbf16>
    %cst_100 = arith.constant dense<0.000000e+00> : vector<192x128xf32>
    %117 = tpu.matmul %115, %116, %cst_100 {dimension_numbers = #tpu.dot_dimension_numbers<[1], [0], [0], [1], [0, 0, 1, 1], [], []>} : vector<192x384xbf16>, vector<384x128xbf16>, vector<192x128xf32> -> vector<192x128xf32>
    %118 = arith.addf %108, %117 : vector<192x128xf32>
    %c48 = arith.constant 48 : index
    %c0_101 = arith.constant 0 : index
    %119 = vector.load %arg10[%c48, %c0_101] : memref<248x128xbf16, #tpu.memory_space<vmem>>, vector<192x128xbf16>
    %c0_102 = arith.constant 0 : index
    %c768_103 = arith.constant 768 : index
    %120 = vector.load %arg9[%c0_102, %c768_103] : memref<240x1152xbf16, #tpu.memory_space<vmem>>, vector<192x128xbf16>
    tpu.vector_store %arg9[%c0_102, %c768_103], %119 {strides = array<i32>} : memref<240x1152xbf16, #tpu.memory_space<vmem>>, vector<192x128xbf16>,
    %c49 = arith.constant 49 : index
    %c0_104 = arith.constant 0 : index
    %121 = vector.load %arg10[%c49, %c0_104] : memref<248x128xbf16, #tpu.memory_space<vmem>>, vector<192x128xbf16>
    %c0_105 = arith.constant 0 : index
    %c896_106 = arith.constant 896 : index
    %122 = vector.load %arg9[%c0_105, %c896_106] : memref<240x1152xbf16, #tpu.memory_space<vmem>>, vector<192x128xbf16>
    tpu.vector_store %arg9[%c0_105, %c896_106], %121 {strides = array<i32>} : memref<240x1152xbf16, #tpu.memory_space<vmem>>, vector<192x128xbf16>,
    %c50 = arith.constant 50 : index
    %c0_107 = arith.constant 0 : index
    %123 = vector.load %arg10[%c50, %c0_107] : memref<248x128xbf16, #tpu.memory_space<vmem>>, vector<192x128xbf16>
    %c0_108 = arith.constant 0 : index
    %c1024_109 = arith.constant 1024 : index
    %124 = vector.load %arg9[%c0_108, %c1024_109] : memref<240x1152xbf16, #tpu.memory_space<vmem>>, vector<192x128xbf16>
    tpu.vector_store %arg9[%c0_108, %c1024_109], %123 {strides = array<i32>} : memref<240x1152xbf16, #tpu.memory_space<vmem>>, vector<192x128xbf16>,
    %c0_110 = arith.constant 0 : index
    %c768_111 = arith.constant 768 : index
    %125 = vector.load %arg9[%c0_110, %c768_111] : memref<240x1152xbf16, #tpu.memory_space<vmem>>, vector<192x384xbf16>
    %c768_112 = arith.constant 768 : index
    %c0_113 = arith.constant 0 : index
    %126 = vector.load %arg6[%c768_112, %c0_113] : memref<1152x128xbf16, #tpu.memory_space<vmem>>, vector<384x128xbf16>
    %cst_114 = arith.constant dense<0.000000e+00> : vector<192x128xf32>
    %127 = tpu.matmul %125, %126, %cst_114 {dimension_numbers = #tpu.dot_dimension_numbers<[1], [0], [0], [1], [0, 0, 1, 1], [], []>} : vector<192x384xbf16>, vector<384x128xbf16>, vector<192x128xf32> -> vector<192x128xf32>
    %128 = arith.addf %118, %127 : vector<192x128xf32>
    %c48_i32_115 = arith.constant 48 : i32
    %129 = arith.addi %1, %c48_i32_115 : i32
    %c1_i32_116 = arith.constant 1 : i32
    %130 = arith.addi %129, %c1_i32_116 : i32
    %c0_117 = arith.constant 0 : index
    %131 = arith.index_cast %130 : i32 to index
    %c0_118 = arith.constant 0 : index
    %132 = vector.load %arg3[%c0_117, %131, %c0_118] : memref<1x504x128xf32, #tpu.memory_space<vmem>>, vector<1x192x128xf32>
    %133 = vector.shape_cast %132 : vector<1x192x128xf32> to vector<192x128xf32>
    %c0_119 = arith.constant 0 : index
    %c0_120 = arith.constant 0 : index
    %134 = vector.load %arg7[%c0_119, %c0_120] : memref<1x128xf32, #tpu.memory_space<vmem>>, vector<1x128xf32>
    %135 = vector.broadcast %134 : vector<1x128xf32> to vector<192x128xf32>
    %136 = arith.addf %128, %135 : vector<192x128xf32>
    %137 = arith.addf %136, %133 : vector<192x128xf32>
    %cst_121 = arith.constant 0.000000e+00 : f32
    %138 = vector.broadcast %cst_121 : f32 to vector<192x128xf32>
    %139 = arith.maximumf %137, %138 : vector<192x128xf32>
    %c0_122 = arith.constant 0 : index
    %c0_123 = arith.constant 0 : index
    %c0_124 = arith.constant 0 : index
    %140 = vector.load %arg8[%c0_122, %c0_123, %c0_124] : memref<1x192x128xf32, #tpu.memory_space<vmem>>, vector<1x192x128xf32>
    %141 = vector.shape_cast %140 : vector<1x192x128xf32> to vector<192x128xf32>
    %142 = vector.shape_cast %139 : vector<192x128xf32> to vector<1x192x128xf32>
    tpu.vector_store %arg8[%c0_122, %c0_123, %c0_124], %142 {strides = array<i32>} : memref<1x192x128xf32, #tpu.memory_space<vmem>>, vector<1x192x128xf32>,
    return
  }
  func.func @transform_0(%arg0: i32, %arg1: i32) -> (i32, i32) {
    %c0_i32 = arith.constant 0 : i32
    %c0_i32_0 = arith.constant 0 : i32
    %c0_i32_1 = arith.constant 0 : i32
    return %c0_i32, %c0_i32_0 : i32, i32
  }
  func.func @transform_1(%arg0: i32, %arg1: i32) -> (i32, i32, i32) {
    %c0_i32 = arith.constant 0 : i32
    %c0_i32_0 = arith.constant 0 : i32
    %c0_i32_1 = arith.constant 0 : i32
    return %arg0, %c0_i32, %c0_i32_0 : i32, i32, i32
  }
  func.func @transform_2(%arg0: i32, %arg1: i32) -> (i32, i32) {
    %c0_i32 = arith.constant 0 : i32
    %c0_i32_0 = arith.constant 0 : i32
    %c0_i32_1 = arith.constant 0 : i32
    return %c0_i32, %c0_i32_0 : i32, i32
  }
  func.func @transform_3(%arg0: i32, %arg1: i32) -> (i32, i32) {
    %c0_i32 = arith.constant 0 : i32
    %c0_i32_0 = arith.constant 0 : i32
    %c0_i32_1 = arith.constant 0 : i32
    return %c0_i32, %c0_i32_0 : i32, i32
  }
  func.func @transform_4(%arg0: i32, %arg1: i32) -> (i32, i32) {
    %c0_i32 = arith.constant 0 : i32
    %c0_i32_0 = arith.constant 0 : i32
    %c0_i32_1 = arith.constant 0 : i32
    return %c0_i32, %c0_i32_0 : i32, i32
  }
  func.func @transform_5(%arg0: i32, %arg1: i32) -> (i32, i32) {
    %c0_i32 = arith.constant 0 : i32
    %c0_i32_0 = arith.constant 0 : i32
    %c0_i32_1 = arith.constant 0 : i32
    return %c0_i32, %c0_i32_0 : i32, i32
  }
  func.func @transform_6(%arg0: i32, %arg1: i32) -> (i32, i32, i32) {
    %c0_i32 = arith.constant 0 : i32
    %c0_i32_0 = arith.constant 0 : i32
    return %arg0, %arg1, %c0_i32 : i32, i32, i32
  }
}

</mosaic_0001>

<bundles_post_ra>
// kernel: tpu_custom_call.1
= control target key start
LH: loop header
LB: loop body
LE: loop exit
PB: predicated region body
PF: predicated region fallthrough
CT: control target
= control target key end

     0   :  { %s11446_s0 = inlined_call_operand.vmem [shape: f32[240,1], index: 0, kind: input, shape index: {}]   ;;  %s11447_s1 = inlined_call_operand.hbm [shape: f32[2,504,128], index: 1, kind: input, shape index: {}]   ;;  %s11448_s2 = inlined_call_operand.hbm [shape: bf16[1152,128], index: 2, kind: input, shape index: {}]   ;;  %s11449_s3 = inlined_call_operand.vmem [shape: f32[1,128], index: 3, kind: input, shape index: {}]   ;;  %s11450_s4 = inlined_call_operand.hbm [shape: bf16[1152,128], index: 4, kind: input, shape index: {}]   ;;  %s11451_s5 = inlined_call_operand.vmem [shape: f32[1,128], index: 5, kind: input, shape index: {}]   ;;  %s11452_s6 = inlined_call_operand.hbm [shape: f32[2,384,128], index: 6, kind: output, shape index: {}]  }
   0x1   :  { %11566 = sst [smem:[#allocation75_spill]] %s11448_s2 }
   0x2   :  { %11567 = sst [smem:[#allocation76_spill]] %s11450_s4 }
   0x3   :  { %11568 = sst [smem:[#allocation77_spill]] %s11452_s6 }
   0x4   :  { %11 = vsyncpa [#allocation5], 0 }
   0x5   :  { %13 = vsyncpa [#allocation5 + $0x1], 0 }
   0x6   :  { %14 = vsyncpa [#allocation8], 0 }
   0x7   :  { %15 = vsyncpa [#allocation6], 0 }
   0x8   :  { %17 = vsyncpa [#allocation6 + $0x1], 0  ;;  %s8860_s21 = smov 0   ;;  %s8862_s22 = smov 0  }
   0x9   :  { %s8864_s23 = smov 0   ;;  %s8866_s24 = smov 0  }
   0xa   :  { %s8868_s25 = smov 0   ;;  %s8870_s26 = smov 0  }
   0xb   :  { %s8872_s27 = smov 0   ;;  %s8874_s28 = smov 0  }
   0xc   :  { %s8876_s29 = smov 0   ;;  %s8878_s30 = smov 0  }
   0xd   :  { %s8880_s7 = smov 0  }
   0xe LB: > { %11569 = sst [smem:[#allocation14_spill]] %s8768_s21  ;;  %s6402_s8 = sadd.s32 4294967295, %s8808_s7   ;;  %s8808_s7 = sphi %s8880_s7, %s23_s7   ;;  %s8804_s30 = sphi %s8878_s30, %s11941_s30   ;;  %s8800_s29 = sphi %s8876_s29, %s11932_s29   ;;  %s8796_s28 = sphi %s8874_s28, %s11940_s28   ;;  %s8792_s27 = sphi %s8872_s27, %s11931_s27   ;;  %s8788_s26 = sphi %s8870_s26, %s11939_s26   ;;  %s8784_s25 = sphi %s8868_s25, %s11938_s25   ;;  %s8780_s24 = sphi %s8866_s24, %s11937_s24   ;;  %s8776_s23 = sphi %s8864_s23, %s11936_s23   ;;  %s8772_s22 = sphi %s8862_s22, %s11935_s22   ;;  %s8768_s21 = sphi %s8860_s21, %s11934_s21  }
   0xf   : > { %11570 = sst [smem:[#allocation15_spill]] %s8796_s28  ;;  %s6403_s9 = sadd.s32 4294967294, %s8808_s7  }
  0x10   : > { %11571 = sst [smem:[#allocation16_spill]] %s8800_s29  ;;  %p76_p0 = scmp.ne.s32.totalorder %s8784_s25, %s8780_s24 }
  0x11   : > { %p8916_p1 = scmp.eq.s32.totalorder %s6402_s8, 0  ;;  %p185_p2 = scmp.ne.s32.totalorder %s8776_s23, %s8772_s22 }
  0x12   : > { %p186_p4 = scmp.eq.s32.totalorder %s6402_s8, 3  ;;  %p191_p5 = scmp.ne.s32.totalorder %s8772_s22, %s8768_s21 }
  0x13   : > { %s11572_s10 = scalar_select %p8916_p1, 1, 0 }
  0x14   : > { %p8925_p3 = por %p8916_p1, %p76_p0  ;;  %p192_p6 = scmp.eq.s32.totalorder %s6403_s9, 3 }
  0x15   : > { %p8931_p7 = por %p186_p4, %p185_p2  ;;  %p6404_p8 = scmp.ge.s32.totalorder %s8808_s7, 1 }
  0x16   : > { %s11573_s12 = scalar_select %p8925_p3, 1, 0 }
  0x17   : > { %s11574_s13 = scalar_select %p8931_p7, 1, 0 }
  0x18   : > { %p8936_p9 = por %p192_p6, %p191_p5  ;;  %p199_p10 = scmp.lt.s32.totalorder %s8808_s7, 5 }
  0x19   : > { %11575 = sst [smem:[#allocation17_spill]] %s11574_s13  ;;  %s8810_s16 = smov [#allocation7]  }
  0x1a   : > { %s11576_s14 = scalar_select %p8936_p9, 1, 0 }
  0x1b   : > { %p8941_p11 = pnand %p6404_p8, %p199_p10  ;;  %s214_s17 = sshll.u32 %s8810_s16, 4  ;;  %s215_s17 = int_to_ptr.vmem [resolvable:$true] %s214_s17 }
  0x1c   : > { %11577 = sst [smem:[#allocation18_spill]] %s11576_s14  ;;  %s8811_s19 = smov [#allocation9]  }
  0x1d   : > { %s11578_s15 = scalar_select %p8941_p11, 1, 0 }
  0x1e   : > { %p8213_p12 = pneg %p8941_p11  ;;  %s230_s20 = sshll.u32 %s8811_s19, 4  ;;  %s8953_s20 = int_to_ptr.vmem [resolvable:$true] %s230_s20 }
  0x1f   : > { %s11580_s2 = sld [smem:[#allocation75_spill]] }
  0x20   : > { %p8949_p13 = pnand %p8213_p12, %p8916_p1 }
  0x22   : > { %p8598_p2 = pneg %p8949_p13 }
  0x25   : > { %s8596_s9 = scalar_lea.hbm %s11580_s2, 9216 }
  0x26   : > { %p8597_p0 = scmp.ne.s32.totalorder %s11580_s2, %s8596_s9  ;;  %p8603_p6 = scmp.lt.u32.totalorder %s8596_s9, %s11580_s2 }
  0x28   : > { %p8599_p4 = pnand %p8598_p2, %p8597_p0 }
  0x2a   : > { %p8600_p5 = pneg %p8599_p4 }
  0x2c   : > { %p8605_p8 = pnand %p8603_p6, %p8600_p5 }
  0x2e   : > { %8608 = shalt.err (!%p8605_p8)
}
  0x2f   : > { %s8609_s19 = scalar_lea.vmem %s215_s17, 9216  ;;  %p8617_p7 = scmp.lt.s32.totalorder %s215_s17, %s215_s17 }
  0x30   : > { %p8610_p10 = scmp.ne.s32.totalorder %s215_s17, %s8609_s19  ;;  %p8618_p1 = scmp.lt.s32.totalorder %s8609_s19, %s8609_s19 }
  0x32   : > { %p8612_p12 = pnand %p8610_p10, %p8598_p2  ;;  %p8619_p3 = por %p8618_p1, %p8617_p7 }
  0x34   : > { %p8613_p9 = pneg %p8612_p12 }
  0x36   : > { %p8620_p11 = pnand %p8619_p3, %p8613_p9 }
  0x38   : > { %8623 = shalt.err (!%p8620_p11)
}
  0x39   : > { %s8812_s11 = smov 64   ;;  %s8813_s24 = smov 4  }
  0x3a   : > { %8216 = dma.hbm_to_vmem [thread:$0]  (!%p8949_p13), %s11580_s2, 9216, %s215_s17, [#allocation8], %s8812_s11, %s8812_s11, %s8813_s24  }
  0x3b   : > { %s11581_s4 = sld [smem:[#allocation76_spill]] }
  0x41   : > { %s8624_s16 = scalar_lea.hbm %s11581_s4, 9216 }
  0x42   : > { %p8625_p0 = scmp.ne.s32.totalorder %s11581_s4, %s8624_s16  ;;  %p8631_p7 = scmp.lt.u32.totalorder %s8624_s16, %s11581_s4 }
  0x44   : > { %p8627_p1 = pnand %p8625_p0, %p8598_p2 }
  0x46   : > { %p8628_p3 = pneg %p8627_p1 }
  0x48   : > { %p8633_p9 = pnand %p8631_p7, %p8628_p3 }
  0x4a   : > { %8636 = shalt.err (!%p8633_p9)
}
  0x4b   : > { %s8637_s17 = scalar_lea.vmem %s8953_s20, 9216  ;;  %p8645_p6 = scmp.lt.s32.totalorder %s8953_s20, %s8953_s20 }
  0x4c   : > { %p8638_p11 = scmp.ne.s32.totalorder %s8953_s20, %s8637_s17  ;;  %p8646_p8 = scmp.lt.s32.totalorder %s8637_s17, %s8637_s17 }
  0x4e   : > { %p8640_p4 = pnand %p8638_p11, %p8598_p2  ;;  %p8647_p10 = por %p8646_p8, %p8645_p6 }
  0x50   : > { %p8641_p5 = pneg %p8640_p4 }
  0x52   : > { %p8648_p12 = pnand %p8647_p10, %p8641_p5 }
  0x54   : > { %8651 = shalt.err (!%p8648_p12)
}
  0x55   : > { %8219 = dma.hbm_to_vmem [thread:$0]  (!%p8949_p13), %s11581_s4, 9216, %s8953_s20, [#allocation8], %s8812_s11, %s8812_s11, %s8813_s24  }
  0x56   : > { %s32_s13 = sadd.s32 1, %s8800_s29  ;;  %s35_s21 = sadd.s32 1, %s8804_s30 }
  0x57   : > { %p33_p2 = scmp.ge.s32.totalorder %s32_s13, 2  ;;  %s63_s18 = sadd.s32 1, %s8788_s26 }
  0x58   : > { %p70_p0 = scmp.ne.s32.totalorder %s8788_s26, %s8784_s25  ;;  %p71_p1 = scmp.eq.s32.totalorder %s8808_s7, 0 }
  0x59   : > { %s11943_s13 = smov (%p33_p2, %s32_s13), 0  ;;  %s11945_s21 = smov (!%p33_p2, %s35_s21), %s8804_s30 }
  0x5a   : > { %11582 = sst [smem:[#allocation19_spill]] %s11943_s13  ;;  %p9011_p3 = por %p71_p1, %p70_p0 }
  0x5b   : > { %s171_s8 = ssub.s32 %s8800_s29, %s11943_s13  ;;  %p37_p13 = scmp.ge.s32.totalorder %s11945_s21, 2 }
  0x5c   : > { %p8230_p7 = scmp.lt.s32.totalorder %s8808_s7, 4  ;;  %s247_s20 = sand.u32 1, %s8788_s26  }
  0x5d   : > { %s8197_s11 = smul.u32 8064, %s8804_s30  ;;  %s11947_s21 = smov (%p37_p13, %s11945_s21), 0 }
  0x5e   : > { %s8196_s24 = smul.u32 504, %s247_s20  ;;  %s60_s9 = ssub.s32 %s8804_s30, %s11947_s21 }
  0x5f   : > { %s9027_s17 = scalar_lea.hbm %s11447_s1, %s8197_s11  ;;  %p61_p9 = scmp.eq.s32.totalorder %s60_s9, 0 }
  0x60   : > { %s172_s6 = sor.u32 %s171_s8, %s60_s9  ;;  %s11584_s2 = sadd.s32 1, %s8776_s23 }
  0x61   : > { %p173_p11 = scmp.eq.s32.totalorder %s172_s6, 0  ;;  %s251_s13 = scalar_lea.vmem [#allocation4], %s8196_s24 }
  0x62   : > { %s9030_s28 = scalar_select %p61_p9, %s8788_s26, %s63_s18  }
  0x63   : > { %s9035_s4 = scalar_select %p173_p11, %s8776_s23, %s11584_s2  }
  0x64   : > { %s258_s29 = sshll.u32 %s251_s13, 4  ;;  %p9041_p4 = pnand %p8230_p7, %p9011_p3  ;;  %s9045_s29 = int_to_ptr.vmem [resolvable:$true] %s258_s29 }
  0x65   : > { %s9047_s8 = scalar_lea.sflag [#allocation5], %s247_s20  ;;  %s8652_s18 = scalar_lea.hbm %s9027_s17, 8064 }
  0x66   : > { %p8653_p5 = scmp.ne.s32.totalorder %s9027_s17, %s8652_s18  ;;  %p8654_p6 = pneg %p9041_p4 }
  0x67   : > { %s8657_s14 = scalar_lea.hbm %s11447_s1, 16128  ;;  %p8658_p12 = scmp.lt.u32.totalorder %s9027_s17, %s11447_s1 }
  0x68   : > { %p8655_p8 = pnand %p8654_p6, %p8653_p5  ;;  %p8659_p2 = scmp.lt.u32.totalorder %s8657_s14, %s8652_s18 }
  0x69   : > { %p8661_p1 = scmp.lt.u32.totalorder %s8652_s18, %s9027_s17 }
  0x6a   : > { %p8656_p10 = pneg %p8655_p8  ;;  %p8660_p0 = por %p8659_p2, %p8658_p12 }
  0x6c   : > { %p8662_p3 = por %p8661_p1, %p8660_p0 }
  0x6e   : > { %p8663_p13 = pnand %p8662_p3, %p8656_p10 }
  0x70   : > { %8666 = shalt.err (!%p8663_p13)
}
  0x71   : > { %s8667_s20 = scalar_lea.vmem %s9045_s29, 8064  ;;  %s8814_s9 = smov [#allocation4]  }
  0x72   : > { %p8668_p7 = scmp.ne.s32.totalorder %s9045_s29, %s8667_s20  ;;  %s8672_s19 = sshll.u32 %s8814_s9, 4  ;;  %s8673_s19 = int_to_ptr.vmem [resolvable:$false] %s8672_s19 }
  0x73   : > { %s8674_s6 = scalar_lea.vmem %s8673_s19, 16128  ;;  %p8675_p5 = scmp.lt.s32.totalorder %s9045_s29, %s8673_s19 }
  0x74   : > { %p8670_p9 = pnand %p8668_p7, %p8654_p6  ;;  %p8676_p8 = scmp.lt.s32.totalorder %s8674_s6, %s8667_s20 }
  0x76   : > { %p8671_p11 = pneg %p8670_p9  ;;  %p8677_p12 = por %p8676_p8, %p8675_p5 }
  0x78   : > { %p8678_p2 = pnand %p8677_p12, %p8671_p11 }
  0x7a   : > { %8681 = shalt.err (!%p8678_p2)
}
  0x7b   : > { %s8815_s18 = smov 128   ;;  %s8816_s2 = smov 8  }
  0x7c   : > { %8223 = dma.hbm_to_vmem [thread:$0]  (!%p9041_p4), %s9027_s17, 8064, %s9045_s29, %s9047_s8, %s8815_s18, %s8815_s18, %s8816_s2  }
  0x7d   : > { %p11586_p6 = scmp.ne.s32.totalorder %s11578_s15, 0 }
  0x7f   : > { %270 = sbr.rel (%p11586_p6) target bundleno = 1270 (0x4f6), region = 44 }
  0x86   : > { %s272_s13 = sand.u32 1, %s8784_s25   ;;  %p11587_p10 = scmp.ne.s32.totalorder %s11573_s12, 0 }
  0x87   : > { %s9078_s14 = smul.u32 504, %s272_s13  ;;  %s273_s11 = scalar_lea.sflag [#allocation5], %s272_s13 }
  0x89   : > { %s276_s24 = scalar_lea.vmem [#allocation4], %s9078_s14 }
  0x8a   : > { %8755 = dma.done.wait (%p11587_p10), %s273_s11, 8064  }
  0x8b   : > { %8757 = vsyncadd (%p11587_p10), %s273_s11, 4294959232  ;;  %p11588_p0 = scmp.ne.s32.totalorder %s11572_s10, 0 }
  0x8d   : > { %8759 = dma.done.wait (%p11588_p0), [#allocation8], 18432  }
  0x8e   : > { %8761 = vsyncadd (%p11588_p0), [#allocation8], 4294948864  ;;  %s310_s29 = sand.u32 1, %s8772_s22   ;;  %v11466_v0 = vmov 0.0   ;;  %vm8818_vm0 = vmmov 0   ;;  %v8337_v1 = vld [vmem:[#allocation7 + $0x100] sm:$0xff]  }
  0x8f   : > { %s9092_s15 = smul.u32 192, %s310_s29  ;;  %7712 = vmatprep.subr.bf16.mxu1 %v11466_v0  ;;  %7728 = vmatprep.mubr.msk.bf16.mxu1 %vm8818_vm0, %v11466_v0  ;;  %v8338_v2 = vld [vmem:[#allocation7 + $0xc0] sm:$0xff]   ;;  %v8340_v4 = vld [vmem:[#allocation7 + $0x108] sm:$0xff]   ;;  %v8343_v7 = vld [vmem:[#allocation7 + $0x110] sm:$0xff]   ;;  %vm2809_vm1 = vcmask 1040384   ;;  %vm3207_vm4 = vcmask 1043456  }
  0x90   : > { %7001 = vmatprep.subr.bf16.mxu0 %v8337_v1  ;;  %v8339_v3 = vld [vmem:[#allocation7 + $0x140] sm:$0xff]   ;;  %v8341_v5 = vld [vmem:[#allocation7 + $0xc8] sm:$0xff]   ;;  %v8344_v8 = vld [vmem:[#allocation7 + $0xd0] sm:$0xff]   ;;  %s315_s10 = smul.u32 192, %s8792_s27  ;;  %vm2810_vm2 = vsmask.f32 256 }
  0x91   : > { %7002 = vmatpush3.bf16.msra.mxu0 %v8338_v2  ;;  %7713 = vmatpush3.bf16.msra.mxu1 %v8339_v3  ;;  %v8342_v6 = vld [vmem:[#allocation7 + $0x148] sm:$0xff]   ;;  %v8345_v9 = vld [vmem:[#allocation7 + $0x150] sm:$0xff]   ;;  %v8346_v10 = vld [vmem:[#allocation7 + $0x118] sm:$0xff]   ;;  %vm3208_vm5 = vsmask.f32 7938  ;;  %s10824_s2 = scalar_lea.vmem [#allocation10], %s9092_s15 }
  0x92   : > { %7003 = vmatprep.subr.bf16.mxu0 %v8340_v4  ;;  %7714 = vmatprep.subr.bf16.mxu1 %v11466_v0  ;;  %v8347_v11 = vld [vmem:[#allocation7 + $0xd8] sm:$0xff]   ;;  %v8349_v13 = vld [vmem:[#allocation7 + $0x120] sm:$0xff]   ;;  %v8352_v16 = vld [vmem:[#allocation7 + $0x128] sm:$0xff]   ;;  %s9105_s12 = scalar_lea.vmem %s276_s24, %s315_s10 [#allocation4]  ;;  %vm2905_vm6 = vsmask.f32 4368  ;;  %p6755_p4 = scmp.ne.s32.totalorder %s8792_s27, 0 }
  0x93   : > { %v8348_v12 = vld [vmem:[#allocation7 + $0x158] sm:$0xff]   ;;  %v8350_v14 = vld [vmem:[#allocation7 + $0xe0] sm:$0xff]   ;;  %v8353_v17 = vld [vmem:[#allocation7 + $0xe8] sm:$0xff]  }
  0x94   : > { %v8351_v15 = vld [vmem:[#allocation7 + $0x160] sm:$0xff]   ;;  %v8354_v18 = vld [vmem:[#allocation7 + $0x168] sm:$0xff]   ;;  %v8355_v19 = vld [vmem:[#allocation7 + $0x130] sm:$0xff]  }
  0x95   : > { %7004 = vmatpush3.bf16.msra.mxu0 %v8341_v5  ;;  %7715 = vmatpush3.bf16.msra.mxu1 %v8342_v6  ;;  %v8356_v20 = vld [vmem:[#allocation7 + $0xf0] sm:$0xff]   ;;  %v8358_v22 = vld [vmem:[#allocation7 + $0x138] sm:$0xff]   ;;  %v8361_v34 = vld [vmem:[#allocation7 + $0x40] sm:$0xff]  }
  0x96   : > { %7005 = vmatprep.subr.bf16.mxu0 %v8343_v7  ;;  %7716 = vmatprep.subr.bf16.mxu1 %v11466_v0  ;;  %v8357_v21 = vld [vmem:[#allocation7 + $0x170] sm:$0xff]   ;;  %v8359_v28 = vld [vmem:[#allocation7 + $0xf8] sm:$0xff]   ;;  %v8362_v35 = vld [vmem:[#allocation7] sm:$0xff]  }
  0x97   : > { %v9108_v23 = vld [vmem:[%s9105_s12 + $0x19] sm:$0xff]  ;;  %v9111_v24 = vld [vmem:[%s9105_s12 + $0x21] sm:$0xff]  ;;  %v9134_v36 = vld [vmem:[%s9105_s12 + $0x29] sm:$0xff] }
  0x98   : > { %11589 = vst [vmem:[#allocation20_spill] sm:$0xff] %v9111_v24  ;;  %v9114_v25 = vld [vmem:[%s9105_s12 + $0x18] sm:$0xff]  ;;  %v688_v26 = vpack.c.bf16 %v9111_v24, %v9108_v23  ;;  %v9120_v27 = vld [vmem:[%s9105_s12 + $0x20] sm:$0xff]  ;;  %11592 = vst [vmem:[#allocation23_spill] sm:$0xff] %v9134_v36 }
  0x99   : > { %7006 = vmatpush3.bf16.msra.mxu0 %v8344_v8  ;;  %7717 = vmatpush3.bf16.msra.mxu1 %v8345_v9  ;;  %11590 = vst [vmem:[#allocation21_spill] sm:$0xff] %v9120_v27  ;;  %v626_v29 = vpack.c.bf16 %v9120_v27, %v9114_v25  ;;  %v9125_v30 = vld [vmem:[%s9105_s12 + $0x1a] sm:$0xff]  ;;  %v9128_v31 = vld [vmem:[%s9105_s12 + $0x22] sm:$0xff]  ;;  %v9137_v37 = vld [vmem:[%s9105_s12 + $0x31] sm:$0xff] }
  0x9a   : > { %7007 = vmatprep.subr.bf16.mxu0 %v8346_v10  ;;  %7718 = vmatprep.subr.bf16.mxu1 %v11466_v0  ;;  %11591 = vst [vmem:[#allocation22_spill] sm:$0xff] %v9128_v31  ;;  %v8360_v32 = vld [vmem:[#allocation7 + $0x178] sm:$0xff]   ;;  %v750_v33 = vpack.c.bf16 %v9128_v31, %v9125_v30  ;;  %11593 = vst [vmem:[#allocation24_spill] sm:$0xff] %v9137_v37  ;;  %v8363_v39 = vld [vmem:[#allocation7 + $0x80] sm:$0xff]   ;;  %v689_v40 = vpack.c.bf16 %v9137_v37, %v9134_v36 }
  0x9b   : > { %1049 = vmatprep.mubr.bf16.mxu0 %v688_v26  ;;  %v9140_v38 = vld [vmem:[%s9105_s12 + $0x28] sm:$0xff]  ;;  %v9145_v41 = vld [vmem:[%s9105_s12 + $0x30] sm:$0xff]  ;;  %v9158_v46 = vld [vmem:[%s9105_s12 + $0x39] sm:$0xff] }
  0x9c   : > { %11594 = vst [vmem:[#allocation25_spill] sm:$0xff] %v9140_v38  ;;  %11595 = vst [vmem:[#allocation26_spill] sm:$0xff] %v9145_v41  ;;  %v9148_v42 = vld [vmem:[%s9105_s12 + $0x2a] sm:$0xff]  ;;  %v9151_v43 = vld [vmem:[%s9105_s12 + $0x32] sm:$0xff]  ;;  %v627_v44 = vpack.c.bf16 %v9145_v41, %v9140_v38 }
  0x9d   : > { %7008 = vmatpush3.bf16.msra.mxu0 %v8347_v11  ;;  %7719 = vmatpush3.bf16.msra.mxu1 %v8348_v12  ;;  %11596 = vst [vmem:[#allocation27_spill] sm:$0xff] %v9148_v42  ;;  %11597 = vst [vmem:[#allocation28_spill] sm:$0xff] %v9151_v43  ;;  %v751_v45 = vpack.c.bf16 %v9151_v43, %v9148_v42  ;;  %v9161_v47 = vld [vmem:[%s9105_s12 + $0x41] sm:$0xff]  ;;  %v8364_v49 = vld [vmem:[#allocation7 + $0x48] sm:$0xff]  }
  0x9e   : > { %7009 = vmatprep.subr.bf16.mxu0 %v8349_v13  ;;  %7720 = vmatprep.subr.bf16.mxu1 %v11466_v0  ;;  %11598 = vst [vmem:[#allocation29_spill] sm:$0xff] %v9158_v46  ;;  %11599 = vst [vmem:[#allocation30_spill] sm:$0xff] %v9161_v47  ;;  %v690_v48 = vpack.c.bf16 %v9161_v47, %v9158_v46  ;;  %v9166_v50 = vld [vmem:[%s9105_s12 + $0x38] sm:$0xff]  ;;  %v9170_v51 = vld [vmem:[%s9105_s12 + $0x40] sm:$0xff] }
  0x9f   : > { %11600 = vst [vmem:[#allocation31_spill] sm:$0xff] %v9166_v50  ;;  %11601 = vst [vmem:[#allocation32_spill] sm:$0xff] %v9170_v51  ;;  %v628_v52 = vpack.c.bf16 %v9170_v51, %v9166_v50  ;;  %v8365_v53 = vld [vmem:[#allocation7 + $0x8] sm:$0xff]   ;;  %v9178_v55 = vld [vmem:[%s9105_s12 + $0x42] sm:$0xff] }
  0xa0   : > { %v9175_v54 = vld [vmem:[%s9105_s12 + $0x3a] sm:$0xff]  ;;  %11603 = vst [vmem:[#allocation34_spill] sm:$0xff] %v9178_v55  ;;  %v9187_v60 = vld [vmem:[%s9105_s12 + $0x49] sm:$0xff]  ;;  %v9190_v61 = vld [vmem:[%s9105_s12 + $0x51] sm:$0xff] }
  0xa1   : > { %7010 = vmatpush3.bf16.msra.mxu0 %v8350_v14  ;;  %7721 = vmatpush3.bf16.msra.mxu1 %v8351_v15  ;;  %11602 = vst [vmem:[#allocation33_spill] sm:$0xff] %v9175_v54  ;;  %v752_v56 = vpack.c.bf16 %v9178_v55, %v9175_v54  ;;  %v8366_v57 = vld [vmem:[#allocation7 + $0x88] sm:$0xff]   ;;  %11604 = vst [vmem:[#allocation35_spill] sm:$0xff] %v9187_v60  ;;  %v9193_v62 = vld [vmem:[%s9105_s12 + $0x48] sm:$0xff]  ;;  %v691_v63 = vpack.c.bf16 %v9190_v61, %v9187_v60 }
  0xa2   : > { %7011 = vmatprep.subr.bf16.mxu0 %v8352_v16  ;;  %7722 = vmatprep.subr.bf16.mxu1 %v11466_v0  ;;  %11605 = vst [vmem:[#allocation36_spill] sm:$0xff] %v9190_v61  ;;  %11606 = vst [vmem:[#allocation37_spill] sm:$0xff] %v9193_v62  ;;  %v9200_v1 = vld [vmem:[%s9105_s12 + $0x50] sm:$0xff]  ;;  %v8367_v6 = vld [vmem:[#allocation7 + $0x50] sm:$0xff]  }
  0xa3   : > { %11607 = vst [vmem:[#allocation38_spill] sm:$0xff] %v9200_v1  ;;  %v9203_v2 = vld [vmem:[%s9105_s12 + $0x4a] sm:$0xff]  ;;  %v9206_v3 = vld [vmem:[%s9105_s12 + $0x52] sm:$0xff]  ;;  %v629_v4 = vpack.c.bf16 %v9200_v1, %v9193_v62  ;;  %v9217_v8 = vld [vmem:[%s9105_s12 + $0x61] sm:$0xff] }
  0xa4   : > { %11608 = vst [vmem:[#allocation39_spill] sm:$0xff] %v9203_v2  ;;  %11609 = vst [vmem:[#allocation40_spill] sm:$0xff] %v9206_v3  ;;  %v9214_v7 = vld [vmem:[%s9105_s12 + $0x59] sm:$0xff]  ;;  %v9231_v14 = vld [vmem:[%s9105_s12 + $0x62] sm:$0xff]  ;;  %v11623_v51 = vpack.c.bf16 %v9206_v3, %v9203_v2  ;;  %v11625_v2 = vmov 0.0  }
  0xa5   : > { %7012 = vmatpush3.bf16.msra.mxu0 %v8353_v17  ;;  %7723 = vmatpush3.bf16.msra.mxu1 %v8354_v18  ;;  %11610 = vst [vmem:[#allocation41_spill] sm:$0xff] %v9214_v7  ;;  %11611 = vst [vmem:[#allocation42_spill] sm:$0xff] %v9217_v8  ;;  %v8368_v10 = vld [vmem:[#allocation7 + $0x10] sm:$0xff]   ;;  %v9301_v26 = vld [vmem:[%s9105_s12 + $0x89] sm:$0xff] }
  0xa6   : > { %7013 = vmatprep.subr.bf16.mxu0 %v8355_v19  ;;  %7724 = vmatprep.subr.bf16.mxu1 %v11466_v0  ;;  %v9222_v11 = vld [vmem:[%s9105_s12 + $0x58] sm:$0xff]  ;;  %v9225_v12 = vld [vmem:[%s9105_s12 + $0x60] sm:$0xff]  ;;  %11615 = vst [vmem:[#allocation46_spill] sm:$0xff] %v9231_v14  ;;  %v9241_v19 = vld [vmem:[%s9105_s12 + $0x69] sm:$0xff] }
  0xa7   : > { %11612 = vst [vmem:[#allocation43_spill] sm:$0xff] %v9222_v11  ;;  %11613 = vst [vmem:[#allocation44_spill] sm:$0xff] %v9225_v12  ;;  %v9228_v13 = vld [vmem:[%s9105_s12 + $0x5a] sm:$0xff]  ;;  %v9307_v15 = vld [vmem:[%s9105_s12 + $0x88] sm:$0xff] }
  0xa8   : > { %11614 = vst [vmem:[#allocation45_spill] sm:$0xff] %v9228_v13  ;;  %v8369_v18 = vld [vmem:[#allocation7 + $0x90] sm:$0xff]   ;;  %11616 = vst [vmem:[#allocation47_spill] sm:$0xff] %v9241_v19  ;;  %v9315_v59 = vld [vmem:[%s9105_s12 + $0x90] sm:$0xff]  ;;  %v11628_v46 = vpack.c.bf16 %v9231_v14, %v9228_v13 }
  0xa9   : > { %7014 = vmatpush3.bf16.msra.mxu0 %v8356_v20  ;;  %7725 = vmatpush3.bf16.msra.mxu1 %v8357_v21  ;;  %v9244_v20 = vld [vmem:[%s9105_s12 + $0x71] sm:$0xff]  ;;  %v9247_v21 = vld [vmem:[%s9105_s12 + $0x68] sm:$0xff]  ;;  %v9412_v62 = vld [vmem:[%s9105_s12 + $0xc0] sm:$0xff] }
  0xaa   : > { %7015 = vmatprep.subr.bf16.mxu0 %v8358_v22  ;;  %7726 = vmatprep.subr.bf16.mxu1 %v11466_v0  ;;  %11617 = vst [vmem:[#allocation48_spill] sm:$0xff] %v9244_v20  ;;  %11618 = vst [vmem:[#allocation49_spill] sm:$0xff] %v9247_v21  ;;  %v9304_v22 = vld [vmem:[%s9105_s12 + $0x91] sm:$0xff]  ;;  %v9359_v16 = vld [vmem:[%s9105_s12 + $0xa9] sm:$0xff] }
  0xab   : > { %v9321_v58 = vld [vmem:[%s9105_s12 + $0x92] sm:$0xff]  ;;  %v9378_v9 = vld [vmem:[%s9105_s12 + $0xaa] sm:$0xff]  ;;  %v9415_v47 = vld [vmem:[%s9105_s12 + $0xba] sm:$0xff] }
  0xac   : > { %v9375_v17 = vld [vmem:[%s9105_s12 + $0xb0] sm:$0xff]  ;;  %v9431_v55 = vld [vmem:[%s9105_s12 + $0xc8] sm:$0xff]  ;;  %v8379_v37 = vld [vmem:[#allocation7 + $0x70] sm:$0xff]  }
  0xad   : > { %7016 = vmatpush3.bf16.msra.mxu0 %v8359_v28  ;;  %7727 = vmatpush3.bf16.msra.mxu1 %v8360_v32  ;;  %v9261_v32 = vld [vmem:[%s9105_s12 + $0x6a] sm:$0xff]  ;;  %v9354_v28 = vld [vmem:[%s9105_s12 + $0xa2] sm:$0xff]  ;;  %v9381_v5 = vld [vmem:[%s9105_s12 + $0xb2] sm:$0xff] }
  0xae   : > { %7130 = vmatprep.subr.bf16.mxu0 %v8361_v34  ;;  %7788 = vmatprep.subr.bf16.mxu1 %v11466_v0  ;;  %11620 = vst [vmem:[#allocation51_spill] sm:$0xff] %v9261_v32  ;;  %v8375_v34 = vld [vmem:[#allocation7 + $0xa0] sm:$0xff]   ;;  %v8378_v61 = vld [vmem:[#allocation7 + $0xa8] sm:$0xff]   ;;  %v8380_v3 = vld [vmem:[#allocation7 + $0x30] sm:$0xff]  }
  0xaf   : > { %v9425_v1 = vld [vmem:[%s9105_s12 + $0xc9] sm:$0xff]  ;;  %v9428_v60 = vld [vmem:[%s9105_s12 + $0xd1] sm:$0xff]  ;;  %v9467_v43 = vld [vmem:[%s9105_s12 + $0xd9] sm:$0xff] }
  0xb0   : > { %1050 = vmatmul.mubr.bf16.vlgmr.msra.gmra.mrb[0].mxu0 %v626_v29  ;;  %7729 = vmatmul.mubr.bf16.vlgmr.msra.gmra.mrb[0].mxu1 %v750_v33  ;;  %v9258_v29 = vld [vmem:[%s9105_s12 + $0x70] sm:$0xff]  ;;  %v8382_v38 = vld [vmem:[#allocation7 + $0x78] sm:$0xff]   ;;  %v9533_v14 = vld [vmem:[%s9105_s12 + $0xf9] sm:$0xff] }
  0xb1   : > { %7131 = vmatpush3.bf16.msra.mxu0 %v8362_v35  ;;  %7789 = vmatpush3.bf16.msra.mxu1 %v8363_v39  ;;  %11619 = vst [vmem:[#allocation50_spill] sm:$0xff] %v9258_v29  ;;  %v9264_v33 = vld [vmem:[%s9105_s12 + $0x72] sm:$0xff]  ;;  %v8370_v39 = vld [vmem:[#allocation7 + $0x58] sm:$0xff]   ;;  %v11634_v50 = vpack.c.bf16 %v9258_v29, %v9247_v21  ;;  %11637 = vst [vmem:[#allocation59_spill] sm:$0xff] %v9533_v14 }
  0xb2   : > { %1057 = vmatprep.mubr.bf16.mxu0 %v689_v40  ;;  %7732 = vmatprep.mubr.msk.bf16.mxu1 %vm8818_vm0, %v11466_v0  ;;  %11621 = vst [vmem:[#allocation52_spill] sm:$0xff] %v9264_v33  ;;  %v8371_v40 = vld [vmem:[#allocation7 + $0x18] sm:$0xff]   ;;  %v8376_v35 = vld [vmem:[#allocation7 + $0x68] sm:$0xff]   ;;  %vm10554_vm3 = vmand %vm2809_vm1, %vm2810_vm2 }
  0xb3   : > { %7132 = vmatprep.subr.bf16.mxu0 %v8364_v49  ;;  %7790 = vmatprep.subr.bf16.mxu1 %v11466_v0  ;;  %v8374_v49 = vld [vmem:[#allocation7 + $0x20] sm:$0xff]   ;;  %v8383_v36 = vld [vmem:[#allocation7 + $0x38] sm:$0xff]   ;;  %v9547_v29 = vld [vmem:[%s9105_s12 + $0xfa] sm:$0xff] }
  0xb4   : > { %v9436_v54 = vld [vmem:[%s9105_s12 + $0xd0] sm:$0xff]  ;;  %v8384_v27 = vld [vmem:[#allocation7 + $0xb8] sm:$0xff]   ;;  %11640 = vst [vmem:[#allocation62_spill] sm:$0xff] %v9547_v29  ;;  %vm10692_vm7 = vmand %vm3207_vm4, %vm3208_vm5 }
  0xb5   : > { %7133 = vmatpush3.bf16.msra.mxu0 %v8365_v53  ;;  %7791 = vmatpush3.bf16.msra.mxu1 %v8366_v57  ;;  %v9283_v53 = vld [vmem:[%s9105_s12 + $0x80] sm:$0xff]  ;;  %v9439_v41 = vld [vmem:[%s9105_s12 + $0xca] sm:$0xff]  ;;  %vm10699_vm8 = vmor %vm2810_vm2, %vm2905_vm6 }
  0xb6   : > { %7134 = vmatprep.subr.bf16.mxu0 %v8367_v6  ;;  %7792 = vmatprep.subr.bf16.mxu1 %v11466_v0  ;;  %v9286_v57 = vld [vmem:[%s9105_s12 + $0x7a] sm:$0xff]  ;;  %v9289_v6 = vld [vmem:[%s9105_s12 + $0x82] sm:$0xff]  ;;  %v9503_v31 = vld [vmem:[%s9105_s12 + $0xf0] sm:$0xff] }
  0xb7   : > { %v9491_v13 = vld [vmem:[%s9105_s12 + $0xe9] sm:$0xff]  ;;  %v11645_v24 = vpack.c.bf16 %v9289_v6, %v9286_v57 }
  0xb8   : > { %1058 = vmatmul.mubr.bf16.gmra.mrb[4].mxu0 %v627_v44  ;;  %7733 = vmatmul.mubr.bf16.gmra.mrb[4].mxu1 %v751_v45  ;;  %v9272_v44 = vld [vmem:[%s9105_s12 + $0x79] sm:$0xff]  ;;  %v9275_v45 = vld [vmem:[%s9105_s12 + $0x81] sm:$0xff]  ;;  %11632 = vst [vmem:[#allocation57_spill] sm:$0xff] %v9491_v13  ;;  %v9506_v42 = vld [vmem:[%s9105_s12 + $0xea] sm:$0xff]  ;;  %v11635_v13 = vpack.c.bf16 %v9264_v33, %v9261_v32 }
  0xb9   : > { %1065 = vmatprep.mubr.bf16.mxu0 %v690_v48  ;;  %7736 = vmatprep.mubr.msk.bf16.mxu1 %vm8818_vm0, %v11466_v0  ;;  %11622 = vst [vmem:[#allocation53_spill] sm:$0xff] %v9272_v44  ;;  %v9278_v48 = vld [vmem:[%s9105_s12 + $0x78] sm:$0xff]  ;;  %11633 = vst [vmem:[#allocation58_spill] sm:$0xff] %v9506_v42  ;;  %v9557_v32 = vld [vmem:[%s9105_s12 + $0x1] sm:$0xff] }
  0xba   : > { %7135 = vmatpush3.bf16.msra.mxu0 %v8368_v10  ;;  %7793 = vmatpush3.bf16.msra.mxu1 %v8369_v18  ;;  %v8373_v10 = vld [vmem:[#allocation7 + $0x60] sm:$0xff]   ;;  %v9338_v18 = vld [vmem:[%s9105_s12 + $0xa1] sm:$0xff]  ;;  %v11644_v14 = vpack.c.bf16 %v9283_v53, %v9278_v48 }
  0xbb   : > { %7794 = vmatprep.subr.bf16.mxu1 %v11466_v0  ;;  %7136 = vmatprep.subr.bf16.mxu0 %v8370_v39  ;;  %v8372_v39 = vld [vmem:[#allocation7 + $0x98] sm:$0xff]  }
  0xbc   : > { %v9569_v21 = vld [vmem:[%s9105_s12 + $0x8] sm:$0xff] }
  0xbd   : > { %11643 = vst [vmem:[#allocation65_spill] sm:$0xff] %v9569_v21  ;;  %v9574_v29 = vld [vmem:[%s9105_s12 + $0x2] sm:$0xff]  ;;  %v9596_v21 = vld [vmem:[%s9105_s12 + $0x10] sm:$0xff] }
  0xbe   : > { %7137 = vmatpush3.bf16.msra.mxu0 %v8371_v40  ;;  %7795 = vmatpush3.bf16.msra.mxu1 %v8372_v39  ;;  %v9341_v39 = vld [vmem:[%s9105_s12 + $0x98] sm:$0xff]  ;;  %v11624_v40 = vpack.c.bf16 %v9217_v8, %v9214_v7 }
  0xbf   : > { %7796 = vmatprep.subr.bf16.mxu1 %v11466_v0  ;;  %7138 = vmatprep.subr.bf16.mxu0 %v8373_v10  ;;  %v9351_v10 = vld [vmem:[%s9105_s12 + $0x9a] sm:$0xff] }
  0xc0   : > { %1066 = vmatmul.mubr.bf16.gmra.mrb[8].mxu0 %v628_v52  ;;  %7737 = vmatmul.mubr.bf16.gmra.mrb[8].mxu1 %v752_v56  ;;  %v9318_v52 = vld [vmem:[%s9105_s12 + $0x8a] sm:$0xff]  ;;  %v9335_v56 = vld [vmem:[%s9105_s12 + $0x99] sm:$0xff] }
  0xc1   : > { %1073 = vmatprep.mubr.bf16.mxu0 %v691_v63  ;;  %7740 = vmatprep.mubr.msk.bf16.mxu1 %vm8818_vm0, %v11466_v0  ;;  %v9346_v63 = vld [vmem:[%s9105_s12 + $0xa0] sm:$0xff]  ;;  %v9365_v0 = vld [vmem:[%s9105_s12 + $0xa8] sm:$0xff]  ;;  %v9409_v7 = vld [vmem:[%s9105_s12 + $0xb8] sm:$0xff] }
  0xc2   : > { %7139 = vmatpush3.bf16.msra.mxu0 %v8374_v49  ;;  %v9362_v49 = vld [vmem:[%s9105_s12 + $0xb1] sm:$0xff]  ;;  %7797 = vmatpush3.bf16.msra.mxu1 %v8375_v34  ;;  %v9404_v34 = vld [vmem:[%s9105_s12 + $0xc1] sm:$0xff]  ;;  %v11650_v33 = vpack.c.bf16 %v9346_v63, %v9341_v39 }
  0xc3   : > { %7798 = vmatprep.subr.bf16.mxu1 %v11625_v2  ;;  %7140 = vmatprep.subr.bf16.mxu0 %v8376_v35  ;;  %v11627_v35 = vpack.c.bf16 %v9225_v12, %v9222_v11  ;;  %v9478_v12 = vld [vmem:[%s9105_s12 + $0xe0] sm:$0xff]  ;;  %v9494_v11 = vld [vmem:[%s9105_s12 + $0xf1] sm:$0xff] }
  0xc4   : > { %11630 = vst [vmem:[#allocation55_spill] sm:$0xff] %v9478_v12  ;;  %v9481_v8 = vld [vmem:[%s9105_s12 + $0xda] sm:$0xff] }
  0xc6   : > { %7799 = vmatpush3.bf16.msra.mxu1 %v8378_v61  ;;  %v9442_v61 = vld [vmem:[%s9105_s12 + $0xd2] sm:$0xff] }
  0xc7   : > { %11626 = vst [vmem:[#allocation54_spill] sm:$0xff] %v9442_v61  ;;  %7800 = vmatprep.subr.bf16.mxu1 %v11625_v2 }
  0xc8   : > { %1074 = vmatmul.mubr.bf16.gmra.mrb[12].mxu0 %v629_v4  ;;  %7741 = vmatmul.mubr.bf16.gmra.mrb[12].mxu1 %v11623_v51  ;;  %v8377_v51 = vld [vmem:[#allocation7 + $0x28] sm:$0xff]  }
  0xc9   : > { %1081 = vmatprep.mubr.bf16.mxu0 %v11624_v40  ;;  %7744 = vmatprep.mubr.msk.bf16.mxu1 %vm8818_vm0, %v11625_v2  ;;  %v9401_v4 = vld [vmem:[%s9105_s12 + $0xb9] sm:$0xff]  ;;  %v9418_v40 = vld [vmem:[%s9105_s12 + $0xc2] sm:$0xff] }
  0xca   : > { %7141 = vmatpush3.bf16.msra.mxu0 %v8377_v51  ;;  %v11629_v51 = vpack.c.bf16 %v9244_v20, %v9241_v19  ;;  %v11636_v19 = vpack.c.bf16 %v9275_v45, %v9272_v44  ;;  %v9550_v20 = vld [vmem:[%s9105_s12 + $0x102] sm:$0xff]  ;;  %v8385_v44 = vld [vmem:[#allocation7 + $0x1c0] sm:$0xff]  }
  0xcb   : > { %7142 = vmatprep.subr.bf16.mxu0 %v8379_v37  ;;  %v9484_v37 = vld [vmem:[%s9105_s12 + $0xe2] sm:$0xff]  ;;  %11641 = vst [vmem:[#allocation63_spill] sm:$0xff] %v9550_v20  ;;  %v9577_v20 = vld [vmem:[%s9105_s12 + $0xa] sm:$0xff] }
  0xcc   : > { %11631 = vst [vmem:[#allocation56_spill] sm:$0xff] %v9484_v37 }
  0xce   : > { %7143 = vmatpush3.bf16.msra.mxu0 %v8380_v3  ;;  %v9509_v3 = vld [vmem:[%s9105_s12 + $0xf2] sm:$0xff] }
  0xcf   : > { %7144 = vmatprep.subr.bf16.mxu0 %v8382_v38  ;;  %v11646_v38 = vpack.c.bf16 %v9304_v22, %v9301_v26 }
  0xd0   : > { %1082 = vmatmul.mubr.bf16.gmra.mrb[16].mxu0 %v11627_v35  ;;  %7745 = vmatmul.mubr.bf16.gmra.mrb[16].mxu1 %v11628_v46  ;;  %v8381_v46 = vld [vmem:[#allocation7 + $0xb0] sm:$0xff]  }
  0xd1   : > { %1089 = vmatprep.mubr.bf16.mxu0 %v11629_v51  ;;  %7748 = vmatprep.mubr.msk.bf16.mxu1 %vm8818_vm0, %v11625_v2  ;;  %v9470_v51 = vld [vmem:[%s9105_s12 + $0xe1] sm:$0xff]  ;;  %v9473_v35 = vld [vmem:[%s9105_s12 + $0xd8] sm:$0xff] }
  0xd2   : > { %7801 = vmatpush3.bf16.msra.mxu1 %v8381_v46  ;;  %v9497_v46 = vld [vmem:[%s9105_s12 + $0xe8] sm:$0xff]  ;;  %7145 = vmatpush3.bf16.msra.mxu0 %v8383_v36  ;;  %v9563_v36 = vld [vmem:[%s9105_s12] sm:$0xff] }
  0xd3   : > { %7802 = vmatprep.subr.bf16.mxu1 %v11625_v2  ;;  %11642 = vst [vmem:[#allocation64_spill] sm:$0xff] %v9563_v36  ;;  %7259 = vmatprep.subr.bf16.mxu0 %v8385_v44  ;;  %v9593_v36 = vld [vmem:[%s9105_s12 + $0x11] sm:$0xff]  ;;  %v11659_v44 = vpack.c.bf16 %v9436_v54, %v9431_v55 }
  0xd6   : > { %7803 = vmatpush3.bf16.msra.mxu1 %v8384_v27  ;;  %v9560_v27 = vld [vmem:[%s9105_s12 + $0x9] sm:$0xff] }
  0xd7   : > { %7864 = vmatprep.subr.bf16.mxu1 %v11625_v2 }
  0xd8   : > { %1090 = vmatmul.mubr.bf16.gmra.mrb[20].mxu0 %v11634_v50  ;;  %7749 = vmatmul.mubr.bf16.gmra.mrb[20].mxu1 %v11635_v13  ;;  %v9536_v13 = vld [vmem:[%s9105_s12 + $0x101] sm:$0xff] }
  0xd9   : > { %1097 = vmatprep.mubr.bf16.mxu0 %v11636_v19  ;;  %7752 = vmatprep.mubr.msk.bf16.mxu1 %vm8818_vm0, %v11625_v2  ;;  %v9539_v19 = vld [vmem:[%s9105_s12 + $0xf8] sm:$0xff]  ;;  %v9544_v50 = vld [vmem:[%s9105_s12 + $0x100] sm:$0xff] }
  0xda   : > { %11638 = vst [vmem:[#allocation60_spill] sm:$0xff] %v9539_v19  ;;  %11639 = vst [vmem:[#allocation61_spill] sm:$0xff] %v9544_v50  ;;  %v9599_v19 = vld [vmem:[%s9105_s12 + $0x12] sm:$0xff]  ;;  %v11647_v50 = vpack.c.bf16 %v9315_v59, %v9307_v15 }
  0xe0   : > { %1098 = vmatmul.mubr.bf16.gmra.mrb[24].mxu0 %v11644_v14  ;;  %7753 = vmatmul.mubr.bf16.gmra.mrb[24].mxu1 %v11645_v24  ;;  %v11648_v14 = vpack.c.bf16 %v9321_v58, %v9318_v52  ;;  %v11649_v24 = vpack.c.bf16 %v9338_v18, %v9335_v56 }
  0xe1   : > { %1105 = vmatprep.mubr.bf16.mxu0 %v11646_v38  ;;  %7756 = vmatprep.mubr.msk.bf16.mxu1 %vm8818_vm0, %v11625_v2  ;;  %v11664_v38 = vld [vmem:[#allocation57_spill] sm:$0xff] }
  0xe8   : > { %1106 = vmatmul.mubr.bf16.gmra.mrb[28].mxu0 %v11647_v50  ;;  %7757 = vmatmul.mubr.bf16.gmra.mrb[28].mxu1 %v11648_v14  ;;  %v11651_v14 = vpack.c.bf16 %v9354_v28, %v9351_v10  ;;  %v11653_v50 = vpack.c.bf16 %v9375_v17, %v9365_v0 }
  0xe9   : > { %1113 = vmatprep.mubr.bf16.mxu0 %v11649_v24  ;;  %7760 = vmatprep.mubr.msk.bf16.mxu1 %vm8818_vm0, %v11625_v2  ;;  %v11652_v24 = vpack.c.bf16 %v9362_v49, %v9359_v16 }
  0xf0   : > { %1114 = vmatmul.mubr.bf16.gmra.mrb[32].mxu0 %v11650_v33  ;;  %7761 = vmatmul.mubr.bf16.gmra.mrb[32].mxu1 %v11651_v14  ;;  %v11654_v14 = vpack.c.bf16 %v9381_v5, %v9378_v9  ;;  %v11656_v33 = vpack.c.bf16 %v9412_v62, %v9409_v7 }
  0xf1   : > { %1121 = vmatprep.mubr.bf16.mxu0 %v11652_v24  ;;  %7764 = vmatprep.mubr.msk.bf16.mxu1 %vm8818_vm0, %v11625_v2  ;;  %v11655_v24 = vpack.c.bf16 %v9404_v34, %v9401_v4 }
  0xf8   : > { %1122 = vmatmul.mubr.bf16.gmra.mrb[36].mxu0 %v11653_v50  ;;  %7765 = vmatmul.mubr.bf16.gmra.mrb[36].mxu1 %v11654_v14  ;;  %v11657_v14 = vpack.c.bf16 %v9418_v40, %v9415_v47  ;;  %v9729_v50 = vld [vmem:[%s9105_s12 + $0x31] sm:$0xff] }
  0xf9   : > { %1129 = vmatprep.mubr.bf16.mxu0 %v11655_v24  ;;  %7768 = vmatprep.mubr.msk.bf16.mxu1 %vm8818_vm0, %v11625_v2  ;;  %v11658_v24 = vpack.c.bf16 %v9428_v60, %v9425_v1  ;;  %11670 = vst [vmem:[#allocation57_spill] sm:$0xff] %v9729_v50  ;;  %v11678_v50 = vld [vmem:[#allocation63_spill] sm:$0xff] }
 0x100   : > { %1130 = vmatmul.mubr.bf16.gmra.mrb[40].mxu0 %v11656_v33  ;;  %7769 = vmatmul.mubr.bf16.gmra.mrb[40].mxu1 %v11657_v14  ;;  %v11660_v14 = vpack.c.bf16 %v9442_v61, %v9439_v41  ;;  %v11665_v33 = vpack.c.bf16 %v9494_v11, %v11664_v38  ;;  %v11667_v11 = vpack.c.bf16 %v9509_v3, %v9506_v42  ;;  %v9740_v3 = vld [vmem:[%s9105_s12 + $0x38] sm:$0xff] }
 0x101   : > { %1137 = vmatprep.mubr.bf16.mxu0 %v11658_v24  ;;  %7772 = vmatprep.mubr.msk.bf16.mxu1 %vm8818_vm0, %v11625_v2  ;;  %v11661_v24 = vpack.c.bf16 %v9470_v51, %v9467_v43  ;;  %11673 = vst [vmem:[#allocation67_spill] sm:$0xff] %v9740_v3  ;;  %v9764_v3 = vld [vmem:[%s9105_s12 + $0x41] sm:$0xff] }
 0x108   : > { %1138 = vmatmul.mubr.bf16.gmra.mrb[44].mxu0 %v11659_v44  ;;  %7773 = vmatmul.mubr.bf16.gmra.mrb[44].mxu1 %v11660_v14  ;;  %v11662_v14 = vpack.c.bf16 %v9478_v12, %v9473_v35  ;;  %v11676_v44 = vld [vmem:[#allocation60_spill] sm:$0xff]  ;;  %v11681_v12 = vpack.c.bf16 %v9560_v27, %v9557_v32  ;;  %v8388_v32 = vld [vmem:[#allocation7 + $0x1c8] sm:$0xff]  }
 0x109   : > { %1145 = vmatprep.mubr.bf16.mxu0 %v11661_v24  ;;  %7776 = vmatprep.mubr.msk.bf16.mxu1 %vm8818_vm0, %v11625_v2  ;;  %v11663_v24 = vpack.c.bf16 %v9484_v37, %v9481_v8  ;;  %v9783_v27 = vld [vmem:[%s9105_s12 + $0x4a] sm:$0xff] }
 0x110   : > { %1146 = vmatmul.mubr.bf16.gmra.mrb[48].mxu0 %v11662_v14  ;;  %7777 = vmatmul.mubr.bf16.gmra.mrb[48].mxu1 %v11663_v24  ;;  %v11666_v24 = vpack.c.bf16 %v9503_v31, %v9497_v46  ;;  %v9732_v14 = vld [vmem:[%s9105_s12 + $0x39] sm:$0xff]  ;;  %v11685_v31 = vld [vmem:[#allocation64_spill] sm:$0xff] }
 0x111   : > { %1153 = vmatprep.mubr.bf16.mxu0 %v11665_v33  ;;  %7780 = vmatprep.mubr.msk.bf16.mxu1 %vm8818_vm0, %v11625_v2  ;;  %v11668_v33 = vld [vmem:[#allocation59_spill] sm:$0xff] }
 0x112   : > { %v11669_v61 = vpack.c.bf16 %v9536_v13, %v11668_v33  ;;  %11671 = vst [vmem:[#allocation59_spill] sm:$0xff] %v9732_v14  ;;  %v11675_v33 = vld [vmem:[#allocation61_spill] sm:$0xff]  ;;  %v11679_v14 = vld [vmem:[#allocation62_spill] sm:$0xff]  ;;  %v8386_v13 = vld [vmem:[#allocation7 + $0x180] sm:$0xff]  }
 0x113   : > { %v11677_v37 = vpack.c.bf16 %v11675_v33, %v11676_v44  ;;  %v11680_v42 = vpack.c.bf16 %v11678_v50, %v11679_v14  ;;  %11682 = vst [vmem:[#allocation61_spill] sm:$0xff] %v9764_v3  ;;  %v9767_v44 = vld [vmem:[%s9105_s12 + $0x49] sm:$0xff]  ;;  %v9772_v33 = vld [vmem:[%s9105_s12 + $0x40] sm:$0xff]  ;;  %v11684_v14 = vld [vmem:[#allocation65_spill] sm:$0xff]  ;;  %v11687_v3 = vpack.c.bf16 %v9577_v20, %v9574_v29 }
 0x114   : > { %11683 = vst [vmem:[#allocation60_spill] sm:$0xff] %v9767_v44  ;;  %v9775_v50 = vld [vmem:[%s9105_s12 + $0x48] sm:$0xff]  ;;  %v8389_v44 = vld [vmem:[#allocation7 + $0x188] sm:$0xff]   ;;  %v8392_v20 = vld [vmem:[#allocation7 + $0x190] sm:$0xff]  }
 0x115   : > { %v9800_v29 = vld [vmem:[%s9105_s12 + $0x51] sm:$0xff] }
 0x116   : > { %11689 = vst [vmem:[#allocation63_spill] sm:$0xff] %v9800_v29  ;;  %v11696_v29 = vld [vmem:[#allocation20_spill] sm:$0xff] }
 0x118   : > { %1154 = vmatmul.mubr.bf16.gmra.mrb[52].mxu0 %v11666_v24  ;;  %7781 = vmatmul.mubr.bf16.gmra.mrb[52].mxu1 %v11667_v11  ;;  %v9737_v24 = vld [vmem:[%s9105_s12 + $0x30] sm:$0xff]  ;;  %v9748_v11 = vld [vmem:[%s9105_s12 + $0x3a] sm:$0xff] }
 0x119   : > { %1161 = vmatprep.mubr.bf16.mxu0 %v11669_v61  ;;  %7784 = vmatprep.mubr.msk.bf16.mxu1 %vm8818_vm0, %v11625_v2  ;;  %11672 = vst [vmem:[#allocation66_spill] sm:$0xff] %v9737_v24  ;;  %v9743_v61 = vld [vmem:[%s9105_s12 + $0x32] sm:$0xff] }
 0x11a   : > { %11674 = vst [vmem:[#allocation68_spill] sm:$0xff] %v9743_v61  ;;  %v8387_v24 = vld [vmem:[#allocation7 + $0x200] sm:$0xff]   ;;  %v11686_v61 = vpack.c.bf16 %v11684_v14, %v11685_v31  ;;  %v8390_v31 = vld [vmem:[#allocation7 + $0x208] sm:$0xff]   ;;  %v8391_v14 = vld [vmem:[#allocation7 + $0x1d0] sm:$0xff]  }
 0x120   : > { %1162 = vmatmul.mubr.bf16.gmra.mrb[56].mxu0 %v11677_v37  ;;  %7785 = vmatmul.mubr.bf16.gmra.mrb[56].mxu1 %v11680_v42  ;;  %v9778_v42 = vld [vmem:[%s9105_s12 + $0x42] sm:$0xff] }
 0x121   : > { %1499 = vmatprep.mubr.bf16.mxu0 %v11681_v12  ;;  %7804 = vmatprep.mubr.msk.bf16.mxu1 %vm8818_vm0, %v11625_v2  ;;  %v11688_v12 = vpack.c.bf16 %v9108_v23, %v9593_v36  ;;  %v9808_v36 = vld [vmem:[%s9105_s12 + $0x50] sm:$0xff]  ;;  %v11694_v23 = vpack.c.bf16 %v9125_v30, %v9599_v19  ;;  %v11695_v37 = vld [vmem:[#allocation23_spill] sm:$0xff] }
 0x122   : > { %v8398_v30 = vld [vmem:[#allocation7 + $0x1a0] sm:$0xff]   ;;  %v9837_v19 = vld [vmem:[%s9105_s12 + $0x61] sm:$0xff] }
 0x123   : > { %11698 = vst [vmem:[#allocation23_spill] sm:$0xff] %v9837_v19 }
 0x128   : > { %1500 = vmatmul.mubr.bf16.vlgmr.msra.gmra.mrb[60].mxu0 %v11686_v61  ;;  %7805 = vmatmul.mubr.bf16.vlgmr.msra.gmra.mrb[60].mxu1 %v11687_v3  ;;  %v9803_v3 = vld [vmem:[%s9105_s12 + $0x59] sm:$0xff] }
 0x129   : > { %7260 = vmatpush3.bf16.msra.mxu0 %v8386_v13  ;;  %7865 = vmatpush3.bf16.msra.mxu1 %v8387_v24  ;;  %11690 = vst [vmem:[#allocation62_spill] sm:$0xff] %v9803_v3  ;;  %v9811_v24 = vld [vmem:[%s9105_s12 + $0x58] sm:$0xff]  ;;  %v11697_v3 = vpack.c.bf16 %v11695_v37, %v11696_v29  ;;  %v9845_v29 = vld [vmem:[%s9105_s12 + $0x60] sm:$0xff] }
 0x12a   : > { %1507 = vmatprep.mubr.bf16.mxu0 %v11688_v12  ;;  %7808 = vmatprep.mubr.msk.bf16.mxu1 %vm8818_vm0, %v11625_v2  ;;  %v9814_v61 = vld [vmem:[%s9105_s12 + $0x52] sm:$0xff]  ;;  %v8393_v13 = vld [vmem:[#allocation7 + $0x210] sm:$0xff]   ;;  %11700 = vst [vmem:[#allocation69_spill] sm:$0xff] %v9845_v29 }
 0x12b   : > { %7261 = vmatprep.subr.bf16.mxu0 %v8388_v32  ;;  %7866 = vmatprep.subr.bf16.mxu1 %v11625_v2  ;;  %11691 = vst [vmem:[#allocation65_spill] sm:$0xff] %v9814_v61  ;;  %v9820_v12 = vld [vmem:[%s9105_s12 + $0x5a] sm:$0xff]  ;;  %v9856_v32 = vld [vmem:[%s9105_s12 + $0x6a] sm:$0xff] }
 0x12c   : > { %11692 = vst [vmem:[#allocation64_spill] sm:$0xff] %v9820_v12  ;;  %11703 = vst [vmem:[#allocation72_spill] sm:$0xff] %v9856_v32  ;;  %v11705_v61 = vld [vmem:[#allocation21_spill] sm:$0xff]  ;;  %v11720_v32 = vld [vmem:[#allocation26_spill] sm:$0xff] }
 0x12d   : > { %7262 = vmatpush3.bf16.msra.mxu0 %v8389_v44  ;;  %7867 = vmatpush3.bf16.msra.mxu1 %v8390_v31  ;;  %v8394_v44 = vld [vmem:[#allocation7 + $0x1d8] sm:$0xff]   ;;  %v11693_v31 = vpack.c.bf16 %v9114_v25, %v9596_v21  ;;  %v11726_v37 = vld [vmem:[#allocation30_spill] sm:$0xff] }
 0x12e   : > { %7263 = vmatprep.subr.bf16.mxu0 %v8391_v14  ;;  %7868 = vmatprep.subr.bf16.mxu1 %v11625_v2  ;;  %v8395_v25 = vld [vmem:[#allocation7 + $0x198] sm:$0xff]   ;;  %v11711_v14 = vld [vmem:[#allocation24_spill] sm:$0xff] }
 0x12f   : > { %v8396_v21 = vld [vmem:[#allocation7 + $0x218] sm:$0xff]  }
 0x130   : > { %1508 = vmatmul.mubr.bf16.gmra.mrb[64].mxu0 %v11693_v31  ;;  %7809 = vmatmul.mubr.bf16.gmra.mrb[64].mxu1 %v11694_v23  ;;  %v8397_v31 = vld [vmem:[#allocation7 + $0x1e0] sm:$0xff]  }
 0x131   : > { %1515 = vmatprep.mubr.bf16.mxu0 %v11697_v3  ;;  %7812 = vmatprep.mubr.msk.bf16.mxu1 %vm8818_vm0, %v11625_v2  ;;  %v9840_v23 = vld [vmem:[%s9105_s12 + $0x69] sm:$0xff] }
 0x132   : > { %7264 = vmatpush3.bf16.msra.mxu0 %v8392_v20  ;;  %7869 = vmatpush3.bf16.msra.mxu1 %v8393_v13  ;;  %11699 = vst [vmem:[#allocation20_spill] sm:$0xff] %v9840_v23  ;;  %v9848_v20 = vld [vmem:[%s9105_s12 + $0x68] sm:$0xff]  ;;  %v11710_v23 = vld [vmem:[#allocation29_spill] sm:$0xff] }
 0x133   : > { %7265 = vmatprep.subr.bf16.mxu0 %v8394_v44  ;;  %7870 = vmatprep.subr.bf16.mxu1 %v11625_v2  ;;  %11701 = vst [vmem:[#allocation70_spill] sm:$0xff] %v9848_v20  ;;  %v9851_v3 = vld [vmem:[%s9105_s12 + $0x62] sm:$0xff]  ;;  %v8399_v13 = vld [vmem:[#allocation7 + $0x220] sm:$0xff]   ;;  %v8400_v44 = vld [vmem:[#allocation7 + $0x1e8] sm:$0xff]   ;;  %v11712_v29 = vpack.c.bf16 %v11710_v23, %v11711_v14 }
 0x134   : > { %11702 = vst [vmem:[#allocation71_spill] sm:$0xff] %v9851_v3  ;;  %v9882_v23 = vld [vmem:[%s9105_s12 + $0x70] sm:$0xff]  ;;  %v9893_v3 = vld [vmem:[%s9105_s12 + $0x7a] sm:$0xff]  ;;  %v11725_v20 = vld [vmem:[#allocation35_spill] sm:$0xff] }
 0x135   : > { %11718 = vst [vmem:[#allocation24_spill] sm:$0xff] %v9893_v3  ;;  %v11740_v3 = vld [vmem:[#allocation36_spill] sm:$0xff] }
 0x136   : > { %7266 = vmatpush3.bf16.msra.mxu0 %v8395_v25  ;;  %7871 = vmatpush3.bf16.msra.mxu1 %v8396_v21  ;;  %v11704_v25 = vld [vmem:[#allocation25_spill] sm:$0xff]  ;;  %v11707_v21 = vld [vmem:[#allocation27_spill] sm:$0xff] }
 0x137   : > { %7267 = vmatprep.subr.bf16.mxu0 %v8397_v31  ;;  %v11706_v12 = vpack.c.bf16 %v11704_v25, %v11705_v61  ;;  %7872 = vmatprep.subr.bf16.mxu1 %v11625_v2  ;;  %v11708_v31 = vld [vmem:[#allocation22_spill] sm:$0xff]  ;;  %v8401_v61 = vld [vmem:[#allocation7 + $0x1a8] sm:$0xff]   ;;  %11715 = vst [vmem:[#allocation27_spill] sm:$0xff] %v9882_v23  ;;  %v11727_v23 = vpack.c.bf16 %v11725_v20, %v11726_v37 }
 0x138   : > { %v11709_v19 = vpack.c.bf16 %v11707_v21, %v11708_v31  ;;  %v8403_v25 = vld [vmem:[#allocation7 + $0x1f0] sm:$0xff]  }
 0x139   : > { %1516 = vmatmul.mubr.bf16.gmra.mrb[68].mxu0 %v11706_v12  ;;  %v8402_v12 = vld [vmem:[#allocation7 + $0x228] sm:$0xff]   ;;  %v8404_v21 = vld [vmem:[#allocation7 + $0x1b0] sm:$0xff]  }
 0x13a   : > { %7813 = vmatmul.mubr.bf16.gmra.mrb[68].mxu1 %v11709_v19  ;;  %1523 = vmatprep.mubr.bf16.mxu0 %v11712_v29  ;;  %v9874_v19 = vld [vmem:[%s9105_s12 + $0x71] sm:$0xff]  ;;  %v9877_v31 = vld [vmem:[%s9105_s12 + $0x79] sm:$0xff] }
 0x13b   : > { %7816 = vmatprep.mubr.msk.bf16.mxu1 %vm8818_vm0, %v11625_v2  ;;  %7268 = vmatpush3.bf16.msra.mxu0 %v8398_v30  ;;  %11713 = vst [vmem:[#allocation25_spill] sm:$0xff] %v9874_v19  ;;  %11714 = vst [vmem:[#allocation21_spill] sm:$0xff] %v9877_v31  ;;  %v9885_v30 = vld [vmem:[%s9105_s12 + $0x78] sm:$0xff]  ;;  %v11723_v19 = vld [vmem:[#allocation28_spill] sm:$0xff] }
 0x13c   : > { %7873 = vmatpush3.bf16.msra.mxu1 %v8399_v13  ;;  %7269 = vmatprep.subr.bf16.mxu0 %v8400_v44  ;;  %11716 = vst [vmem:[#allocation22_spill] sm:$0xff] %v9885_v30  ;;  %v9888_v29 = vld [vmem:[%s9105_s12 + $0x72] sm:$0xff]  ;;  %v8405_v13 = vld [vmem:[#allocation7 + $0x230] sm:$0xff]   ;;  %v8406_v44 = vld [vmem:[#allocation7 + $0x1f8] sm:$0xff]  }
 0x13d   : > { %7874 = vmatprep.subr.bf16.mxu1 %v11625_v2  ;;  %11717 = vst [vmem:[#allocation29_spill] sm:$0xff] %v9888_v29  ;;  %v9919_v20 = vld [vmem:[%s9105_s12 + $0x80] sm:$0xff]  ;;  %v11739_v29 = vld [vmem:[#allocation41_spill] sm:$0xff] }
 0x13e   : > { %v11741_v30 = vpack.c.bf16 %v11739_v29, %v11740_v3  ;;  %v9960_v3 = vld [vmem:[%s9105_s12 + $0x92] sm:$0xff]  ;;  %v9965_v29 = vld [vmem:[%s9105_s12 + $0x9a] sm:$0xff] }
 0x13f   : > { %7270 = vmatpush3.bf16.msra.mxu0 %v8401_v61  ;;  %v11719_v61 = vld [vmem:[#allocation31_spill] sm:$0xff]  ;;  %11747 = vst [vmem:[#allocation41_spill] sm:$0xff] %v9965_v29  ;;  %v11765_v29 = vld [vmem:[#allocation53_spill] sm:$0xff] }
 0x140   : > { %7875 = vmatpush3.bf16.msra.mxu1 %v8402_v12  ;;  %7271 = vmatprep.subr.bf16.mxu0 %v8403_v25  ;;  %v11721_v14 = vpack.c.bf16 %v11719_v61, %v11720_v32  ;;  %v11722_v25 = vld [vmem:[#allocation33_spill] sm:$0xff]  ;;  %v8407_v32 = vld [vmem:[#allocation7 + $0x1b8] sm:$0xff]  }
 0x141   : > { %7876 = vmatprep.subr.bf16.mxu1 %v11625_v2  ;;  %v11724_v31 = vpack.c.bf16 %v11722_v25, %v11723_v19  ;;  %v9911_v61 = vld [vmem:[%s9105_s12 + $0x81] sm:$0xff]  ;;  %v9914_v19 = vld [vmem:[%s9105_s12 + $0x89] sm:$0xff]  ;;  %11730 = vst [vmem:[#allocation33_spill] sm:$0xff] %v9919_v20 }
 0x142   : > { %1524 = vmatmul.mubr.bf16.gmra.mrb[72].mxu0 %v11721_v14  ;;  %v8408_v14 = vld [vmem:[#allocation7 + $0x238] sm:$0xff]   ;;  %11728 = vst [vmem:[#allocation31_spill] sm:$0xff] %v9911_v61  ;;  %11729 = vst [vmem:[#allocation26_spill] sm:$0xff] %v9914_v19  ;;  %v11734_v25 = vld [vmem:[#allocation32_spill] sm:$0xff] }
 0x143   : > { %7817 = vmatmul.mubr.bf16.gmra.mrb[72].mxu1 %v11724_v31  ;;  %1531 = vmatprep.mubr.bf16.mxu0 %v11727_v23  ;;  %v9925_v31 = vld [vmem:[%s9105_s12 + $0x82] sm:$0xff]  ;;  %v11751_v23 = vld [vmem:[#allocation45_spill] sm:$0xff] }
 0x144   : > { %7820 = vmatprep.mubr.msk.bf16.mxu1 %vm8818_vm0, %v11625_v2  ;;  %7272 = vmatpush3.bf16.msra.mxu0 %v8404_v21  ;;  %v9922_v21 = vld [vmem:[%s9105_s12 + $0x88] sm:$0xff]  ;;  %11731 = vst [vmem:[#allocation28_spill] sm:$0xff] %v9925_v31  ;;  %v11737_v61 = vld [vmem:[#allocation34_spill] sm:$0xff] }
 0x145   : > { %7877 = vmatpush3.bf16.msra.mxu1 %v8405_v13  ;;  %7273 = vmatprep.subr.bf16.mxu0 %v8406_v44  ;;  %v9930_v13 = vld [vmem:[%s9105_s12 + $0x8a] sm:$0xff]  ;;  %v11733_v44 = vld [vmem:[#allocation37_spill] sm:$0xff]  ;;  %11746 = vst [vmem:[#allocation34_spill] sm:$0xff] %v9960_v3 }
 0x146   : > { %7878 = vmatprep.subr.bf16.mxu1 %v11625_v2  ;;  %11732 = vst [vmem:[#allocation35_spill] sm:$0xff] %v9930_v13  ;;  %v11736_v12 = vld [vmem:[#allocation39_spill] sm:$0xff]  ;;  %v11755_v13 = vld [vmem:[#allocation42_spill] sm:$0xff] }
 0x147   : > { %v11738_v19 = vpack.c.bf16 %v11736_v12, %v11737_v61  ;;  %v9954_v12 = vld [vmem:[%s9105_s12 + $0x90] sm:$0xff]  ;;  %v9957_v61 = vld [vmem:[%s9105_s12 + $0x98] sm:$0xff]  ;;  %v11754_v31 = vld [vmem:[#allocation47_spill] sm:$0xff] }
 0x148   : > { %7274 = vmatpush3.bf16.msra.mxu0 %v8407_v32  ;;  %v11735_v32 = vpack.c.bf16 %v11733_v44, %v11734_v25  ;;  %v9949_v44 = vld [vmem:[%s9105_s12 + $0x99] sm:$0xff]  ;;  %11744 = vst [vmem:[#allocation32_spill] sm:$0xff] %v9954_v12  ;;  %11745 = vst [vmem:[#allocation39_spill] sm:$0xff] %v9957_v61  ;;  %v11756_v20 = vpack.c.bf16 %v11754_v31, %v11755_v13  ;;  %v10000_v13 = vld [vmem:[%s9105_s12 + $0xaa] sm:$0xff] }
 0x149   : > { %7879 = vmatpush3.bf16.msra.mxu1 %v8408_v14  ;;  %v9946_v14 = vld [vmem:[%s9105_s12 + $0x91] sm:$0xff]  ;;  %11743 = vst [vmem:[#allocation37_spill] sm:$0xff] %v9949_v44 }
 0x14a   : > { %1532 = vmatmul.mubr.bf16.gmra.mrb[76].mxu0 %v11735_v32  ;;  %11742 = vst [vmem:[#allocation30_spill] sm:$0xff] %v9946_v14  ;;  %v11749_v32 = vld [vmem:[#allocation38_spill] sm:$0xff]  ;;  %v11752_v14 = vld [vmem:[#allocation40_spill] sm:$0xff] }
 0x14b   : > { %7821 = vmatmul.mubr.bf16.gmra.mrb[76].mxu1 %v11738_v19  ;;  %1539 = vmatprep.mubr.bf16.mxu0 %v11741_v30  ;;  %v11748_v19 = vld [vmem:[#allocation43_spill] sm:$0xff]  ;;  %v11753_v44 = vpack.c.bf16 %v11751_v23, %v11752_v14  ;;  %v11766_v12 = vld [vmem:[#allocation48_spill] sm:$0xff] }
 0x14c   : > { %7824 = vmatprep.mubr.msk.bf16.mxu1 %vm8818_vm0, %v11625_v2  ;;  %v11750_v37 = vpack.c.bf16 %v11748_v19, %v11749_v32  ;;  %v9981_v30 = vld [vmem:[%s9105_s12 + $0xa1] sm:$0xff]  ;;  %v11760_v32 = vld [vmem:[#allocation44_spill] sm:$0xff]  ;;  %v11767_v61 = vpack.c.bf16 %v11765_v29, %v11766_v12 }
 0x14d   : > { %11757 = vst [vmem:[#allocation36_spill] sm:$0xff] %v9981_v30  ;;  %v9989_v23 = vld [vmem:[%s9105_s12 + $0xa0] sm:$0xff]  ;;  %v9992_v14 = vld [vmem:[%s9105_s12 + $0xa8] sm:$0xff]  ;;  %v10016_v31 = vld [vmem:[%s9105_s12 + $0xb1] sm:$0xff] }
 0x14e   : > { %v11762_v30 = vld [vmem:[#allocation51_spill] sm:$0xff]  ;;  %11768 = vst [vmem:[#allocation38_spill] sm:$0xff] %v10016_v31  ;;  %v10030_v12 = vld [vmem:[%s9105_s12 + $0xb2] sm:$0xff]  ;;  %v10035_v29 = vld [vmem:[%s9105_s12 + $0xba] sm:$0xff] }
 0x14f   : > { %v11772_v19 = vld [vmem:[#allocation52_spill] sm:$0xff] }
 0x150   : > { %v11773_v31 = vpack.c.bf16 %v9286_v57, %v11772_v19  ;;  %v10059_v57 = vld [vmem:[%s9105_s12 + $0xc0] sm:$0xff]  ;;  %v10062_v19 = vld [vmem:[%s9105_s12 + $0xc8] sm:$0xff] }
 0x152   : > { %1540 = vmatmul.mubr.bf16.gmra.mrb[80].mxu0 %v11750_v37  ;;  %v9984_v37 = vld [vmem:[%s9105_s12 + $0xa9] sm:$0xff] }
 0x153   : > { %7825 = vmatmul.mubr.bf16.gmra.mrb[80].mxu1 %v11753_v44  ;;  %1547 = vmatprep.mubr.bf16.mxu0 %v11756_v20  ;;  %11758 = vst [vmem:[#allocation43_spill] sm:$0xff] %v9984_v37  ;;  %v9995_v20 = vld [vmem:[%s9105_s12 + $0xa2] sm:$0xff]  ;;  %v11759_v44 = vld [vmem:[#allocation49_spill] sm:$0xff] }
 0x154   : > { %7828 = vmatprep.mubr.msk.bf16.mxu1 %vm8818_vm0, %v11625_v2  ;;  %v11761_v25 = vpack.c.bf16 %v11759_v44, %v11760_v32  ;;  %v11763_v37 = vld [vmem:[#allocation46_spill] sm:$0xff]  ;;  %v11777_v44 = vpack.c.bf16 %v9335_v56, %v9304_v22  ;;  %v10100_v22 = vld [vmem:[%s9105_s12 + $0xd2] sm:$0xff] }
 0x155   : > { %v11764_v3 = vpack.c.bf16 %v11762_v30, %v11763_v37  ;;  %v10027_v30 = vld [vmem:[%s9105_s12 + $0xb8] sm:$0xff]  ;;  %v10121_v56 = vld [vmem:[%s9105_s12 + $0xe1] sm:$0xff] }
 0x156   : > { %v11770_v37 = vld [vmem:[#allocation50_spill] sm:$0xff] }
 0x157   : > { %v11771_v32 = vpack.c.bf16 %v9278_v48, %v11770_v37  ;;  %v10054_v48 = vld [vmem:[%s9105_s12 + $0xc9] sm:$0xff]  ;;  %v11776_v37 = vpack.c.bf16 %v9318_v52, %v9289_v6  ;;  %v10097_v52 = vld [vmem:[%s9105_s12 + $0xd8] sm:$0xff] }
 0x158   : > { %v10094_v6 = vld [vmem:[%s9105_s12 + $0xd0] sm:$0xff] }
 0x159   : > { %11778 = vst [vmem:[#allocation40_spill] sm:$0xff] %v10094_v6  ;;  %v10124_v6 = vld [vmem:[%s9105_s12 + $0xe9] sm:$0xff] }
 0x15a   : > { %1548 = vmatmul.mubr.bf16.gmra.mrb[84].mxu0 %v11761_v25  ;;  %v10019_v25 = vld [vmem:[%s9105_s12 + $0xb9] sm:$0xff] }
 0x15b   : > { %7829 = vmatmul.mubr.bf16.gmra.mrb[84].mxu1 %v11764_v3  ;;  %1555 = vmatprep.mubr.bf16.mxu0 %v11767_v61  ;;  %11769 = vst [vmem:[#allocation45_spill] sm:$0xff] %v10019_v25  ;;  %v10024_v3 = vld [vmem:[%s9105_s12 + $0xb0] sm:$0xff]  ;;  %v11774_v25 = vpack.c.bf16 %v9301_v26, %v9275_v45  ;;  %v10051_v61 = vld [vmem:[%s9105_s12 + $0xc1] sm:$0xff] }
 0x15c   : > { %7832 = vmatprep.mubr.msk.bf16.mxu1 %vm8818_vm0, %v11625_v2  ;;  %v10065_v26 = vld [vmem:[%s9105_s12 + $0xc2] sm:$0xff]  ;;  %v10086_v45 = vld [vmem:[%s9105_s12 + $0xd1] sm:$0xff] }
 0x162   : > { %1556 = vmatmul.mubr.bf16.gmra.mrb[88].mxu0 %v11771_v32  ;;  %v11781_v32 = vpack.c.bf16 %v9359_v16, %v9338_v18  ;;  %v10140_v18 = vld [vmem:[%s9105_s12 + $0xea] sm:$0xff]  ;;  %v8819_v16 = vmov 0  }
 0x163   : > { %7833 = vmatmul.mubr.bf16.gmra.mrb[88].mxu1 %v11773_v31  ;;  %1563 = vmatprep.mubr.bf16.mxu0 %v11774_v25  ;;  %v10070_v31 = vld [vmem:[%s9105_s12 + $0xca] sm:$0xff]  ;;  %v11775_v25 = vpack.c.bf16 %v9307_v15, %v9283_v53  ;;  %v10089_v15 = vld [vmem:[%s9105_s12 + $0xd9] sm:$0xff]  ;;  %v11780_v53 = vpack.c.bf16 %v9351_v10, %v9321_v58  ;;  %v10135_v10 = vld [vmem:[%s9105_s12 + $0xe2] sm:$0xff] }
 0x164   : > { %7836 = vmatprep.mubr.msk.bf16.mxu1 %vm8818_vm0, %v11625_v2  ;;  %v10132_v58 = vld [vmem:[%s9105_s12 + $0xe8] sm:$0xff]  ;;  %8335 = vset.pattern.permute.xlu0 %v8819_v16 }
 0x165   : > { %8336 = vset.pattern.permute.xlu1 %v8819_v16  ;;  %v10178_v16 = vld [vmem:[%s9105_s12 + $0xfa] sm:$0xff] }
 0x166   : > { %11789 = vst [vmem:[#allocation51_spill] sm:$0xff] %v10178_v16 }
 0x16a   : > { %1564 = vmatmul.mubr.bf16.gmra.mrb[92].mxu0 %v11775_v25 }
 0x16b   : > { %7837 = vmatmul.mubr.bf16.gmra.mrb[92].mxu1 %v11776_v37  ;;  %1571 = vmatprep.mubr.bf16.mxu0 %v11777_v44  ;;  %v10105_v44 = vld [vmem:[%s9105_s12 + $0xda] sm:$0xff]  ;;  %v11779_v37 = vpack.c.bf16 %v9341_v39, %v9315_v59  ;;  %v11784_v59 = vpack.c.bf16 %v9401_v4, %v9362_v49  ;;  %v10173_v4 = vld [vmem:[%s9105_s12 + $0xf2] sm:$0xff] }
 0x16c   : > { %7840 = vmatprep.mubr.msk.bf16.mxu1 %vm8818_vm0, %v11625_v2  ;;  %v10129_v39 = vld [vmem:[%s9105_s12 + $0xe0] sm:$0xff]  ;;  %v10170_v49 = vld [vmem:[%s9105_s12 + $0xf8] sm:$0xff]  ;;  %11788 = vst [vmem:[#allocation44_spill] sm:$0xff] %v10173_v4 }
 0x16d   : > { %11787 = vst [vmem:[#allocation49_spill] sm:$0xff] %v10170_v49  ;;  %v10208_v4 = vld [vmem:[%s9105_s12 + $0x100] sm:$0xff]  ;;  %v2604_v49 = vld [vmem:[%s11446_s0 + $0x28] sm:$0xff] }
 0x172   : > { %1572 = vmatmul.mubr.bf16.gmra.mrb[96].mxu0 %v11779_v37  ;;  %v11783_v37 = vpack.c.bf16 %v9378_v9, %v9354_v28  ;;  %v10167_v28 = vld [vmem:[%s9105_s12 + $0xf0] sm:$0xff]  ;;  %v11791_v9 = vpack.c.bf16 %v9415_v47, %v9381_v5 }
 0x173   : > { %7841 = vmatmul.mubr.bf16.gmra.mrb[96].mxu1 %v11780_v53  ;;  %1579 = vmatprep.mubr.bf16.mxu0 %v11781_v32  ;;  %v11782_v32 = vpack.c.bf16 %v9365_v0, %v9346_v63  ;;  %v2599_v0 = vld [vmem:[%s11446_s0] sm:$0xff]  ;;  %v10159_v63 = vld [vmem:[%s9105_s12 + $0xf1] sm:$0xff]  ;;  %11786 = vst [vmem:[#allocation42_spill] sm:$0xff] %v10167_v28  ;;  %v11792_v53 = vpack.c.bf16 %v9425_v1, %v9404_v34 }
 0x174   : > { %7844 = vmatprep.mubr.msk.bf16.mxu1 %vm8818_vm0, %v11625_v2  ;;  %11785 = vst [vmem:[#allocation47_spill] sm:$0xff] %v10159_v63  ;;  %2631 = vperm.xlu0 %8335, %v2599_v0   ;;  %v2601_v1 = vld [vmem:[%s11446_s0 + $0x10] sm:$0xff]  ;;  %v10200_v34 = vld [vmem:[%s9105_s12 + $0x101] sm:$0xff] }
 0x175   : > { %11793 = vst [vmem:[#allocation46_spill] sm:$0xff] %v10200_v34  ;;  %2641 = vperm.xlu1 %8336, %v2601_v1   ;;  %v10221_v63 = vld [vmem:[%s9105_s12 + $0x10a] sm:$0xff]  ;;  %v11795_v1 = vpack.c.bf16 %v9431_v55, %v9412_v62  ;;  %v2602_v55 = vld [vmem:[%s11446_s0 + $0x18] sm:$0xff] }
 0x179   : > { %2646 = vperm.xlu1 %8336, %v2602_v55   ;;  %v10256_v55 = vld [vmem:[%s9105_s12 + $0x112] sm:$0xff] }
 0x17a   : > { %1580 = vmatmul.mubr.bf16.gmra.mrb[100].mxu0 %v11782_v32  ;;  %v10162_v32 = vld [vmem:[%s9105_s12 + $0xf9] sm:$0xff]  ;;  %11801 = vst [vmem:[#allocation73_spill] sm:$0xff] %v10256_v55  ;;  %v11811_v55 = vld [vmem:[#allocation56_spill] sm:$0xff] }
 0x17b   : > { %7845 = vmatmul.mubr.bf16.gmra.mrb[100].mxu1 %v11783_v37  ;;  %1587 = vmatprep.mubr.bf16.mxu0 %v11784_v59  ;;  %v11790_v37 = vpack.c.bf16 %v9409_v7, %v9375_v17  ;;  %v2600_v59 = vld [vmem:[%s11446_s0 + $0x8] sm:$0xff] }
 0x17c   : > { %7848 = vmatprep.mubr.msk.bf16.mxu1 %vm8818_vm0, %v11625_v2  ;;  %2636 = vperm.xlu0 %8335, %v2600_v59  }
 0x17d   : > { %2656 = vperm.xlu1 %8336, %v2604_v49  }
 0x182   : > { %1588 = vmatmul.mubr.bf16.gmra.mrb[104].mxu0 %v11790_v37 }
 0x183   : > { %7849 = vmatmul.mubr.bf16.gmra.mrb[104].mxu1 %v11791_v9  ;;  %1595 = vmatprep.mubr.bf16.mxu0 %v11792_v53  ;;  %v7017_v7 = vpop.f32.mrb[0].mxu0  ;;  %v1204_v37 = vpop.f32.mrb[0].mxu1  ;;  %v10203_v53 = vld [vmem:[%s9105_s12 + $0x109] sm:$0xff] }
 0x184   : > { %7852 = vmatprep.mubr.msk.bf16.mxu1 %vm8818_vm0, %v11625_v2  ;;  %v7018_v17 = vpop.f32.mrb[1].mxu0  ;;  %v7730_v9 = vpop.f32.mrb[1].mxu1 }
 0x185   : > { %v7019_v47 = vadd.f32 %v7018_v17, %v7017_v7  ;;  %v7020_v5 = vpop.f32.mrb[2].mxu0  ;;  %v1207_v25 = vpop.f32.mrb[2].mxu1  ;;  %v10211_v7 = vld [vmem:[%s9105_s12 + $0x108] sm:$0xff] }
 0x186   : > { %v7021_v0 = vpop.f32.mrb[3].mxu0  ;;  %v10214_v17 = vld [vmem:[%s9105_s12 + $0x102] sm:$0xff]  ;;  %v7731_v28 = vpop.f32.mrb[3].mxu1 }
 0x187   : > { %11794 = vst [vmem:[#allocation53_spill] sm:$0xff] %v10214_v17  ;;  %v10216_v9 = vadd.f32 %v7019_v47, %v1204_v37  ;;  %v7022_v16 = vadd.f32 %v7021_v0, %v7020_v5  ;;  %v11796_v0 = vpack.c.bf16 %v9439_v41, %v9418_v40  ;;  %v11797_v28 = vpack.c.bf16 %v9467_v43, %v9428_v60  ;;  %v10242_v43 = vld [vmem:[%s9105_s12 + $0x111] sm:$0xff]  ;;  %v10245_v60 = vld [vmem:[%s9105_s12 + $0x119] sm:$0xff] }
 0x188   : > { %11798 = vst [vmem:[#allocation48_spill] sm:$0xff] %v10242_v43  ;;  %v10266_v17 = vld [vmem:[%s9105_s12 + $0x11a] sm:$0xff] }
 0x189   : > { %v10228_v34 = vadd.f32 %v7022_v16, %v1207_v25  ;;  %11802 = vst [vmem:[#allocation74_spill] sm:$0xff] %v10266_v17 }
 0x18a   : > { %1596 = vmatmul.mubr.bf16.gmra.mrb[108].mxu0 %v11795_v1  ;;  %v11803_v1 = vpack.c.bf16 %v9473_v35, %v9436_v54 }
 0x18b   : > { %7853 = vmatmul.mubr.bf16.gmra.mrb[108].mxu1 %v11796_v0  ;;  %1603 = vmatprep.mubr.bf16.mxu0 %v11797_v28  ;;  %v7023_v62 = vpop.f32.mrb[4].mxu0  ;;  %v1212_v16 = vpop.f32.mrb[4].mxu1  ;;  %v10250_v0 = vld [vmem:[%s9105_s12 + $0x110] sm:$0xff]  ;;  %v10253_v28 = vld [vmem:[%s9105_s12 + $0x118] sm:$0xff] }
 0x18c   : > { %7856 = vmatprep.mubr.msk.bf16.mxu1 %vm8818_vm0, %v11625_v2  ;;  %v7024_v25 = vpop.f32.mrb[5].mxu0  ;;  %v7734_v37 = vpop.f32.mrb[5].mxu1  ;;  %11799 = vst [vmem:[#allocation50_spill] sm:$0xff] %v10250_v0  ;;  %11800 = vst [vmem:[#allocation52_spill] sm:$0xff] %v10253_v28  ;;  %v11813_v0 = vld [vmem:[#allocation59_spill] sm:$0xff]  ;;  %v11814_v28 = vld [vmem:[#allocation57_spill] sm:$0xff] }
 0x18d   : > { %v7025_v41 = vadd.f32 %v7024_v25, %v7023_v62  ;;  %v7026_v40 = vpop.f32.mrb[6].mxu0  ;;  %v1215_v5 = vpop.f32.mrb[6].mxu1  ;;  %v2603_v37 = vld [vmem:[%s11446_s0 + $0x20] sm:$0xff]  ;;  %v11815_v43 = vpack.c.bf16 %v11813_v0, %v11814_v28 }
 0x18e   : > { %v7027_v47 = vpop.f32.mrb[7].mxu0  ;;  %v7735_v25 = vpop.f32.mrb[7].mxu1  ;;  %2651 = vperm.xlu0 %8335, %v2603_v37  }
 0x18f   : > { %v10258_v59 = vadd.f32 %v7025_v41, %v1212_v16  ;;  %v7028_v62 = vadd.f32 %v7027_v47, %v7026_v40  ;;  %v11804_v40 = vld [vmem:[#allocation54_spill] sm:$0xff]  ;;  %v11806_v25 = vpack.c.bf16 %v11664_v38, %v9470_v51  ;;  %v2605_v38 = vld [vmem:[%s11446_s0 + $0x30] sm:$0xff] }
 0x190   : > { %v11805_v47 = vpack.c.bf16 %v9481_v8, %v11804_v40  ;;  %v2606_v51 = vld [vmem:[%s11446_s0 + $0x38] sm:$0xff] }
 0x191   : > { %v10273_v41 = vadd.f32 %v7028_v62, %v1215_v5  ;;  %2666 = vperm.xlu1 %8336, %v2606_v51   ;;  %v11810_v16 = vld [vmem:[#allocation58_spill] sm:$0xff] }
 0x192   : > { %1604 = vmatmul.mubr.bf16.gmra.mrb[112].mxu0 %v11803_v1  ;;  %2661 = vperm.xlu0 %8335, %v2605_v38   ;;  %v11812_v17 = vpack.c.bf16 %v11810_v16, %v11811_v55 }
 0x193   : > { %7857 = vmatmul.mubr.bf16.gmra.mrb[112].mxu1 %v11805_v47  ;;  %1611 = vmatprep.mubr.bf16.mxu0 %v11806_v25  ;;  %v7029_v54 = vpop.f32.mrb[8].mxu0  ;;  %v1220_v5 = vpop.f32.mrb[8].mxu1 }
 0x194   : > { %7860 = vmatprep.mubr.msk.bf16.mxu1 %vm8818_vm0, %v11625_v2  ;;  %v7030_v35 = vpop.f32.mrb[9].mxu0  ;;  %v7738_v37 = vpop.f32.mrb[9].mxu1 }
 0x195   : > { %v7031_v1 = vadd.f32 %v7030_v35, %v7029_v54  ;;  %v7032_v62 = vpop.f32.mrb[10].mxu0  ;;  %v1223_v40 = vpop.f32.mrb[10].mxu1  ;;  %v11807_v54 = vld [vmem:[#allocation55_spill] sm:$0xff] }
 0x196   : > { %v7033_v8 = vpop.f32.mrb[11].mxu0  ;;  %v7739_v49 = vpop.f32.mrb[11].mxu1  ;;  %v11808_v35 = vpack.c.bf16 %v9497_v46, %v11807_v54  ;;  %v2607_v46 = vld [vmem:[%s11446_s0 + $0x40] sm:$0xff] }
 0x197   : > { %v10292_v47 = vadd.f32 %v7031_v1, %v1220_v5  ;;  %v7034_v25 = vadd.f32 %v7033_v8, %v7032_v62  ;;  %v2628_v5 = vld [vmem:[%s11446_s0 + $0xe8] sm:$0xff]  ;;  %2671 = vperm.xlu0 %8335, %v2607_v46   ;;  %v2609_v8 = vld [vmem:[%s11446_s0 + $0x50] sm:$0xff]  ;;  %v11817_v54 = vld [vmem:[#allocation66_spill] sm:$0xff] }
 0x198   : > { %2776 = vperm.xlu1 %8336, %v2628_v5   ;;  %v11816_v49 = vld [vmem:[#allocation67_spill] sm:$0xff]  ;;  %v11819_v46 = vld [vmem:[#allocation68_spill] sm:$0xff] }
 0x199   : > { %v10297_v37 = vadd.f32 %v7034_v25, %v1223_v40  ;;  %v2608_v40 = vld [vmem:[%s11446_s0 + $0x48] sm:$0xff] }
 0x19a   : > { %1612 = vmatmul.mubr.bf16.gmra.mrb[116].mxu0 %v11808_v35  ;;  %v11818_v35 = vpack.c.bf16 %v11816_v49, %v11817_v54  ;;  %v2612_v49 = vld [vmem:[%s11446_s0 + $0x68] sm:$0xff] }
 0x19b   : > { %11809 = vst [vmem:[#allocation54_spill] sm:$0xff] %v10297_v37  ;;  %7861 = vmatmul.mubr.bf16.gmra.mrb[116].mxu1 %v11812_v17  ;;  %2228 = vmatprep.mubr.bf16.mxu0 %v11815_v43  ;;  %v7035_v1 = vpop.f32.mrb[12].mxu0  ;;  %v1228_v17 = vpop.f32.mrb[12].mxu1 }
 0x19c   : > { %7880 = vmatprep.mubr.msk.bf16.mxu1 %vm8818_vm0, %v11625_v2  ;;  %v7036_v55 = vpop.f32.mrb[13].mxu0  ;;  %v7742_v0 = vpop.f32.mrb[13].mxu1  ;;  %2681 = vperm.xlu1 %8336, %v2609_v8  }
 0x19d   : > { %v7037_v16 = vadd.f32 %v7036_v55, %v7035_v1  ;;  %v7038_v62 = vpop.f32.mrb[14].mxu0  ;;  %v1231_v28 = vpop.f32.mrb[14].mxu1  ;;  %2676 = vperm.xlu0 %8335, %v2608_v40   ;;  %v11820_v1 = vpack.c.bf16 %v9748_v11, %v11819_v46  ;;  %v11821_v55 = vld [vmem:[#allocation60_spill] sm:$0xff]  ;;  %v11822_v0 = vld [vmem:[#allocation61_spill] sm:$0xff] }
 0x19e   : > { %v7039_v43 = vpop.f32.mrb[15].mxu0  ;;  %v7743_v25 = vpop.f32.mrb[15].mxu1  ;;  %v11823_v37 = vpack.c.bf16 %v11821_v55, %v11822_v0  ;;  %v11825_v0 = vpack.c.bf16 %v9783_v27, %v9778_v42 }
 0x19f   : > { %v10319_v51 = vadd.f32 %v7037_v16, %v1228_v17  ;;  %v7040_v38 = vadd.f32 %v7039_v43, %v7038_v62  ;;  %v2611_v17 = vld [vmem:[%s11446_s0 + $0x60] sm:$0xff]  ;;  %v2610_v16 = vld [vmem:[%s11446_s0 + $0x58] sm:$0xff]  ;;  %v2613_v25 = vld [vmem:[%s11446_s0 + $0x70] sm:$0xff] }
 0x1a0   : > { %2691 = vperm.xlu1 %8336, %v2611_v17   ;;  %v11826_v17 = vld [vmem:[#allocation62_spill] sm:$0xff] }
 0x1a1   : > { %v10324_v5 = vadd.f32 %v7040_v38, %v1231_v28  ;;  %2686 = vperm.xlu0 %8335, %v2610_v16   ;;  %v11827_v16 = vld [vmem:[#allocation63_spill] sm:$0xff] }
 0x1a2   : > { %2229 = vmatmul.mubr.bf16.vlgmr.msra.gmra.mrb[120].mxu0 %v11818_v35 }
 0x1a3   : > { %7881 = vmatmul.mubr.bf16.vlgmr.msra.gmra.mrb[120].mxu1 %v11820_v1  ;;  %2236 = vmatprep.mubr.bf16.mxu0 %v11823_v37  ;;  %v7041_v62 = vpop.f32.mrb[16].mxu0  ;;  %v1236_v43 = vpop.f32.mrb[16].mxu1  ;;  %v11824_v1 = vpack.c.bf16 %v9775_v50, %v9772_v33  ;;  %v2614_v33 = vld [vmem:[%s11446_s0 + $0x78] sm:$0xff] }
 0x1a4   : > { %7884 = vmatprep.mubr.msk.bf16.mxu1 %vm8818_vm0, %v11625_v2  ;;  %v7042_v11 = vpop.f32.mrb[17].mxu0  ;;  %v7746_v40 = vpop.f32.mrb[17].mxu1  ;;  %2701 = vperm.xlu1 %8336, %v2613_v25   ;;  %v2616_v25 = vld [vmem:[%s11446_s0 + $0x88] sm:$0xff] }
 0x1a5   : > { %v7043_v28 = vadd.f32 %v7042_v11, %v7041_v62  ;;  %v7044_v8 = vpop.f32.mrb[18].mxu0  ;;  %v1239_v38 = vpop.f32.mrb[18].mxu1  ;;  %2696 = vperm.xlu0 %8335, %v2612_v49   ;;  %v11828_v62 = vpack.c.bf16 %v11826_v17, %v11827_v16  ;;  %v2615_v11 = vld [vmem:[%s11446_s0 + $0x80] sm:$0xff]  ;;  %v11830_v17 = vld [vmem:[#allocation64_spill] sm:$0xff]  ;;  %v11831_v16 = vld [vmem:[#allocation65_spill] sm:$0xff] }
 0x1a6   : > { %v7045_v37 = vpop.f32.mrb[19].mxu0  ;;  %v7747_v46 = vpop.f32.mrb[19].mxu1 }
 0x1a7   : > { %v10346_v54 = vadd.f32 %v7043_v28, %v1236_v43  ;;  %v7046_v35 = vadd.f32 %v7045_v37, %v7044_v8 }
 0x1a8   : > { %2711 = vperm.xlu1 %8336, %v2615_v11   ;;  %v11833_v11 = vld [vmem:[#allocation20_spill] sm:$0xff] }
 0x1a9   : > { %v10351_v55 = vadd.f32 %v7046_v35, %v1239_v38  ;;  %2706 = vperm.xlu0 %8335, %v2614_v33   ;;  %v2617_v38 = vld [vmem:[%s11446_s0 + $0x90] sm:$0xff]  ;;  %v11834_v33 = vld [vmem:[#allocation23_spill] sm:$0xff] }
 0x1aa   : > { %2237 = vmatmul.mubr.bf16.gmra.mrb[124].mxu0 %v11824_v1  ;;  %v11829_v1 = vpack.c.bf16 %v9811_v24, %v9808_v36  ;;  %v2618_v36 = vld [vmem:[%s11446_s0 + $0x98] sm:$0xff] }
 0x1ab   : > { %7885 = vmatmul.mubr.bf16.gmra.mrb[124].mxu1 %v11825_v0  ;;  %2244 = vmatprep.mubr.bf16.mxu0 %v11828_v62  ;;  %v7047_v50 = vpop.f32.mrb[20].mxu0  ;;  %v1244_v27 = vpop.f32.mrb[20].mxu1  ;;  %v11832_v62 = vpack.c.bf16 %v11830_v17, %v11831_v16  ;;  %v11837_v16 = vld [vmem:[#allocation70_spill] sm:$0xff] }
 0x1ac   : > { %7888 = vmatprep.mubr.msk.bf16.mxu1 %vm8818_vm0, %v11625_v2  ;;  %v7048_v42 = vpop.f32.mrb[21].mxu0  ;;  %v7750_v8 = vpop.f32.mrb[21].mxu1  ;;  %2721 = vperm.xlu1 %8336, %v2617_v38  }
 0x1ad   : > { %v7049_v43 = vadd.f32 %v7048_v42, %v7047_v50  ;;  %v7050_v28 = vpop.f32.mrb[22].mxu0  ;;  %v1247_v37 = vpop.f32.mrb[22].mxu1  ;;  %2716 = vperm.xlu0 %8335, %v2616_v25   ;;  %v11835_v50 = vpack.c.bf16 %v11833_v11, %v11834_v33  ;;  %v2619_v42 = vld [vmem:[%s11446_s0 + $0xa0] sm:$0xff]  ;;  %v2621_v25 = vld [vmem:[%s11446_s0 + $0xb0] sm:$0xff] }
 0x1ae   : > { %v7051_v40 = vpop.f32.mrb[23].mxu0  ;;  %v7751_v46 = vpop.f32.mrb[23].mxu1 }
 0x1af   : > { %v10373_v49 = vadd.f32 %v7049_v43, %v1244_v27  ;;  %v7052_v35 = vadd.f32 %v7051_v40, %v7050_v28 }
 0x1b0   : > { %2731 = vperm.xlu1 %8336, %v2619_v42   ;;  %v11842_v42 = vld [vmem:[#allocation71_spill] sm:$0xff] }
 0x1b1   : > { %v10378_v0 = vadd.f32 %v7052_v35, %v1247_v37  ;;  %2726 = vperm.xlu0 %8335, %v2618_v36   ;;  %v2620_v35 = vld [vmem:[%s11446_s0 + $0xa8] sm:$0xff] }
 0x1b2   : > { %2245 = vmatmul.mubr.bf16.gmra.mrb[128].mxu0 %v11829_v1 }
 0x1b3   : > { %7889 = vmatmul.mubr.bf16.gmra.mrb[128].mxu1 %v11832_v62  ;;  %2252 = vmatprep.mubr.bf16.mxu0 %v11835_v50  ;;  %v7053_v24 = vpop.f32.mrb[24].mxu0  ;;  %v1252_v43 = vpop.f32.mrb[24].mxu1  ;;  %v11838_v62 = vld [vmem:[#allocation69_spill] sm:$0xff]  ;;  %v11841_v50 = vld [vmem:[#allocation72_spill] sm:$0xff] }
 0x1b4   : > { %7892 = vmatprep.mubr.msk.bf16.mxu1 %vm8818_vm0, %v11625_v2  ;;  %v7054_v27 = vpop.f32.mrb[25].mxu0  ;;  %v7754_v40 = vpop.f32.mrb[25].mxu1  ;;  %2741 = vperm.xlu1 %8336, %v2621_v25   ;;  %v11839_v11 = vpack.c.bf16 %v11837_v16, %v11838_v62  ;;  %v11843_v36 = vpack.c.bf16 %v11841_v50, %v11842_v42  ;;  %v2625_v62 = vld [vmem:[%s11446_s0 + $0xd0] sm:$0xff] }
 0x1b5   : > { %v7055_v28 = vadd.f32 %v7054_v27, %v7053_v24  ;;  %v7056_v8 = vpop.f32.mrb[26].mxu0  ;;  %v1255_v38 = vpop.f32.mrb[26].mxu1  ;;  %2736 = vperm.xlu0 %8335, %v2620_v35   ;;  %v11844_v24 = vld [vmem:[#allocation21_spill] sm:$0xff] }
 0x1b6   : > { %v7057_v37 = vpop.f32.mrb[27].mxu0  ;;  %v7755_v17 = vpop.f32.mrb[27].mxu1  ;;  %v11845_v27 = vld [vmem:[#allocation25_spill] sm:$0xff] }
 0x1b7   : > { %v10400_v46 = vadd.f32 %v7055_v28, %v1252_v43  ;;  %v7058_v1 = vadd.f32 %v7057_v37, %v7056_v8  ;;  %v11846_v40 = vpack.c.bf16 %v11844_v24, %v11845_v27  ;;  %v2623_v43 = vld [vmem:[%s11446_s0 + $0xc0] sm:$0xff]  ;;  %v2622_v28 = vld [vmem:[%s11446_s0 + $0xb8] sm:$0xff] }
 0x1b8   : > { %2751 = vperm.xlu1 %8336, %v2623_v43   ;;  %v11847_v24 = vld [vmem:[#allocation22_spill] sm:$0xff]  ;;  %v11848_v27 = vld [vmem:[#allocation27_spill] sm:$0xff] }
 0x1b9   : > { %11836 = vst [vmem:[#allocation55_spill] sm:$0xff] %v10400_v46  ;;  %v10405_v33 = vadd.f32 %v7058_v1, %v1255_v38  ;;  %2746 = vperm.xlu0 %8335, %v2622_v28   ;;  %v11850_v28 = vld [vmem:[#allocation24_spill] sm:$0xff] }
 0x1ba   : > { %2253 = vmatmul.mubr.bf16.gmra.mrb[132].mxu0 %v11839_v11  ;;  %v2624_v11 = vld [vmem:[%s11446_s0 + $0xc8] sm:$0xff] }
 0x1bb   : > { %11840 = vst [vmem:[#allocation58_spill] sm:$0xff] %v10405_v33  ;;  %7893 = vmatmul.mubr.bf16.gmra.mrb[132].mxu1 %v11843_v36  ;;  %2260 = vmatprep.mubr.bf16.mxu0 %v11846_v40  ;;  %v7059_v8 = vpop.f32.mrb[28].mxu0  ;;  %v1260_v38 = vpop.f32.mrb[28].mxu1  ;;  %v11849_v40 = vpack.c.bf16 %v11847_v24, %v11848_v27  ;;  %v11854_v33 = vld [vmem:[#allocation31_spill] sm:$0xff] }
 0x1bc   : > { %7896 = vmatprep.mubr.msk.bf16.mxu1 %vm8818_vm0, %v11625_v2  ;;  %v7060_v37 = vpop.f32.mrb[29].mxu0  ;;  %v7758_v1 = vpop.f32.mrb[29].mxu1  ;;  %2761 = vperm.xlu1 %8336, %v2625_v62  }
 0x1bd   : > { %v7061_v25 = vadd.f32 %v7060_v37, %v7059_v8  ;;  %v7062_v35 = vpop.f32.mrb[30].mxu0  ;;  %v1263_v16 = vpop.f32.mrb[30].mxu1  ;;  %2756 = vperm.xlu0 %8335, %v2624_v11   ;;  %v11851_v8 = vld [vmem:[#allocation29_spill] sm:$0xff]  ;;  %v11853_v1 = vld [vmem:[#allocation26_spill] sm:$0xff] }
 0x1be   : > { %v7063_v17 = vpop.f32.mrb[31].mxu0  ;;  %v7759_v36 = vpop.f32.mrb[31].mxu1  ;;  %v11852_v37 = vpack.c.bf16 %v11850_v28, %v11851_v8  ;;  %v11855_v46 = vpack.c.bf16 %v11853_v1, %v11854_v33  ;;  %v11861_v1 = vld [vmem:[#allocation28_spill] sm:$0xff] }
 0x1bf   : > { %v10427_v50 = vadd.f32 %v7061_v25, %v1260_v38  ;;  %v7064_v42 = vadd.f32 %v7063_v17, %v7062_v35  ;;  %v2627_v38 = vld [vmem:[%s11446_s0 + $0xe0] sm:$0xff]  ;;  %v2626_v25 = vld [vmem:[%s11446_s0 + $0xd8] sm:$0xff] }
 0x1c0   : > { %2771 = vperm.xlu1 %8336, %v2627_v38  }
 0x1c1   : > { %v10432_v43 = vadd.f32 %v7064_v42, %v1263_v16  ;;  %2766 = vperm.xlu0 %8335, %v2626_v25   ;;  %v11863_v25 = vld [vmem:[#allocation37_spill] sm:$0xff] }
 0x1c2   : > { %2261 = vmatmul.mubr.bf16.gmra.mrb[136].mxu0 %v11849_v40  ;;  %v11857_v40 = vld [vmem:[#allocation33_spill] sm:$0xff] }
 0x1c3   : > { %7897 = vmatmul.mubr.bf16.gmra.mrb[136].mxu1 %v11852_v37  ;;  %2268 = vmatprep.mubr.bf16.mxu0 %v11855_v46  ;;  %v7065_v35 = vpop.f32.mrb[32].mxu0  ;;  %v1268_v16 = vpop.f32.mrb[32].mxu1  ;;  %v11858_v28 = vpack.c.bf16 %v9922_v21, %v11857_v40  ;;  %v11860_v37 = vld [vmem:[#allocation35_spill] sm:$0xff] }
 0x1c4   : > { %7900 = vmatprep.mubr.msk.bf16.mxu1 %vm8818_vm0, %v11625_v2  ;;  %v7066_v17 = vpop.f32.mrb[33].mxu0  ;;  %v7762_v33 = vpop.f32.mrb[33].mxu1  ;;  %v11862_v38 = vpack.c.bf16 %v11860_v37, %v11861_v1  ;;  %v11866_v37 = vld [vmem:[#allocation39_spill] sm:$0xff]  ;;  %v11867_v1 = vld [vmem:[#allocation32_spill] sm:$0xff] }
 0x1c5   : > { %v7067_v62 = vadd.f32 %v7066_v17, %v7065_v35  ;;  %v7068_v11 = vpop.f32.mrb[34].mxu0  ;;  %v1271_v42 = vpop.f32.mrb[34].mxu1  ;;  %v11864_v35 = vld [vmem:[#allocation30_spill] sm:$0xff] }
 0x1c6   : > { %v7069_v46 = vpop.f32.mrb[35].mxu0  ;;  %v7763_v27 = vpop.f32.mrb[35].mxu1  ;;  %v11865_v17 = vpack.c.bf16 %v11863_v25, %v11864_v35  ;;  %v11869_v35 = vld [vmem:[#allocation41_spill] sm:$0xff] }
 0x1c7   : > { %v10448_v36 = vadd.f32 %v7067_v62, %v1268_v16  ;;  %v7070_v24 = vadd.f32 %v7069_v46, %v7068_v11 }
 0x1c9   : > { %11856 = vst [vmem:[#allocation56_spill] sm:$0xff] %v10448_v36  ;;  %v10453_v8 = vadd.f32 %v7070_v24, %v1271_v42  ;;  %v11872_v36 = vld [vmem:[#allocation43_spill] sm:$0xff] }
 0x1ca   : > { %2269 = vmatmul.mubr.bf16.gmra.mrb[140].mxu0 %v11858_v28 }
 0x1cb   : > { %11859 = vst [vmem:[#allocation59_spill] sm:$0xff] %v10453_v8  ;;  %7901 = vmatmul.mubr.bf16.gmra.mrb[140].mxu1 %v11862_v38  ;;  %2276 = vmatprep.mubr.bf16.mxu0 %v11865_v17  ;;  %v7071_v16 = vpop.f32.mrb[36].mxu0  ;;  %v1276_v11 = vpop.f32.mrb[36].mxu1  ;;  %v11868_v38 = vpack.c.bf16 %v11866_v37, %v11867_v1  ;;  %v11870_v17 = vld [vmem:[#allocation34_spill] sm:$0xff] }
 0x1cc   : > { %7904 = vmatprep.mubr.msk.bf16.mxu1 %vm8818_vm0, %v11625_v2  ;;  %v7072_v62 = vpop.f32.mrb[37].mxu0  ;;  %v7766_v21 = vpop.f32.mrb[37].mxu1  ;;  %v11871_v8 = vpack.c.bf16 %v11869_v35, %v11870_v17  ;;  %v11876_v35 = vpack.c.bf16 %v10000_v13, %v9995_v20  ;;  %v11877_v17 = vld [vmem:[#allocation45_spill] sm:$0xff]  ;;  %v11880_v13 = vpack.c.bf16 %v10027_v30, %v10024_v3 }
 0x1cd   : > { %v7073_v33 = vadd.f32 %v7072_v62, %v7071_v16  ;;  %v7074_v46 = vpop.f32.mrb[38].mxu0  ;;  %v1279_v42 = vpop.f32.mrb[38].mxu1  ;;  %v11873_v16 = vld [vmem:[#allocation36_spill] sm:$0xff] }
 0x1ce   : > { %v7075_v27 = vpop.f32.mrb[39].mxu0  ;;  %v7767_v28 = vpop.f32.mrb[39].mxu1  ;;  %v11874_v62 = vpack.c.bf16 %v11872_v36, %v11873_v16  ;;  %v11878_v16 = vld [vmem:[#allocation38_spill] sm:$0xff] }
 0x1cf   : > { %v10463_v24 = vadd.f32 %v7073_v33, %v1276_v11  ;;  %v7076_v40 = vadd.f32 %v7075_v27, %v7074_v46 }
 0x1d1   : > { %v10468_v25 = vadd.f32 %v7076_v40, %v1279_v42 }
 0x1d2   : > { %2277 = vmatmul.mubr.bf16.gmra.mrb[144].mxu0 %v11868_v38 }
 0x1d3   : > { %7905 = vmatmul.mubr.bf16.gmra.mrb[144].mxu1 %v11871_v8  ;;  %2284 = vmatprep.mubr.bf16.mxu0 %v11874_v62  ;;  %v7077_v11 = vpop.f32.mrb[40].mxu0  ;;  %v1284_v46 = vpop.f32.mrb[40].mxu1  ;;  %v11875_v8 = vpack.c.bf16 %v9992_v14, %v9989_v23  ;;  %v11879_v62 = vpack.c.bf16 %v11877_v17, %v11878_v16 }
 0x1d4   : > { %7908 = vmatprep.mubr.msk.bf16.mxu1 %vm8818_vm0, %v11625_v2  ;;  %v7078_v33 = vpop.f32.mrb[41].mxu0  ;;  %v7770_v28 = vpop.f32.mrb[41].mxu1 }
 0x1d5   : > { %v7079_v21 = vadd.f32 %v7078_v33, %v7077_v11  ;;  %v7080_v27 = vpop.f32.mrb[42].mxu0  ;;  %v1287_v42 = vpop.f32.mrb[42].mxu1 }
 0x1d6   : > { %v7081_v37 = vpop.f32.mrb[43].mxu0  ;;  %v7771_v38 = vpop.f32.mrb[43].mxu1 }
 0x1d7   : > { %v10478_v40 = vadd.f32 %v7079_v21, %v1284_v46  ;;  %v7082_v1 = vadd.f32 %v7081_v37, %v7080_v27  ;;  %v11881_v38 = vpack.c.bf16 %v10035_v29, %v10030_v12  ;;  %v11883_v29 = vpack.c.bf16 %v10062_v19, %v10059_v57 }
 0x1d9   : > { %v10483_v36 = vadd.f32 %v7082_v1, %v1287_v42 }
 0x1da   : > { %2285 = vmatmul.mubr.bf16.gmra.mrb[148].mxu0 %v11875_v8  ;;  %v11882_v8 = vpack.c.bf16 %v10054_v48, %v10051_v61  ;;  %v11884_v48 = vpack.c.bf16 %v10070_v31, %v10065_v26  ;;  %v11886_v31 = vld [vmem:[#allocation40_spill] sm:$0xff] }
 0x1db   : > { %7909 = vmatmul.mubr.bf16.gmra.mrb[148].mxu1 %v11876_v35  ;;  %2292 = vmatprep.mubr.bf16.mxu0 %v11879_v62  ;;  %v7083_v11 = vpop.f32.mrb[44].mxu0  ;;  %v1292_v46 = vpop.f32.mrb[44].mxu1 }
 0x1dc   : > { %7912 = vmatprep.mubr.msk.bf16.mxu1 %vm8818_vm0, %v11625_v2  ;;  %v7084_v33 = vpop.f32.mrb[45].mxu0  ;;  %v7774_v23 = vpop.f32.mrb[45].mxu1 }
 0x1dd   : > { %v7085_v21 = vadd.f32 %v7084_v33, %v7083_v11  ;;  %v7086_v27 = vpop.f32.mrb[46].mxu0  ;;  %v1295_v28 = vpop.f32.mrb[46].mxu1 }
 0x1de   : > { %v7087_v14 = vpop.f32.mrb[47].mxu0  ;;  %v7775_v20 = vpop.f32.mrb[47].mxu1 }
 0x1df   : > { %v10493_v37 = vadd.f32 %v7085_v21, %v1292_v46  ;;  %v7088_v42 = vadd.f32 %v7087_v14, %v7086_v27  ;;  %v11885_v27 = vpack.c.bf16 %v10089_v15, %v10086_v45  ;;  %v11888_v15 = vpack.c.bf16 %v10105_v44, %v10100_v22 }
 0x1e0   : > { %v11890_v44 = vpack.c.bf16 %v10132_v58, %v10129_v39 }
 0x1e1   : > { %v10498_v1 = vadd.f32 %v7088_v42, %v1295_v28 }
 0x1e2   : > { %2293 = vmatmul.mubr.bf16.gmra.mrb[152].mxu0 %v11880_v13 }
 0x1e3   : > { %7913 = vmatmul.mubr.bf16.gmra.mrb[152].mxu1 %v11881_v38  ;;  %2300 = vmatprep.mubr.bf16.mxu0 %v11882_v8  ;;  %v7089_v35 = vpop.f32.mrb[48].mxu0  ;;  %v1300_v16 = vpop.f32.mrb[48].mxu1 }
 0x1e4   : > { %7916 = vmatprep.mubr.msk.bf16.mxu1 %vm8818_vm0, %v11625_v2  ;;  %v7090_v17 = vpop.f32.mrb[49].mxu0  ;;  %v7778_v3 = vpop.f32.mrb[49].mxu1 }
 0x1e5   : > { %v7091_v62 = vadd.f32 %v7090_v17, %v7089_v35  ;;  %v7092_v11 = vpop.f32.mrb[50].mxu0  ;;  %v1303_v33 = vpop.f32.mrb[50].mxu1  ;;  %v11887_v35 = vpack.c.bf16 %v10097_v52, %v11886_v31  ;;  %v11889_v17 = vpack.c.bf16 %v10124_v6, %v10121_v56  ;;  %v11891_v56 = vpack.c.bf16 %v10140_v18, %v10135_v10  ;;  %v11897_v31 = vld [vmem:[#allocation42_spill] sm:$0xff] }
 0x1e6   : > { %v7093_v30 = vpop.f32.mrb[51].mxu0  ;;  %v7779_v12 = vpop.f32.mrb[51].mxu1 }
 0x1e7   : > { %v10508_v46 = vadd.f32 %v7091_v62, %v1300_v16  ;;  %v7094_v21 = vadd.f32 %v7093_v30, %v7092_v11 }
 0x1e9   : > { %v10513_v61 = vadd.f32 %v7094_v21, %v1303_v33 }
 0x1ea   : > { %2301 = vmatmul.mubr.bf16.gmra.mrb[156].mxu0 %v11883_v29 }
 0x1eb   : > { %7917 = vmatmul.mubr.bf16.gmra.mrb[156].mxu1 %v11884_v48  ;;  %2308 = vmatprep.mubr.bf16.mxu0 %v11885_v27  ;;  %v7095_v23 = vpop.f32.mrb[52].mxu0  ;;  %v1308_v28 = vpop.f32.mrb[52].mxu1  ;;  %v11892_v48 = vld [vmem:[#allocation47_spill] sm:$0xff] }
 0x1ec   : > { %7920 = vmatprep.mubr.msk.bf16.mxu1 %vm8818_vm0, %v11625_v2  ;;  %v7096_v14 = vpop.f32.mrb[53].mxu0  ;;  %v7782_v57 = vpop.f32.mrb[53].mxu1  ;;  %v11893_v27 = vpack.c.bf16 %v10162_v32, %v11892_v48 }
 0x1ed   : > { %v7097_v42 = vadd.f32 %v7096_v14, %v7095_v23  ;;  %v7098_v20 = vpop.f32.mrb[54].mxu0  ;;  %v1311_v13 = vpop.f32.mrb[54].mxu1  ;;  %v2812_v14 = vld [vmem:[#allocation3] sm:$0x1] }
 0x1ee   : > { %v7099_v19 = vpop.f32.mrb[55].mxu0  ;;  %v7783_v26 = vpop.f32.mrb[55].mxu1  ;;  %v2813_v32 = vsel %vm10554_vm3, 0, %v2812_v14 }
 0x1ef   : > { %v10523_v38 = vadd.f32 %v7097_v42, %v1308_v28  ;;  %v7100_v8 = vadd.f32 %v7099_v19, %v7098_v20  ;;  %2814 = vst [vmem:[#allocation3] sm:$0x1] %v2813_v32  ;;  %v11896_v26 = vld [vmem:[#allocation49_spill] sm:$0xff] }
 0x1f1   : > { %v10528_v45 = vadd.f32 %v7100_v8, %v1311_v13 }
 0x1f2   : > { %2309 = vmatmul.mubr.bf16.gmra.mrb[160].mxu0 %v11887_v35  ;;  %v11898_v35 = vpack.c.bf16 %v11896_v26, %v11897_v31  ;;  %v11909_v31 = vld [vmem:[#allocation52_spill] sm:$0xff] }
 0x1f3   : > { %7921 = vmatmul.mubr.bf16.gmra.mrb[160].mxu1 %v11888_v15  ;;  %2316 = vmatprep.mubr.bf16.mxu0 %v11889_v17  ;;  %v7101_v16 = vpop.f32.mrb[56].mxu0  ;;  %v1316_v11 = vpop.f32.mrb[56].mxu1 }
 0x1f4   : > { %7924 = vmatprep.mubr.msk.bf16.mxu1 %vm8818_vm0, %v11625_v2  ;;  %v7102_v62 = vpop.f32.mrb[57].mxu0  ;;  %v7786_v52 = vpop.f32.mrb[57].mxu1 }
 0x1f5   : > { %v7103_v3 = vadd.f32 %v7102_v62, %v7101_v16  ;;  %v7104_v30 = vpop.f32.mrb[58].mxu0  ;;  %v1319_v21 = vpop.f32.mrb[58].mxu1  ;;  %v11899_v16 = vld [vmem:[#allocation51_spill] sm:$0xff]  ;;  %v11900_v62 = vld [vmem:[#allocation44_spill] sm:$0xff] }
 0x1f6   : > { %v7105_v33 = vpop.f32.mrb[59].mxu0  ;;  %v7787_v22 = vpop.f32.mrb[59].mxu1 }
 0x1f7   : > { %v10538_v12 = vadd.f32 %v7103_v3, %v1316_v11  ;;  %v7106_v29 = vadd.f32 %v7105_v33, %v7104_v30  ;;  %v11901_v11 = vpack.c.bf16 %v11899_v16, %v11900_v62  ;;  %v11902_v3 = vld [vmem:[#allocation46_spill] sm:$0xff] }
 0x1f8   : > { %v11903_v30 = vpack.c.bf16 %v10203_v53, %v11902_v3  ;;  %v11904_v53 = vpack.c.bf16 %v10211_v7, %v10208_v4  ;;  %v11913_v62 = vld [vmem:[#allocation74_spill] sm:$0xff] }
 0x1f9   : > { %v10543_v6 = vadd.f32 %v7106_v29, %v1319_v21 }
 0x1fa   : > { %2317 = vmatmul.mubr.bf16.gmra.mrb[164].mxu0 %v11890_v44 }
 0x1fb   : > { %7925 = vmatmul.mubr.bf16.gmra.mrb[164].mxu1 %v11891_v56  ;;  %2324 = vmatprep.mubr.bf16.mxu0 %v11893_v27  ;;  %v7146_v23 = vpop.f32.mrb[60].mxu0  ;;  %v1654_v39 = vpop.f32.mrb[60].mxu1 }
 0x1fc   : > { %7928 = vmatprep.mubr.msk.bf16.mxu1 %vm8818_vm0, %v11625_v2  ;;  %v7147_v28 = vpop.f32.mrb[61].mxu0  ;;  %v7806_v42 = vpop.f32.mrb[61].mxu1 }
 0x1fd   : > { %v7148_v10 = vadd.f32 %v7147_v28, %v7146_v23  ;;  %v7149_v18 = vpop.f32.mrb[62].mxu0  ;;  %v1657_v57 = vpop.f32.mrb[62].mxu1 }
 0x1fe   : > { %v7150_v20 = vpop.f32.mrb[63].mxu0  ;;  %v7807_v8 = vpop.f32.mrb[63].mxu1 }
 0x1ff   : > { %v1502_v19 = vadd.f32 %v7148_v10, %v10216_v9  ;;  %v7151_v13 = vadd.f32 %v7150_v20, %v7149_v18  ;;  %v11907_v18 = vld [vmem:[#allocation48_spill] sm:$0xff] }
 0x200   : > { %v11908_v42 = vpack.c.bf16 %v10245_v60, %v11907_v18  ;;  %v11910_v60 = vld [vmem:[#allocation50_spill] sm:$0xff] }
 0x201   : > { %v10564_v15 = vadd.f32 %v1654_v39, %v1502_v19  ;;  %v1505_v17 = vadd.f32 %v7151_v13, %v10228_v34  ;;  %v11905_v39 = vld [vmem:[#allocation53_spill] sm:$0xff] }
 0x202   : > { %2325 = vmatmul.mubr.bf16.gmra.mrb[168].mxu0 %v11898_v35  ;;  %v11906_v10 = vpack.c.bf16 %v10221_v63, %v11905_v39  ;;  %v11911_v35 = vpack.c.bf16 %v11909_v31, %v11910_v60 }
 0x203   : > { %7929 = vmatmul.mubr.bf16.gmra.mrb[168].mxu1 %v11901_v11  ;;  %2332 = vmatprep.mubr.bf16.mxu0 %v11903_v30  ;;  %v10575_v9 = vadd.f32 %v1657_v57, %v1505_v17  ;;  %v7152_v52 = vpop.f32.mrb[64].mxu0  ;;  %v1662_v21 = vpop.f32.mrb[64].mxu1  ;;  %v11914_v11 = vld [vmem:[#allocation73_spill] sm:$0xff] }
 0x204   : > { %7932 = vmatprep.mubr.msk.bf16.mxu1 %vm8818_vm0, %v11625_v2  ;;  %v7153_v33 = vpop.f32.mrb[65].mxu0  ;;  %v7810_v44 = vpop.f32.mrb[65].mxu1  ;;  %v11915_v3 = vpack.c.bf16 %v11913_v62, %v11914_v11 }
 0x205   : > { %v7154_v29 = vadd.f32 %v7153_v33, %v7152_v52  ;;  %v7155_v22 = vpop.f32.mrb[66].mxu0  ;;  %v1665_v56 = vpop.f32.mrb[66].mxu1 }
 0x206   : > { %v7156_v34 = vpop.f32.mrb[67].mxu0  ;;  %v7811_v23 = vpop.f32.mrb[67].mxu1 }
 0x207   : > { %v1510_v48 = vadd.f32 %v7154_v29, %v10258_v59  ;;  %v7157_v27 = vadd.f32 %v7156_v34, %v7155_v22 }
 0x209   : > { %v10581_v14 = vadd.f32 %v1662_v21, %v1510_v48  ;;  %v1513_v28 = vadd.f32 %v7157_v27, %v10273_v41 }
 0x20a   : > { %2333 = vmatmul.mubr.bf16.gmra.mrb[172].mxu0 %v11904_v53 }
 0x20b   : > { %7933 = vmatmul.mubr.bf16.gmra.mrb[172].mxu1 %v11906_v10  ;;  %2340 = vmatprep.mubr.bf16.mxu0 %v11908_v42  ;;  %v10592_v59 = vadd.f32 %v1665_v56, %v1513_v28 }
 0x20c   : > { %7936 = vmatprep.mubr.msk.bf16.mxu1 %vm8818_vm0, %v11625_v2  ;;  %v7158_v32 = vpop.f32.mrb[68].mxu0  ;;  %v11912_v2 = vld [vmem:[#allocation54_spill] sm:$0xff] }
 0x20d   : > { %v7159_v4 = vpop.f32.mrb[69].mxu0  ;;  %v1670_v7 = vpop.f32.mrb[68].mxu1 }
 0x20e   : > { %v7160_v20 = vadd.f32 %v7159_v4, %v7158_v32  ;;  %v7161_v57 = vpop.f32.mrb[70].mxu0  ;;  %v7814_v19 = vpop.f32.mrb[69].mxu1 }
 0x20f   : > { %v7162_v41 = vpop.f32.mrb[71].mxu0  ;;  %v1673_v13 = vpop.f32.mrb[70].mxu1 }
 0x210   : > { %v1518_v63 = vadd.f32 %v7160_v20, %v10292_v47  ;;  %v7163_v8 = vadd.f32 %v7162_v41, %v7161_v57  ;;  %v7815_v26 = vpop.f32.mrb[71].mxu1 }
 0x212   : > { %2341 = vmatmul.mubr.bf16.gmra.mrb[176].mxu0 %v11911_v35  ;;  %v10598_v17 = vadd.f32 %v1670_v7, %v1518_v63  ;;  %v1521_v16 = vadd.f32 %v7163_v8, %v11912_v2 }
 0x213   : > { %7937 = vmatmul.mubr.bf16.gmra.mrb[176].mxu1 %v11915_v3 }
 0x214   : > { %v10604_v30 = vadd.f32 %v1673_v13, %v1521_v16 }
 0x215   : > { %v7164_v52 = vpop.f32.mrb[72].mxu0 }
 0x216   : > { %v7165_v33 = vpop.f32.mrb[73].mxu0  ;;  %v1678_v21 = vpop.f32.mrb[72].mxu1 }
 0x217   : > { %v7166_v47 = vadd.f32 %v7165_v33, %v7164_v52  ;;  %v7167_v29 = vpop.f32.mrb[74].mxu0  ;;  %v7818_v22 = vpop.f32.mrb[73].mxu1 }
 0x218   : > { %v7168_v44 = vpop.f32.mrb[75].mxu0  ;;  %v1681_v34 = vpop.f32.mrb[74].mxu1 }
 0x219   : > { %v1526_v56 = vadd.f32 %v7166_v47, %v10319_v51  ;;  %v7169_v48 = vadd.f32 %v7168_v44, %v7167_v29  ;;  %v7819_v27 = vpop.f32.mrb[75].mxu1 }
 0x21b   : > { %v10607_v23 = vadd.f32 %v1678_v21, %v1526_v56  ;;  %v1529_v53 = vadd.f32 %v7169_v48, %v10324_v5  ;;  %v11916_v48 = vld [vmem:[#allocation55_spill] sm:$0xff] }
 0x21d   : > { %v10610_v28 = vadd.f32 %v1681_v34, %v1529_v53  ;;  %v7170_v39 = vpop.f32.mrb[76].mxu0 }
 0x21e   : > { %v7171_v10 = vpop.f32.mrb[77].mxu0  ;;  %v1686_v18 = vpop.f32.mrb[76].mxu1 }
 0x21f   : > { %v7172_v42 = vadd.f32 %v7171_v10, %v7170_v39  ;;  %v7173_v32 = vpop.f32.mrb[78].mxu0  ;;  %v7822_v4 = vpop.f32.mrb[77].mxu1  ;;  %v11917_v10 = vld [vmem:[#allocation58_spill] sm:$0xff] }
 0x220   : > { %v7174_v7 = vpop.f32.mrb[79].mxu0  ;;  %v1689_v20 = vpop.f32.mrb[78].mxu1 }
 0x221   : > { %v1534_v57 = vadd.f32 %v7172_v42, %v10346_v54  ;;  %v7175_v19 = vadd.f32 %v7174_v7, %v7173_v32  ;;  %v7823_v51 = vpop.f32.mrb[79].mxu1 }
 0x223   : > { %v10613_v41 = vadd.f32 %v1686_v18, %v1534_v57  ;;  %v1537_v13 = vadd.f32 %v7175_v19, %v10351_v55 }
 0x225   : > { %v10616_v63 = vadd.f32 %v1689_v20, %v1537_v13  ;;  %v7176_v5 = vpop.f32.mrb[80].mxu0 }
 0x226   : > { %v7177_v8 = vpop.f32.mrb[81].mxu0  ;;  %v1694_v26 = vpop.f32.mrb[80].mxu1 }
 0x227   : > { %v7178_v31 = vadd.f32 %v7177_v8, %v7176_v5  ;;  %v7179_v60 = vpop.f32.mrb[82].mxu0  ;;  %v7826_v35 = vpop.f32.mrb[81].mxu1 }
 0x228   : > { %v7180_v2 = vpop.f32.mrb[83].mxu0  ;;  %v1697_v16 = vpop.f32.mrb[82].mxu1 }
 0x229   : > { %v1542_v62 = vadd.f32 %v7178_v31, %v10373_v49  ;;  %v7181_v11 = vadd.f32 %v7180_v2, %v7179_v60  ;;  %v7827_v54 = vpop.f32.mrb[83].mxu1 }
 0x22b   : > { %v10619_v3 = vadd.f32 %v1694_v26, %v1542_v62  ;;  %v1545_v52 = vadd.f32 %v7181_v11, %v10378_v0 }
 0x22d   : > { %v10622_v33 = vadd.f32 %v1697_v16, %v1545_v52  ;;  %v7182_v55 = vpop.f32.mrb[84].mxu0 }
 0x22e   : > { %v7183_v21 = vpop.f32.mrb[85].mxu0  ;;  %v1702_v47 = vpop.f32.mrb[84].mxu1 }
 0x22f   : > { %v7184_v29 = vadd.f32 %v7183_v21, %v7182_v55  ;;  %v7185_v22 = vpop.f32.mrb[86].mxu0  ;;  %v7830_v44 = vpop.f32.mrb[85].mxu1  ;;  %v11918_v21 = vld [vmem:[#allocation56_spill] sm:$0xff] }
 0x230   : > { %v7186_v34 = vpop.f32.mrb[87].mxu0  ;;  %v1705_v56 = vpop.f32.mrb[86].mxu1  ;;  %v11919_v44 = vld [vmem:[#allocation59_spill] sm:$0xff] }
 0x231   : > { %v1550_v27 = vadd.f32 %v7184_v29, %v11916_v48  ;;  %v7187_v53 = vadd.f32 %v7186_v34, %v7185_v22  ;;  %v7831_v49 = vpop.f32.mrb[87].mxu1 }
 0x233   : > { %v10625_v39 = vadd.f32 %v1702_v47, %v1550_v27  ;;  %v1553_v18 = vadd.f32 %v7187_v53, %v11917_v10 }
 0x235   : > { %v10628_v42 = vadd.f32 %v1705_v56, %v1553_v18  ;;  %v7188_v0 = vpop.f32.mrb[88].mxu0 }
 0x236   : > { %v7189_v32 = vpop.f32.mrb[89].mxu0  ;;  %v1710_v4 = vpop.f32.mrb[88].mxu1 }
 0x237   : > { %v7190_v7 = vadd.f32 %v7189_v32, %v7188_v0  ;;  %v7191_v20 = vpop.f32.mrb[90].mxu0  ;;  %v7834_v57 = vpop.f32.mrb[89].mxu1 }
 0x238   : > { %v7192_v19 = vpop.f32.mrb[91].mxu0  ;;  %v1713_v51 = vpop.f32.mrb[90].mxu1 }
 0x239   : > { %v1558_v13 = vadd.f32 %v7190_v7, %v10427_v50  ;;  %v7193_v5 = vadd.f32 %v7192_v19, %v7191_v20  ;;  %v7835_v8 = vpop.f32.mrb[91].mxu1 }
 0x23b   : > { %v10631_v26 = vadd.f32 %v1710_v4, %v1558_v13  ;;  %v1561_v31 = vadd.f32 %v7193_v5, %v10432_v43 }
 0x23d   : > { %v10634_v60 = vadd.f32 %v1713_v51, %v1561_v31  ;;  %v7194_v35 = vpop.f32.mrb[92].mxu0 }
 0x23e   : > { %v7195_v2 = vpop.f32.mrb[93].mxu0  ;;  %v1718_v16 = vpop.f32.mrb[92].mxu1 }
 0x23f   : > { %v7196_v62 = vadd.f32 %v7195_v2, %v7194_v35  ;;  %v7197_v11 = vpop.f32.mrb[94].mxu0  ;;  %v7838_v54 = vpop.f32.mrb[93].mxu1 }
 0x240   : > { %v7198_v52 = vpop.f32.mrb[95].mxu0  ;;  %v1721_v55 = vpop.f32.mrb[94].mxu1 }
 0x241   : > { %v1566_v47 = vadd.f32 %v7196_v62, %v11918_v21  ;;  %v7199_v29 = vadd.f32 %v7198_v52, %v7197_v11  ;;  %v7839_v50 = vpop.f32.mrb[95].mxu1 }
 0x243   : > { %v10637_v22 = vadd.f32 %v1718_v16, %v1566_v47  ;;  %v1569_v34 = vadd.f32 %v7199_v29, %v11919_v44 }
 0x245   : > { %v10640_v56 = vadd.f32 %v1721_v55, %v1569_v34  ;;  %v7200_v43 = vpop.f32.mrb[96].mxu0 }
 0x246   : > { %v7201_v48 = vpop.f32.mrb[97].mxu0  ;;  %v1726_v27 = vpop.f32.mrb[96].mxu1 }
 0x247   : > { %v7202_v53 = vadd.f32 %v7201_v48, %v7200_v43  ;;  %v7203_v49 = vpop.f32.mrb[98].mxu0  ;;  %v7842_v10 = vpop.f32.mrb[97].mxu1 }
 0x248   : > { %v7204_v18 = vpop.f32.mrb[99].mxu0  ;;  %v1729_v0 = vpop.f32.mrb[98].mxu1 }
 0x249   : > { %v1574_v32 = vadd.f32 %v7202_v53, %v10463_v24  ;;  %v7205_v4 = vadd.f32 %v7204_v18, %v7203_v49  ;;  %v7843_v7 = vpop.f32.mrb[99].mxu1 }
 0x24b   : > { %v10643_v20 = vadd.f32 %v1726_v27, %v1574_v32  ;;  %v1577_v57 = vadd.f32 %v7205_v4, %v10468_v25 }
 0x24d   : > { %v10646_v19 = vadd.f32 %v1729_v0, %v1577_v57  ;;  %v7206_v51 = vpop.f32.mrb[100].mxu0 }
 0x24e   : > { %v7207_v13 = vpop.f32.mrb[101].mxu0  ;;  %v1734_v5 = vpop.f32.mrb[100].mxu1 }
 0x24f   : > { %v7208_v8 = vadd.f32 %v7207_v13, %v7206_v51  ;;  %v7209_v31 = vpop.f32.mrb[102].mxu0  ;;  %v7846_v35 = vpop.f32.mrb[101].mxu1 }
 0x250   : > { %v7210_v2 = vpop.f32.mrb[103].mxu0  ;;  %v1737_v16 = vpop.f32.mrb[102].mxu1 }
 0x251   : > { %v1582_v62 = vadd.f32 %v7208_v8, %v10478_v40  ;;  %v7211_v11 = vadd.f32 %v7210_v2, %v7209_v31  ;;  %v7847_v24 = vpop.f32.mrb[103].mxu1 }
 0x253   : > { %v10649_v54 = vadd.f32 %v1734_v5, %v1582_v62  ;;  %v1585_v52 = vadd.f32 %v7211_v11, %v10483_v36 }
 0x255   : > { %v10652_v55 = vadd.f32 %v1737_v16, %v1585_v52  ;;  %v7212_v25 = vpop.f32.mrb[104].mxu0 }
 0x256   : > { %v7213_v21 = vpop.f32.mrb[105].mxu0  ;;  %v1742_v47 = vpop.f32.mrb[104].mxu1 }
 0x257   : > { %v7214_v29 = vadd.f32 %v7213_v21, %v7212_v25  ;;  %v7215_v50 = vpop.f32.mrb[106].mxu0  ;;  %v7850_v44 = vpop.f32.mrb[105].mxu1 }
 0x258   : > { %v7216_v34 = vpop.f32.mrb[107].mxu0  ;;  %v1745_v43 = vpop.f32.mrb[106].mxu1 }
 0x259   : > { %v1590_v48 = vadd.f32 %v7214_v29, %v10493_v37  ;;  %v7217_v27 = vadd.f32 %v7216_v34, %v7215_v50  ;;  %v7851_v40 = vpop.f32.mrb[107].mxu1 }
 0x25b   : > { %v10655_v53 = vadd.f32 %v1742_v47, %v1590_v48  ;;  %v1593_v49 = vadd.f32 %v7217_v27, %v10498_v1 }
 0x25d   : > { %v10658_v10 = vadd.f32 %v1745_v43, %v1593_v49  ;;  %v7218_v36 = vpop.f32.mrb[108].mxu0 }
 0x25e   : > { %v7219_v18 = vpop.f32.mrb[109].mxu0  ;;  %v1750_v0 = vpop.f32.mrb[108].mxu1 }
 0x25f   : > { %v7220_v32 = vadd.f32 %v7219_v18, %v7218_v36  ;;  %v7221_v4 = vpop.f32.mrb[110].mxu0  ;;  %v7854_v7 = vpop.f32.mrb[109].mxu1 }
 0x260   : > { %v7222_v57 = vpop.f32.mrb[111].mxu0  ;;  %v1753_v51 = vpop.f32.mrb[110].mxu1 }
 0x261   : > { %v1598_v13 = vadd.f32 %v7220_v32, %v10508_v46  ;;  %v7223_v5 = vadd.f32 %v7222_v57, %v7221_v4  ;;  %v7855_v37 = vpop.f32.mrb[111].mxu1  ;;  %v2632_v57 = vpop.permute.xlu0 %2631 }
 0x263   : > { %v10661_v8 = vadd.f32 %v1750_v0, %v1598_v13  ;;  %v1601_v31 = vadd.f32 %v7223_v5, %v10513_v61 }
 0x265   : > { %v10664_v35 = vadd.f32 %v1753_v51, %v1601_v31  ;;  %v7224_v1 = vpop.f32.mrb[112].mxu0 }
 0x266   : > { %v7225_v2 = vpop.f32.mrb[113].mxu0  ;;  %v1758_v16 = vpop.f32.mrb[112].mxu1 }
 0x267   : > { %v7226_v62 = vadd.f32 %v7225_v2, %v7224_v1  ;;  %v7227_v11 = vpop.f32.mrb[114].mxu0  ;;  %v7858_v24 = vpop.f32.mrb[113].mxu1 }
 0x268   : > { %v7228_v52 = vpop.f32.mrb[115].mxu0  ;;  %v1761_v25 = vpop.f32.mrb[114].mxu1 }
 0x269   : > { %v1606_v21 = vadd.f32 %v7226_v62, %v10523_v38  ;;  %v7229_v47 = vadd.f32 %v7228_v52, %v7227_v11  ;;  %v7859_v46 = vpop.f32.mrb[115].mxu1  ;;  %v10681_v11 = vld [vmem:[%s11449_s3] ss:$0 sm:$0xff] }
 0x26b   : > { %v10667_v29 = vadd.f32 %v1758_v16, %v1606_v21  ;;  %v1609_v50 = vadd.f32 %v7229_v47, %v10528_v45  ;;  %v2637_v47 = vpop.permute.xlu0 %2636 }
 0x26d   : > { %v10670_v44 = vadd.f32 %v1761_v25, %v1609_v50  ;;  %v7230_v61 = vpop.f32.mrb[116].mxu0 }
 0x26e   : > { %v7231_v34 = vpop.f32.mrb[117].mxu0  ;;  %v1766_v43 = vpop.f32.mrb[116].mxu1 }
 0x26f   : > { %v7232_v48 = vadd.f32 %v7231_v34, %v7230_v61  ;;  %v7233_v27 = vpop.f32.mrb[118].mxu0  ;;  %v7862_v40 = vpop.f32.mrb[117].mxu1 }
 0x270   : > { %v7234_v49 = vpop.f32.mrb[119].mxu0  ;;  %v1769_v36 = vpop.f32.mrb[118].mxu1 }
 0x271   : > { %v1614_v18 = vadd.f32 %v7232_v48, %v10538_v12  ;;  %v7235_v0 = vadd.f32 %v7234_v49, %v7233_v27  ;;  %v7863_v38 = vpop.f32.mrb[119].mxu1 }
 0x273   : > { %v10673_v32 = vadd.f32 %v1766_v43, %v1614_v18  ;;  %v1617_v4 = vadd.f32 %v7235_v0, %v10543_v6 }
 0x275   : > { %v10676_v7 = vadd.f32 %v1769_v36, %v1617_v4  ;;  %v7275_v45 = vpop.f32.mrb[120].mxu0 }
 0x276   : > { %v7276_v51 = vpop.f32.mrb[121].mxu0  ;;  %v2383_v13 = vpop.f32.mrb[120].mxu1 }
 0x277   : > { %v7277_v5 = vadd.f32 %v7276_v51, %v7275_v45  ;;  %v7278_v37 = vpop.f32.mrb[122].mxu0  ;;  %v7882_v31 = vpop.f32.mrb[121].mxu1 }
 0x278   : > { %v7279_v1 = vpop.f32.mrb[123].mxu0  ;;  %v2386_v2 = vpop.f32.mrb[122].mxu1 }
 0x279   : > { %v2384_v16 = vadd.f32 %v7277_v5, %v2383_v13  ;;  %v7280_v62 = vadd.f32 %v7279_v1, %v7278_v37  ;;  %v7883_v12 = vpop.f32.mrb[123].mxu1  ;;  %v2642_v13 = vpop.permute.xlu1 %2641 }
 0x27b   : > { %v2502_v6 = vadd.f32 %v2384_v16, %v10564_v15  ;;  %v2387_v24 = vadd.f32 %v7280_v62, %v2386_v2 }
 0x27d   : > { %v2503_v52 = vadd.f32 %v2387_v24, %v10575_v9  ;;  %v7281_v25 = vpop.f32.mrb[124].mxu0  ;;  %v2539_v21 = vadd.f32 %v10681_v11, %v2502_v6 }
 0x27e   : > { %v7282_v46 = vpop.f32.mrb[125].mxu0  ;;  %v2391_v50 = vpop.f32.mrb[124].mxu1 }
 0x27f   : > { %v2569_v61 = vmax.f32 %v2539_v21, 0.0  ;;  %v7283_v34 = vadd.f32 %v7282_v46, %v7281_v25  ;;  %v7284_v43 = vpop.f32.mrb[126].mxu0  ;;  %v7886_v48 = vpop.f32.mrb[125].mxu1  ;;  %v2540_v27 = vadd.f32 %v10681_v11, %v2503_v52 }
 0x280   : > { %v7285_v40 = vpop.f32.mrb[127].mxu0  ;;  %v2394_v49 = vpop.f32.mrb[126].mxu1 }
 0x281   : > { %v2779_v36 = vmul.f32 %v2632_v57, %v2569_v61  ;;  %v2392_v18 = vadd.f32 %v7283_v34, %v2391_v50  ;;  %v7286_v15 = vadd.f32 %v7285_v40, %v7284_v43  ;;  %v7887_v0 = vpop.f32.mrb[127].mxu1  ;;  %v2570_v38 = vmax.f32 %v2540_v27, 0.0  ;;  %v2647_v40 = vpop.permute.xlu1 %2646 }
 0x283   : > { %v6971_v9 = vpack.c.bf16 %v2779_v36, %v2779_v36  ;;  %v2504_v4 = vadd.f32 %v2392_v18, %v10581_v14  ;;  %v2395_v45 = vadd.f32 %v7286_v15, %v2394_v49  ;;  %v2780_v51 = vmul.f32 %v2637_v47, %v2570_v38 }
 0x285   : > { %v2908_v5 = vshrl.u32 %v6971_v9, 16  ;;  %v2505_v37 = vadd.f32 %v2395_v45, %v10592_v59  ;;  %v6972_v31 = vpack.c.bf16 %v2780_v51, %v2780_v51  ;;  %v7287_v1 = vpop.f32.mrb[128].mxu0  ;;  %v2541_v57 = vadd.f32 %v10681_v11, %v2504_v4  ;;  %v3210_v59 = vld [vmem:[#allocation3] sm:$0xf] }
 0x286   : > { %v7288_v2 = vpop.f32.mrb[129].mxu0  ;;  %v2399_v16 = vpop.f32.mrb[128].mxu1  ;;  %v2911_v12 = vshll.u32 %v6971_v9, 16 }
 0x287   : > { %v2910_v62 = vrot.slane %v2908_v5, 7  ;;  %v2916_v6 = vshrl.u32 %v6972_v31, 16  ;;  %v7289_v24 = vadd.f32 %v7288_v2, %v7287_v1  ;;  %v7290_v14 = vpop.f32.mrb[130].mxu0  ;;  %v7890_v52 = vpop.f32.mrb[129].mxu1  ;;  %v2571_v21 = vmax.f32 %v2541_v57, 0.0 }
 0x288   : > { %v7291_v47 = vpop.f32.mrb[131].mxu0  ;;  %v2402_v46 = vpop.f32.mrb[130].mxu1  ;;  %v2542_v50 = vadd.f32 %v10681_v11, %v2505_v37  ;;  %v2919_v43 = vshll.u32 %v6972_v31, 16 }
 0x289   : > { %v2913_v61 = vor.u32 %v2911_v12, %v2910_v62  ;;  %v2918_v34 = vrot.slane %v2916_v6, 7  ;;  %v2400_v48 = vadd.f32 %v7289_v24, %v2399_v16  ;;  %v7891_v27 = vpop.f32.mrb[131].mxu1  ;;  %v2781_v36 = vmul.f32 %v2642_v13, %v2571_v21  ;;  %v2652_v37 = vpop.permute.xlu0 %2651 }
 0x28a   : > { %v7292_v18 = vadd.f32 %v7291_v47, %v7290_v14  ;;  %v2572_v15 = vmax.f32 %v2542_v50, 0.0  ;;  %v2914_v0 = vrot.slane %v2910_v62, 4  ;;  %v2657_v57 = vpop.permute.xlu1 %2656 }
 0x28b   : > { %v3211_v38 = vsel %vm10692_vm7, %v2913_v61, %v3210_v59  ;;  %v2921_v9 = vor.u32 %v2919_v43, %v2918_v34  ;;  %v2506_v4 = vadd.f32 %v2400_v48, %v10598_v17  ;;  %v6973_v45 = vpack.c.bf16 %v2781_v36, %v2781_v36 }
 0x28c   : > { %3212 = vst [vmem:[#allocation3] sm:$0xf] %v3211_v38  ;;  %v2403_v51 = vadd.f32 %v7292_v18, %v2402_v46  ;;  %v2782_v5 = vmul.f32 %v2647_v40, %v2572_v15  ;;  %v2923_v43 = vrot.slane %v2918_v34, 4 }
 0x28d   : > { %v2922_v31 = vsel %vm10699_vm8, %v2914_v0, %v2921_v9  ;;  %v7293_v1 = vpop.f32.mrb[132].mxu0  ;;  %v2543_v13 = vadd.f32 %v10681_v11, %v2506_v4  ;;  %v2925_v2 = vshrl.u32 %v6973_v45, 16  ;;  %v2928_v21 = vshll.u32 %v6973_v45, 16 }
 0x28e   : > { %3213 = vst [vmem:[#allocation3 + $0x4] sm:$0xf] %v2922_v31  ;;  %v2507_v16 = vadd.f32 %v2403_v51, %v10604_v30  ;;  %v6974_v62 = vpack.c.bf16 %v2782_v5, %v2782_v5  ;;  %v7294_v12 = vpop.f32.mrb[133].mxu0  ;;  %v2407_v6 = vpop.f32.mrb[132].mxu1 }
 0x28f   : > { %v7295_v17 = vadd.f32 %v7294_v12, %v7293_v1  ;;  %v7296_v24 = vpop.f32.mrb[134].mxu0  ;;  %v7894_v14 = vpop.f32.mrb[133].mxu1  ;;  %v2573_v52 = vmax.f32 %v2543_v13, 0.0  ;;  %v2927_v59 = vrot.slane %v2925_v2, 7 }
 0x290   : > { %v2934_v47 = vshrl.u32 %v6974_v62, 16  ;;  %v7297_v46 = vpop.f32.mrb[135].mxu0  ;;  %v2410_v50 = vpop.f32.mrb[134].mxu1  ;;  %v2544_v61 = vadd.f32 %v10681_v11, %v2507_v16  ;;  %v2937_v15 = vshll.u32 %v6974_v62, 16 }
 0x291   : > { %v2408_v48 = vadd.f32 %v7295_v17, %v2407_v6  ;;  %v2783_v27 = vmul.f32 %v2652_v37, %v2573_v52  ;;  %v7298_v40 = vadd.f32 %v7297_v46, %v7296_v24  ;;  %v7895_v36 = vpop.f32.mrb[135].mxu1  ;;  %v2930_v30 = vor.u32 %v2928_v21, %v2927_v59  ;;  %v2667_v1 = vpop.permute.xlu1 %2666 }
 0x292   : > { %v2936_v18 = vrot.slane %v2934_v47, 7  ;;  %v2574_v0 = vmax.f32 %v2544_v61, 0.0  ;;  %v2932_v51 = vrot.slane %v2927_v59, 4  ;;  %v2662_v2 = vpop.permute.xlu0 %2661 }
 0x293   : > { %v2508_v38 = vadd.f32 %v2408_v48, %v10607_v23  ;;  %v6975_v9 = vpack.c.bf16 %v2783_v27, %v2783_v27  ;;  %v2411_v4 = vadd.f32 %v7298_v40, %v2410_v50  ;;  %v2931_v45 = vsel %vm10699_vm8, %v2923_v43, %v2930_v30 }
 0x294   : > { %v2939_v5 = vor.u32 %v2937_v15, %v2936_v18  ;;  %v2784_v31 = vmul.f32 %v2657_v57, %v2574_v0  ;;  %3214 = vst [vmem:[#allocation3 + $0x8] sm:$0xf] %v2931_v45  ;;  %v2941_v50 = vrot.slane %v2936_v18, 4 }
 0x295   : > { %v2943_v34 = vshrl.u32 %v6975_v9, 16  ;;  %v2509_v37 = vadd.f32 %v2411_v4, %v10610_v28  ;;  %v7299_v13 = vpop.f32.mrb[136].mxu0  ;;  %v2545_v16 = vadd.f32 %v10681_v11, %v2508_v38  ;;  %v2946_v62 = vshll.u32 %v6975_v9, 16  ;;  %v10722_v18 = vpop.permute.xlu1 %2776 }
 0x296   : > { %v2940_v23 = vsel %vm10699_vm8, %v2932_v51, %v2939_v5  ;;  %v6976_v12 = vpack.c.bf16 %v2784_v31, %v2784_v31  ;;  %v7300_v6 = vpop.f32.mrb[137].mxu0  ;;  %v2415_v17 = vpop.f32.mrb[136].mxu1 }
 0x297   : > { %3215 = vst [vmem:[#allocation3 + $0xc] sm:$0xf] %v2940_v23  ;;  %v2945_v24 = vrot.slane %v2943_v34, 7  ;;  %v7301_v14 = vadd.f32 %v7300_v6, %v7299_v13  ;;  %v7302_v57 = vpop.f32.mrb[138].mxu0  ;;  %v7898_v52 = vpop.f32.mrb[137].mxu1  ;;  %v2546_v59 = vadd.f32 %v10681_v11, %v2509_v37  ;;  %v2575_v21 = vmax.f32 %v2545_v16, 0.0 }
 0x298   : > { %v2952_v28 = vshrl.u32 %v6976_v12, 16  ;;  %v7303_v47 = vpop.f32.mrb[139].mxu0  ;;  %v2418_v46 = vpop.f32.mrb[138].mxu1  ;;  %v2955_v36 = vshll.u32 %v6976_v12, 16 }
 0x299   : > { %v2948_v61 = vor.u32 %v2946_v62, %v2945_v24  ;;  %v2416_v43 = vadd.f32 %v7301_v14, %v2415_v17  ;;  %v2576_v48 = vmax.f32 %v2546_v59, 0.0  ;;  %v7899_v27 = vpop.f32.mrb[139].mxu1  ;;  %v2785_v30 = vmul.f32 %v2662_v2, %v2575_v21  ;;  %v2672_v34 = vpop.permute.xlu0 %2671 }
 0x29a   : > { %v2954_v40 = vrot.slane %v2952_v28, 7  ;;  %v7304_v15 = vadd.f32 %v7303_v47, %v7302_v57  ;;  %v2950_v4 = vrot.slane %v2945_v24, 4 }
 0x29b   : > { %v2949_v0 = vsel %vm10699_vm8, %v2941_v50, %v2948_v61  ;;  %v2510_v38 = vadd.f32 %v2416_v43, %v10613_v41  ;;  %v2786_v9 = vmul.f32 %v2667_v1, %v2576_v48  ;;  %v6977_v51 = vpack.c.bf16 %v2785_v30, %v2785_v30 }
 0x29c   : > { %3216 = vst [vmem:[#allocation3 + $0x10] sm:$0xf] %v2949_v0  ;;  %v2957_v45 = vor.u32 %v2955_v36, %v2954_v40  ;;  %v2419_v5 = vadd.f32 %v7304_v15, %v2418_v46  ;;  %v2959_v43 = vrot.slane %v2954_v40, 4 }
 0x29d   : > { %v6978_v31 = vpack.c.bf16 %v2786_v9, %v2786_v9  ;;  %v2547_v37 = vadd.f32 %v10681_v11, %v2510_v38  ;;  %v7305_v13 = vpop.f32.mrb[140].mxu0  ;;  %v2961_v16 = vshrl.u32 %v6977_v51, 16  ;;  %v2964_v52 = vshll.u32 %v6977_v51, 16  ;;  %v2677_v38 = vpop.permute.xlu0 %2676 }
 0x29e   : > { %v2958_v2 = vsel %vm10699_vm8, %v2950_v4, %v2957_v45  ;;  %v2511_v23 = vadd.f32 %v2419_v5, %v10616_v63  ;;  %v7306_v41 = vpop.f32.mrb[141].mxu0  ;;  %v2423_v1 = vpop.f32.mrb[140].mxu1 }
 0x29f   : > { %3217 = vst [vmem:[#allocation3 + $0x14] sm:$0xf] %v2958_v2  ;;  %v2970_v62 = vshrl.u32 %v6978_v31, 16  ;;  %v2577_v12 = vmax.f32 %v2547_v37, 0.0  ;;  %v7307_v6 = vadd.f32 %v7306_v41, %v7305_v13  ;;  %v7308_v17 = vpop.f32.mrb[142].mxu0  ;;  %v7902_v24 = vpop.f32.mrb[141].mxu1 }
 0x2a0   : > { %v2973_v14 = vshll.u32 %v6978_v31, 16  ;;  %v2963_v57 = vrot.slane %v2961_v16, 7  ;;  %v2548_v59 = vadd.f32 %v10681_v11, %v2511_v23  ;;  %v7309_v21 = vpop.f32.mrb[143].mxu0  ;;  %v2426_v28 = vpop.f32.mrb[142].mxu1 }
 0x2a1   : > { %v2972_v47 = vrot.slane %v2970_v62, 7  ;;  %v2787_v46 = vmul.f32 %v2672_v34, %v2577_v12  ;;  %v2424_v50 = vadd.f32 %v7307_v6, %v2423_v1  ;;  %v7310_v61 = vadd.f32 %v7309_v21, %v7308_v17  ;;  %v7903_v63 = vpop.f32.mrb[143].mxu1  ;;  %v2682_v31 = vpop.permute.xlu1 %2681 }
 0x2a2   : > { %v2966_v48 = vor.u32 %v2964_v52, %v2963_v57  ;;  %v2578_v27 = vmax.f32 %v2548_v59, 0.0  ;;  %v2968_v30 = vrot.slane %v2963_v57, 4 }
 0x2a3   : > { %v2975_v36 = vor.u32 %v2973_v14, %v2972_v47  ;;  %v6979_v15 = vpack.c.bf16 %v2787_v46, %v2787_v46  ;;  %v2512_v0 = vadd.f32 %v2424_v50, %v10619_v3  ;;  %v2427_v45 = vadd.f32 %v7310_v61, %v2426_v28 }
 0x2a4   : > { %v2967_v9 = vsel %vm10699_vm8, %v2959_v43, %v2966_v48  ;;  %v2788_v4 = vmul.f32 %v2677_v38, %v2578_v27  ;;  %v2977_v57 = vrot.slane %v2972_v47, 4  ;;  %v2687_v48 = vpop.permute.xlu0 %2686 }
 0x2a5   : > { %v2976_v51 = vsel %vm10699_vm8, %v2968_v30, %v2975_v36  ;;  %3218 = vst [vmem:[#allocation3 + $0x18] sm:$0xf] %v2967_v9  ;;  %v2979_v5 = vshrl.u32 %v6979_v15, 16  ;;  %v2549_v40 = vadd.f32 %v10681_v11, %v2512_v0  ;;  %v7311_v34 = vpop.f32.mrb[144].mxu0  ;;  %v2513_v13 = vadd.f32 %v2427_v45, %v10622_v33  ;;  %v2692_v38 = vpop.permute.xlu1 %2691 }
 0x2a6   : > { %3219 = vst [vmem:[#allocation3 + $0x1c] sm:$0xf] %v2976_v51  ;;  %v6980_v37 = vpack.c.bf16 %v2788_v4, %v2788_v4  ;;  %v7312_v3 = vpop.f32.mrb[145].mxu0  ;;  %v2431_v2 = vpop.f32.mrb[144].mxu1  ;;  %v2982_v23 = vshll.u32 %v6979_v15, 16 }
 0x2a7   : > { %v2981_v16 = vrot.slane %v2979_v5, 7  ;;  %v2579_v41 = vmax.f32 %v2549_v40, 0.0  ;;  %v7313_v1 = vadd.f32 %v7312_v3, %v7311_v34  ;;  %v7314_v62 = vpop.f32.mrb[146].mxu0  ;;  %v7906_v12 = vpop.f32.mrb[145].mxu1  ;;  %v2550_v17 = vadd.f32 %v10681_v11, %v2513_v13 }
 0x2a8   : > { %v2988_v6 = vshrl.u32 %v6980_v37, 16  ;;  %v7315_v24 = vpop.f32.mrb[147].mxu0  ;;  %v2434_v14 = vpop.f32.mrb[146].mxu1  ;;  %v2991_v33 = vshll.u32 %v6980_v37, 16 }
 0x2a9   : > { %v2984_v52 = vor.u32 %v2982_v23, %v2981_v16  ;;  %v2789_v59 = vmul.f32 %v2682_v31, %v2579_v41  ;;  %v2432_v21 = vadd.f32 %v7313_v1, %v2431_v2  ;;  %v7907_v28 = vpop.f32.mrb[147].mxu1  ;;  %v2580_v50 = vmax.f32 %v2550_v17, 0.0 }
 0x2aa   : > { %v2990_v46 = vrot.slane %v2988_v6, 7  ;;  %v7316_v61 = vadd.f32 %v7315_v24, %v7314_v62  ;;  %v2986_v36 = vrot.slane %v2981_v16, 4  ;;  %v2697_v28 = vpop.permute.xlu0 %2696 }
 0x2ab   : > { %v2985_v63 = vsel %vm10699_vm8, %v2977_v57, %v2984_v52  ;;  %v6981_v43 = vpack.c.bf16 %v2789_v59, %v2789_v59  ;;  %v2514_v27 = vadd.f32 %v2432_v21, %v10625_v39  ;;  %v2790_v15 = vmul.f32 %v2687_v48, %v2580_v50  ;;  %v2702_v48 = vpop.permute.xlu1 %2701 }
 0x2ac   : > { %3220 = vst [vmem:[#allocation3 + $0x20] sm:$0xf] %v2985_v63  ;;  %v2993_v30 = vor.u32 %v2991_v33, %v2990_v46  ;;  %v2435_v47 = vadd.f32 %v7316_v61, %v2434_v14  ;;  %v2995_v12 = vrot.slane %v2990_v46, 4 }
 0x2ad   : > { %v2997_v0 = vshrl.u32 %v6981_v43, 16  ;;  %v2551_v9 = vadd.f32 %v10681_v11, %v2514_v27  ;;  %v7317_v4 = vpop.f32.mrb[148].mxu0  ;;  %v6982_v51 = vpack.c.bf16 %v2790_v15, %v2790_v15  ;;  %v3000_v39 = vshll.u32 %v6981_v43, 16 }
 0x2ae   : > { %v2994_v45 = vsel %vm10699_vm8, %v2986_v36, %v2993_v30  ;;  %v2515_v5 = vadd.f32 %v2435_v47, %v10628_v42  ;;  %v7318_v31 = vpop.f32.mrb[149].mxu0  ;;  %v2439_v40 = vpop.f32.mrb[148].mxu1 }
 0x2af   : > { %v2999_v34 = vrot.slane %v2997_v0, 7  ;;  %3221 = vst [vmem:[#allocation3 + $0x24] sm:$0xf] %v2994_v45  ;;  %v2581_v37 = vmax.f32 %v2551_v9, 0.0  ;;  %v7319_v13 = vadd.f32 %v7318_v31, %v7317_v4  ;;  %v7320_v3 = vpop.f32.mrb[150].mxu0  ;;  %v7910_v2 = vpop.f32.mrb[149].mxu1 }
 0x2b0   : > { %v3006_v16 = vshrl.u32 %v6982_v51, 16  ;;  %v2552_v23 = vadd.f32 %v10681_v11, %v2515_v5  ;;  %v7321_v41 = vpop.f32.mrb[151].mxu0  ;;  %v2442_v1 = vpop.f32.mrb[150].mxu1  ;;  %v3009_v14 = vshll.u32 %v6982_v51, 16 }
 0x2b1   : > { %v3002_v62 = vor.u32 %v3000_v39, %v2999_v34  ;;  %v2791_v6 = vmul.f32 %v2692_v38, %v2581_v37  ;;  %v2440_v17 = vadd.f32 %v7319_v13, %v2439_v40  ;;  %v7911_v24 = vpop.f32.mrb[151].mxu1  ;;  %v7322_v52 = vadd.f32 %v7321_v41, %v7320_v3 }
 0x2b2   : > { %v3008_v42 = vrot.slane %v3006_v16, 7  ;;  %v2582_v57 = vmax.f32 %v2552_v23, 0.0  ;;  %v3004_v50 = vrot.slane %v2999_v34, 4 }
 0x2b3   : > { %v3003_v59 = vsel %vm10699_vm8, %v2995_v12, %v3002_v62  ;;  %v6983_v21 = vpack.c.bf16 %v2791_v6, %v2791_v6  ;;  %v2516_v33 = vadd.f32 %v2440_v17, %v10631_v26  ;;  %v2443_v43 = vadd.f32 %v7322_v52, %v2442_v1  ;;  %v2707_v12 = vpop.permute.xlu0 %2706  ;;  %v2712_v52 = vpop.permute.xlu1 %2711 }
 0x2b4   : > { %3222 = vst [vmem:[#allocation3 + $0x28] sm:$0xf] %v3003_v59  ;;  %v3011_v61 = vor.u32 %v3009_v14, %v3008_v42  ;;  %v2792_v63 = vmul.f32 %v2697_v28, %v2582_v57  ;;  %v3013_v37 = vrot.slane %v3008_v42, 4 }
 0x2b5   : > { %v3015_v46 = vshrl.u32 %v6983_v21, 16  ;;  %v2553_v27 = vadd.f32 %v10681_v11, %v2516_v33  ;;  %v7323_v36 = vpop.f32.mrb[152].mxu0  ;;  %v2517_v47 = vadd.f32 %v2443_v43, %v10634_v60  ;;  %v3018_v9 = vshll.u32 %v6983_v21, 16 }
 0x2b6   : > { %v3012_v30 = vsel %vm10699_vm8, %v3004_v50, %v3011_v61  ;;  %v6984_v15 = vpack.c.bf16 %v2792_v63, %v2792_v63  ;;  %v7324_v0 = vpop.f32.mrb[153].mxu0  ;;  %v2447_v38 = vpop.f32.mrb[152].mxu1 }
 0x2b7   : > { %3223 = vst [vmem:[#allocation3 + $0x2c] sm:$0xf] %v3012_v30  ;;  %v3017_v26 = vrot.slane %v3015_v46, 7  ;;  %v2583_v4 = vmax.f32 %v2553_v27, 0.0  ;;  %v7325_v45 = vadd.f32 %v7324_v0, %v7323_v36  ;;  %v7326_v51 = vpop.f32.mrb[154].mxu0  ;;  %v7914_v5 = vpop.f32.mrb[153].mxu1  ;;  %v2554_v40 = vadd.f32 %v10681_v11, %v2517_v47 }
 0x2b8   : > { %v3024_v31 = vshrl.u32 %v6984_v15, 16  ;;  %v7327_v34 = vpop.f32.mrb[155].mxu0  ;;  %v2450_v39 = vpop.f32.mrb[154].mxu1  ;;  %v3027_v23 = vshll.u32 %v6984_v15, 16 }
 0x2b9   : > { %v3020_v13 = vor.u32 %v3018_v9, %v3017_v26  ;;  %v2793_v3 = vmul.f32 %v2702_v48, %v2583_v4  ;;  %v2448_v2 = vadd.f32 %v7325_v45, %v2447_v38  ;;  %v7915_v16 = vpop.f32.mrb[155].mxu1  ;;  %v2584_v41 = vmax.f32 %v2554_v40, 0.0 }
 0x2ba   : > { %v3026_v60 = vrot.slane %v3024_v31, 7  ;;  %v7328_v1 = vadd.f32 %v7327_v34, %v7326_v51  ;;  %v3022_v24 = vrot.slane %v3017_v26, 4 }
 0x2bb   : > { %v3021_v62 = vsel %vm10699_vm8, %v3013_v37, %v3020_v13  ;;  %v6985_v6 = vpack.c.bf16 %v2793_v3, %v2793_v3  ;;  %v2518_v17 = vadd.f32 %v2448_v2, %v10637_v22  ;;  %v2794_v57 = vmul.f32 %v2707_v12, %v2584_v41 }
 0x2bc   : > { %3224 = vst [vmem:[#allocation3 + $0x30] sm:$0xf] %v3021_v62  ;;  %v3029_v14 = vor.u32 %v3027_v23, %v3026_v60  ;;  %v2451_v42 = vadd.f32 %v7328_v1, %v2450_v39  ;;  %v3031_v26 = vrot.slane %v3026_v60, 4  ;;  %v2717_v39 = vpop.permute.xlu0 %2716  ;;  %v2722_v23 = vpop.permute.xlu1 %2721 }
 0x2bd   : > { %v3033_v59 = vshrl.u32 %v6985_v6, 16  ;;  %v2555_v21 = vadd.f32 %v10681_v11, %v2518_v17  ;;  %v7329_v28 = vpop.f32.mrb[156].mxu0  ;;  %v6986_v50 = vpack.c.bf16 %v2794_v57, %v2794_v57  ;;  %v3036_v46 = vshll.u32 %v6985_v6, 16 }
 0x2be   : > { %v3030_v33 = vsel %vm10699_vm8, %v3022_v24, %v3029_v14  ;;  %v2519_v61 = vadd.f32 %v2451_v42, %v10640_v56  ;;  %v7330_v63 = vpop.f32.mrb[157].mxu0  ;;  %v2455_v43 = vpop.f32.mrb[156].mxu1 }
 0x2bf   : > { %3225 = vst [vmem:[#allocation3 + $0x34] sm:$0xf] %v3030_v33  ;;  %v3035_v22 = vrot.slane %v3033_v59, 7  ;;  %v2585_v48 = vmax.f32 %v2555_v21, 0.0  ;;  %v7331_v27 = vadd.f32 %v7330_v63, %v7329_v28  ;;  %v7332_v36 = vpop.f32.mrb[158].mxu0  ;;  %v7918_v30 = vpop.f32.mrb[157].mxu1 }
 0x2c0   : > { %v3042_v15 = vshrl.u32 %v6986_v50, 16  ;;  %v2556_v47 = vadd.f32 %v10681_v11, %v2519_v61  ;;  %v7333_v0 = vpop.f32.mrb[159].mxu0  ;;  %v2458_v38 = vpop.f32.mrb[158].mxu1  ;;  %v3045_v5 = vshll.u32 %v6986_v50, 16 }
 0x2c1   : > { %v3038_v9 = vor.u32 %v3036_v46, %v3035_v22  ;;  %v2795_v4 = vmul.f32 %v2712_v52, %v2585_v48  ;;  %v2456_v45 = vadd.f32 %v7331_v27, %v2455_v43  ;;  %v7919_v51 = vpop.f32.mrb[159].mxu1  ;;  %v7334_v40 = vadd.f32 %v7333_v0, %v7332_v36 }
 0x2c2   : > { %v3044_v56 = vrot.slane %v3042_v15, 7  ;;  %v2586_v31 = vmax.f32 %v2556_v47, 0.0  ;;  %v3040_v3 = vrot.slane %v3035_v22, 4  ;;  %v2727_v15 = vpop.permute.xlu0 %2726  ;;  %v2732_v51 = vpop.permute.xlu1 %2731 }
 0x2c3   : > { %v3039_v34 = vsel %vm10699_vm8, %v3031_v26, %v3038_v9  ;;  %v6987_v37 = vpack.c.bf16 %v2795_v4, %v2795_v4  ;;  %v2520_v13 = vadd.f32 %v2456_v45, %v10643_v20  ;;  %v2459_v60 = vadd.f32 %v7334_v40, %v2458_v38 }
 0x2c4   : > { %3226 = vst [vmem:[#allocation3 + $0x38] sm:$0xf] %v3039_v34  ;;  %v3047_v2 = vor.u32 %v3045_v5, %v3044_v56  ;;  %v2796_v16 = vmul.f32 %v2717_v39, %v2586_v31  ;;  %v3049_v63 = vrot.slane %v3044_v56, 4 }
 0x2c5   : > { %v3051_v41 = vshrl.u32 %v6987_v37, 16  ;;  %v2557_v1 = vadd.f32 %v10681_v11, %v2520_v13  ;;  %v7335_v62 = vpop.f32.mrb[160].mxu0  ;;  %v2521_v17 = vadd.f32 %v2459_v60, %v10646_v19  ;;  %v3054_v57 = vshll.u32 %v6987_v37, 16 }
 0x2c6   : > { %v3048_v12 = vsel %vm10699_vm8, %v3040_v3, %v3047_v2  ;;  %v6988_v6 = vpack.c.bf16 %v2796_v16, %v2796_v16  ;;  %v7336_v24 = vpop.f32.mrb[161].mxu0  ;;  %v2463_v14 = vpop.f32.mrb[160].mxu1 }
 0x2c7   : > { %3227 = vst [vmem:[#allocation3 + $0x3c] sm:$0xf] %v3048_v12  ;;  %v3053_v20 = vrot.slane %v3051_v41, 7  ;;  %v2587_v42 = vmax.f32 %v2557_v1, 0.0  ;;  %v7337_v52 = vadd.f32 %v7336_v24, %v7335_v62  ;;  %v7338_v59 = vpop.f32.mrb[162].mxu0  ;;  %v7922_v21 = vpop.f32.mrb[161].mxu1  ;;  %v2558_v33 = vadd.f32 %v10681_v11, %v2521_v17 }
 0x2c8   : > { %v3060_v28 = vshrl.u32 %v6988_v6, 16  ;;  %v7339_v50 = vpop.f32.mrb[163].mxu0  ;;  %v2466_v61 = vpop.f32.mrb[162].mxu1  ;;  %v3063_v27 = vshll.u32 %v6988_v6, 16 }
 0x2c9   : > { %v3056_v43 = vor.u32 %v3054_v57, %v3053_v20  ;;  %v2797_v22 = vmul.f32 %v2722_v23, %v2587_v42  ;;  %v2464_v46 = vadd.f32 %v7337_v52, %v2463_v14  ;;  %v7923_v48 = vpop.f32.mrb[163].mxu1  ;;  %v2588_v36 = vmax.f32 %v2558_v33, 0.0 }
 0x2ca   : > { %v3062_v19 = vrot.slane %v3060_v28, 7  ;;  %v7340_v30 = vadd.f32 %v7339_v50, %v7338_v59  ;;  %v3058_v26 = vrot.slane %v3053_v20, 4  ;;  %v2737_v59 = vpop.permute.xlu0 %2736 }
 0x2cb   : > { %v3057_v47 = vsel %vm10699_vm8, %v3049_v63, %v3056_v43  ;;  %v6989_v0 = vpack.c.bf16 %v2797_v22, %v2797_v22  ;;  %v2522_v38 = vadd.f32 %v2464_v46, %v10649_v54  ;;  %v2798_v4 = vmul.f32 %v2727_v15, %v2588_v36  ;;  %v2742_v22 = vpop.permute.xlu1 %2741 }
 0x2cc   : > { %3228 = vst [vmem:[#allocation3 + $0x40] sm:$0xf] %v3057_v47  ;;  %v3065_v9 = vor.u32 %v3063_v27, %v3062_v19  ;;  %v2467_v45 = vadd.f32 %v7340_v30, %v2466_v61  ;;  %v3067_v6 = vrot.slane %v3062_v19, 4 }
 0x2cd   : > { %v3069_v56 = vshrl.u32 %v6989_v0, 16  ;;  %v2559_v5 = vadd.f32 %v10681_v11, %v2522_v38  ;;  %v7341_v31 = vpop.f32.mrb[164].mxu0  ;;  %v6990_v34 = vpack.c.bf16 %v2798_v4, %v2798_v4  ;;  %v3072_v3 = vshll.u32 %v6989_v0, 16 }
 0x2ce   : > { %v3066_v40 = vsel %vm10699_vm8, %v3058_v26, %v3065_v9  ;;  %v2523_v39 = vadd.f32 %v2467_v45, %v10652_v55  ;;  %v7342_v37 = vpop.f32.mrb[165].mxu0  ;;  %v2471_v13 = vpop.f32.mrb[164].mxu1 }
 0x2cf   : > { %3229 = vst [vmem:[#allocation3 + $0x44] sm:$0xf] %v3066_v40  ;;  %v3071_v54 = vrot.slane %v3069_v56, 7  ;;  %v2589_v2 = vmax.f32 %v2559_v5, 0.0  ;;  %v7343_v16 = vadd.f32 %v7342_v37, %v7341_v31  ;;  %v7344_v60 = vpop.f32.mrb[166].mxu0  ;;  %v7926_v23 = vpop.f32.mrb[165].mxu1 }
 0x2d0   : > { %v3078_v41 = vshrl.u32 %v6990_v34, 16  ;;  %v2560_v1 = vadd.f32 %v10681_v11, %v2523_v39  ;;  %v7345_v62 = vpop.f32.mrb[167].mxu0  ;;  %v2474_v12 = vpop.f32.mrb[166].mxu1  ;;  %v3081_v57 = vshll.u32 %v6990_v34, 16 }
 0x2d1   : > { %v3074_v17 = vor.u32 %v3072_v3, %v3071_v54  ;;  %v2799_v24 = vmul.f32 %v2732_v51, %v2589_v2  ;;  %v2472_v14 = vadd.f32 %v7343_v16, %v2471_v13  ;;  %v7927_v20 = vpop.f32.mrb[167].mxu1  ;;  %v7346_v52 = vadd.f32 %v7345_v62, %v7344_v60  ;;  %v2747_v2 = vpop.permute.xlu0 %2746 }
 0x2d2   : > { %v3080_v55 = vrot.slane %v3078_v41, 7  ;;  %v2590_v42 = vmax.f32 %v2560_v1, 0.0  ;;  %v3076_v50 = vrot.slane %v3071_v54, 4 }
 0x2d3   : > { %v3075_v21 = vsel %vm10699_vm8, %v3067_v6, %v3074_v17  ;;  %v6991_v28 = vpack.c.bf16 %v2799_v24, %v2799_v24  ;;  %v2524_v33 = vadd.f32 %v2472_v14, %v10655_v53  ;;  %v2475_v43 = vadd.f32 %v7346_v52, %v2474_v12  ;;  %v2752_v6 = vpop.permute.xlu1 %2751 }
 0x2d4   : > { %3230 = vst [vmem:[#allocation3 + $0x48] sm:$0xf] %v3075_v21  ;;  %v3083_v61 = vor.u32 %v3081_v57, %v3080_v55  ;;  %v2800_v63 = vmul.f32 %v2737_v59, %v2590_v42  ;;  %v3085_v31 = vrot.slane %v3080_v55, 4 }
 0x2d5   : > { %v3087_v46 = vshrl.u32 %v6991_v28, 16  ;;  %v2561_v48 = vadd.f32 %v10681_v11, %v2524_v33  ;;  %v7347_v19 = vpop.f32.mrb[168].mxu0  ;;  %v2525_v30 = vadd.f32 %v2475_v43, %v10658_v10  ;;  %v3090_v0 = vshll.u32 %v6991_v28, 16 }
 0x2d6   : > { %v3084_v27 = vsel %vm10699_vm8, %v3076_v50, %v3083_v61  ;;  %v6992_v36 = vpack.c.bf16 %v2800_v63, %v2800_v63  ;;  %v7348_v15 = vpop.f32.mrb[169].mxu0  ;;  %v2479_v47 = vpop.f32.mrb[168].mxu1 }
 0x2d7   : > { %3231 = vst [vmem:[#allocation3 + $0x4c] sm:$0xf] %v3084_v27  ;;  %v3089_v53 = vrot.slane %v3087_v46, 7  ;;  %v2591_v38 = vmax.f32 %v2561_v48, 0.0  ;;  %v7349_v26 = vadd.f32 %v7348_v15, %v7347_v19  ;;  %v7350_v9 = vpop.f32.mrb[170].mxu0  ;;  %v7930_v4 = vpop.f32.mrb[169].mxu1  ;;  %v2562_v51 = vadd.f32 %v10681_v11, %v2525_v30 }
 0x2d8   : > { %v3096_v45 = vshrl.u32 %v6992_v36, 16  ;;  %v7351_v56 = vpop.f32.mrb[171].mxu0  ;;  %v2482_v5 = vpop.f32.mrb[170].mxu1  ;;  %v3099_v13 = vshll.u32 %v6992_v36, 16 }
 0x2d9   : > { %v3092_v40 = vor.u32 %v3090_v0, %v3089_v53  ;;  %v2801_v34 = vmul.f32 %v2742_v22, %v2591_v38  ;;  %v2480_v39 = vadd.f32 %v7349_v26, %v2479_v47  ;;  %v7931_v37 = vpop.f32.mrb[171].mxu1  ;;  %v2592_v54 = vmax.f32 %v2562_v51, 0.0 }
 0x2da   : > { %v3098_v10 = vrot.slane %v3096_v45, 7  ;;  %v7352_v3 = vadd.f32 %v7351_v56, %v7350_v9  ;;  %v3094_v41 = vrot.slane %v3089_v53, 4  ;;  %v2757_v53 = vpop.permute.xlu0 %2756  ;;  %v2762_v56 = vpop.permute.xlu1 %2761 }
 0x2db   : > { %v3093_v16 = vsel %vm10699_vm8, %v3085_v31, %v3092_v40  ;;  %v6993_v60 = vpack.c.bf16 %v2801_v34, %v2801_v34  ;;  %v2526_v23 = vadd.f32 %v2480_v39, %v10661_v8  ;;  %v2802_v62 = vmul.f32 %v2747_v2, %v2592_v54 }
 0x2dc   : > { %3232 = vst [vmem:[#allocation3 + $0x50] sm:$0xf] %v3093_v16  ;;  %v3101_v1 = vor.u32 %v3099_v13, %v3098_v10  ;;  %v2483_v12 = vadd.f32 %v7352_v3, %v2482_v5  ;;  %v3103_v46 = vrot.slane %v3098_v10, 4 }
 0x2dd   : > { %v3105_v17 = vshrl.u32 %v6993_v60, 16  ;;  %v2563_v24 = vadd.f32 %v10681_v11, %v2526_v23  ;;  %v7353_v14 = vpop.f32.mrb[172].mxu0  ;;  %v6994_v55 = vpack.c.bf16 %v2802_v62, %v2802_v62  ;;  %v3108_v59 = vshll.u32 %v6993_v60, 16 }
 0x2de   : > { %v3102_v20 = vsel %vm10699_vm8, %v3094_v41, %v3101_v1  ;;  %v2527_v57 = vadd.f32 %v2483_v12, %v10664_v35  ;;  %v7354_v42 = vpop.f32.mrb[173].mxu0  ;;  %v2487_v52 = vpop.f32.mrb[172].mxu1 }
 0x2df   : > { %3233 = vst [vmem:[#allocation3 + $0x54] sm:$0xf] %v3102_v20  ;;  %v3107_v8 = vrot.slane %v3105_v17, 7  ;;  %v2593_v21 = vmax.f32 %v2563_v24, 0.0  ;;  %v7355_v28 = vadd.f32 %v7354_v42, %v7353_v14  ;;  %v7356_v33 = vpop.f32.mrb[174].mxu0  ;;  %v7934_v50 = vpop.f32.mrb[173].mxu1 }
 0x2e0   : > { %v3114_v61 = vshrl.u32 %v6994_v55, 16  ;;  %v2564_v63 = vadd.f32 %v10681_v11, %v2527_v57  ;;  %v7357_v43 = vpop.f32.mrb[175].mxu0  ;;  %v2490_v22 = vpop.f32.mrb[174].mxu1  ;;  %v3117_v30 = vshll.u32 %v6994_v55, 16 }
 0x2e1   : > { %v3110_v48 = vor.u32 %v3108_v59, %v3107_v8  ;;  %v2803_v19 = vmul.f32 %v2752_v6, %v2593_v21  ;;  %v2488_v27 = vadd.f32 %v7355_v28, %v2487_v52  ;;  %v7935_v36 = vpop.f32.mrb[175].mxu1  ;;  %v7358_v47 = vadd.f32 %v7357_v43, %v7356_v33  ;;  %v2767_v42 = vpop.permute.xlu0 %2766 }
 0x2e2   : > { %v3116_v35 = vrot.slane %v3114_v61, 7  ;;  %v2594_v15 = vmax.f32 %v2564_v63, 0.0  ;;  %v3112_v9 = vrot.slane %v3107_v8, 4  ;;  %v8409_v61 = vld [vmem:[%s11449_s3] ss:$0 sm:$0xff] }
 0x2e3   : > { %v3111_v0 = vsel %vm10699_vm8, %v3103_v46, %v3110_v48  ;;  %v6995_v38 = vpack.c.bf16 %v2803_v19, %v2803_v19  ;;  %v2528_v26 = vadd.f32 %v2488_v27, %v10667_v29  ;;  %v2491_v51 = vadd.f32 %v7358_v47, %v2490_v22  ;;  %v2772_v27 = vpop.permute.xlu1 %2771 }
 0x2e4   : > { %3234 = vst [vmem:[#allocation3 + $0x58] sm:$0xf] %v3111_v0  ;;  %v3119_v4 = vor.u32 %v3117_v30, %v3116_v35  ;;  %v2804_v45 = vmul.f32 %v2757_v53, %v2594_v15  ;;  %v3121_v12 = vrot.slane %v3116_v35, 4 }
 0x2e5   : > { %v3123_v5 = vshrl.u32 %v6995_v38, 16  ;;  %v2565_v31 = vadd.f32 %v10681_v11, %v2528_v26  ;;  %v7359_v40 = vpop.f32.mrb[176].mxu0  ;;  %v2529_v37 = vadd.f32 %v2491_v51, %v10670_v44  ;;  %v3126_v54 = vshll.u32 %v6995_v38, 16 }
 0x2e6   : > { %v3120_v34 = vsel %vm10699_vm8, %v3112_v9, %v3119_v4  ;;  %v6996_v39 = vpack.c.bf16 %v2804_v45, %v2804_v45  ;;  %v7360_v10 = vpop.f32.mrb[177].mxu0  ;;  %v2495_v13 = vpop.f32.mrb[176].mxu1 }
 0x2e7   : > { %3235 = vst [vmem:[#allocation3 + $0x5c] sm:$0xf] %v3120_v34  ;;  %v3125_v29 = vrot.slane %v3123_v5, 7  ;;  %v2595_v3 = vmax.f32 %v2565_v31, 0.0  ;;  %v7361_v2 = vadd.f32 %v7360_v10, %v7359_v40  ;;  %v7362_v16 = vpop.f32.mrb[178].mxu0  ;;  %v7938_v60 = vpop.f32.mrb[177].mxu1  ;;  %v2566_v41 = vadd.f32 %v10681_v11, %v2529_v37 }
 0x2e8   : > { %v3132_v23 = vshrl.u32 %v6996_v39, 16  ;;  %v7363_v1 = vpop.f32.mrb[179].mxu0  ;;  %v2498_v62 = vpop.f32.mrb[178].mxu1  ;;  %v3135_v20 = vshll.u32 %v6996_v39, 16 }
 0x2e9   : > { %v3128_v6 = vor.u32 %v3126_v54, %v3125_v29  ;;  %v2805_v17 = vmul.f32 %v2762_v56, %v2595_v3  ;;  %v2496_v24 = vadd.f32 %v7361_v2, %v2495_v13  ;;  %v7939_v14 = vpop.f32.mrb[179].mxu1  ;;  %v2596_v55 = vmax.f32 %v2566_v41, 0.0  ;;  %v3242_v54 = vld [vmem:[#allocation3 + $0x78] sm:$0x1] }
 0x2ea   : > { %v3134_v44 = vrot.slane %v3132_v23, 7  ;;  %v7364_v57 = vadd.f32 %v7363_v1, %v7362_v16  ;;  %v3130_v21 = vrot.slane %v3125_v29, 4  ;;  %v3252_v1 = vld [vmem:[#allocation3] sm:$0xf] (!%p6755_p4) }
 0x2eb   : > { %v3129_v52 = vsel %vm10699_vm8, %v3121_v12, %v3128_v6  ;;  %v6997_v8 = vpack.c.bf16 %v2805_v17, %v2805_v17  ;;  %v2530_v59 = vadd.f32 %v2496_v24, %v10673_v32  ;;  %v2806_v28 = vmul.f32 %v2767_v42, %v2596_v55 }
 0x2ec   : > { %3236 = vst [vmem:[#allocation3 + $0x60] sm:$0xf] %v3129_v52  ;;  %v3137_v11 = vor.u32 %v3135_v20, %v3134_v44  ;;  %v2499_v33 = vadd.f32 %v7364_v57, %v2498_v62  ;;  %v3139_v30 = vrot.slane %v3134_v44, 4  ;;  %v3257_v62 = vld [vmem:[#allocation3 + $0xc] sm:$0x1] (!%p6755_p4)  ;;  %v3253_v49 = vsel (!%p6755_p4), %vm10692_vm7, 0, %v3252_v1 }
 0x2ed   : > { %v3141_v50 = vshrl.u32 %v6997_v8, 16  ;;  %v2567_v63 = vadd.f32 %v8409_v61, %v2530_v59  ;;  %v6998_v22 = vpack.c.bf16 %v2806_v28, %v2806_v28  ;;  %v3144_v32 = vshll.u32 %v6997_v8, 16  ;;  %3254 = vst [vmem:[#allocation3] sm:$0xf] (!%p6755_p4), %v3253_v49 }
 0x2ee   : > { %v3138_v43 = vsel %vm10699_vm8, %v3130_v21, %v3137_v11  ;;  %v2531_v46 = vadd.f32 %v2499_v33, %v10676_v7  ;;  %v8820_v12 = vmov (!%p6755_p4), 0   ;;  %v3258_v6 = vsel (!%p6755_p4), %vm10554_vm3, 0, %v3257_v62 }
 0x2ef   : > { %3237 = vst [vmem:[#allocation3 + $0x64] sm:$0xf] %v3138_v43  ;;  %v3143_v48 = vrot.slane %v3141_v50, 7  ;;  %v2597_v19 = vmax.f32 %v2567_v63, 0.0  ;;  %v3150_v36 = vshrl.u32 %v6998_v22, 16  ;;  %v3153_v0 = vshll.u32 %v6998_v22, 16 }
 0x2f0   : > { %v2568_v35 = vadd.f32 %v8409_v61, %v2531_v46  ;;  %3255 = vst [vmem:[#allocation3 + $0x4] sm:$0xf] (!%p6755_p4), %v8820_v12  ;;  %3256 = vst [vmem:[#allocation3 + $0x8] sm:$0xf] (!%p6755_p4), %v8820_v12 }
 0x2f1   : > { %v3146_v15 = vor.u32 %v3144_v32, %v3143_v48  ;;  %v2807_v47 = vmul.f32 %v2772_v27, %v2597_v19  ;;  %v3152_v53 = vrot.slane %v3150_v36, 7  ;;  %v3148_v4 = vrot.slane %v3143_v48, 4  ;;  %3259 = vst [vmem:[#allocation3 + $0xc] sm:$0x1] (!%p6755_p4), %v3258_v6 }
 0x2f2   : > { %v2598_v38 = vmax.f32 %v2568_v35, 0.0 }
 0x2f3   : > { %v3147_v26 = vsel %vm10699_vm8, %v3139_v30, %v3146_v15  ;;  %v6999_v9 = vpack.c.bf16 %v2807_v47, %v2807_v47  ;;  %v3155_v7 = vor.u32 %v3153_v0, %v3152_v53  ;;  %v3157_v39 = vrot.slane %v3152_v53, 4 }
 0x2f4   : > { %3238 = vst [vmem:[#allocation3 + $0x68] sm:$0xf] %v3147_v26  ;;  %v2808_v45 = vmul.f32 %v10722_v18, %v2598_v38 }
 0x2f5   : > { %v3159_v51 = vshrl.u32 %v6999_v9, 16  ;;  %v3156_v56 = vsel %vm10699_vm8, %v3148_v4, %v3155_v7  ;;  %v3162_v40 = vshll.u32 %v6999_v9, 16 }
 0x2f6   : > { %v7000_v5 = vpack.c.bf16 %v2808_v45, %v2808_v45  ;;  %3239 = vst [vmem:[#allocation3 + $0x6c] sm:$0xf] %v3156_v56 }
 0x2f7   : > { %v3161_v31 = vrot.slane %v3159_v51, 7 }
 0x2f8   : > { %v3168_v34 = vshrl.u32 %v7000_v5, 16  ;;  %v3171_v13 = vshll.u32 %v7000_v5, 16 }
 0x2f9   : > { %v3164_v37 = vor.u32 %v3162_v40, %v3161_v31  ;;  %v3166_v3 = vrot.slane %v3161_v31, 4 }
 0x2fa   : > { %v3170_v10 = vrot.slane %v3168_v34, 7 }
 0x2fb   : > { %v3165_v29 = vsel %vm10699_vm8, %v3157_v39, %v3164_v37 }
 0x2fc   : > { %3240 = vst [vmem:[#allocation3 + $0x70] sm:$0xf] %v3165_v29  ;;  %v3173_v18 = vor.u32 %v3171_v13, %v3170_v10  ;;  %v3175_v2 = vrot.slane %v3170_v10, 4 }
 0x2fe   : > { %v3174_v16 = vsel %vm10699_vm8, %v3166_v3, %v3173_v18  ;;  %v3243_v60 = vsel %vm10554_vm3, %v3175_v2, %v3242_v54 }
 0x2ff   : > { %3241 = vst [vmem:[#allocation3 + $0x74] sm:$0xf] %v3174_v16  ;;  %3244 = vst [vmem:[#allocation3 + $0x78] sm:$0x1] %v3243_v60 }
 0x302   : > { %3251 = sbr.rel (%p6755_p4) target bundleno = 777 (0x309), region = 60 }
 0x306   : > { %v3245_v23 = vld [vmem:[#allocation3 + $0x78] sm:$0xf] }
 0x307   : > { %v3246_v41 = vsel %vm10692_vm7, 0, %v3245_v23 }
 0x308   : > { %3247 = vst [vmem:[#allocation3 + $0x78] sm:$0xf] %v3246_v41 }
 0x309 PF: > { %p6756_p1 = scmp.ne.s32.totalorder %s8792_s27, 1 }
 0x30a   : > { %v3264_v17 = vld [vmem:[#allocation3 + $0x6c] sm:$0xf] (!%p6756_p1)  ;;  %v8821_v44 = vmov (!%p6756_p1), 0  }
 0x30b   : > { %3263 = sbr.rel (%p6756_p1) target bundleno = 786 (0x312), region = 64  ;;  %v3265_v14 = vsel (!%p6756_p1), %vm10692_vm7, 0, %v3264_v17  ;;  %3267 = vst [vmem:[#allocation3 + $0x70] sm:$0xf] (!%p6756_p1), %v8821_v44  ;;  %3268 = vst [vmem:[#allocation3 + $0x74] sm:$0xf] (!%p6756_p1), %v8821_v44 }
 0x30c   : > { %3266 = vst [vmem:[#allocation3 + $0x6c] sm:$0xf] (!%p6756_p1), %v3265_v14 }
 0x30f   : > { %v3269_v24 = vld [vmem:[#allocation3 + $0x78] sm:$0x1] (!%p6756_p1) }
 0x310   : > { %v3270_v20 = vsel (!%p6756_p1), %vm10554_vm3, 0, %v3269_v24 }
 0x311   : > { %3271 = vst [vmem:[#allocation3 + $0x78] sm:$0x1] (!%p6756_p1), %v3270_v20 }
 0x312 PF: > { %v8410_v55 = vld [vmem:[#allocation9 + $0x100] sm:$0xff]   ;;  %v8413_v52 = vld [vmem:[#allocation9 + $0x108] sm:$0xff]   ;;  %v8416_v59 = vld [vmem:[#allocation9 + $0x110] sm:$0xff]   ;;  %vm3468_vm9 = vsmask.f32 7424  ;;  %vm3681_vm10 = vcmask 1046528  }
 0x313   : > { %v8411_v57 = vld [vmem:[#allocation9 + $0x140] sm:$0xff]   ;;  %7388 = vmatprep.subr.bf16.mxu0 %v8410_v55  ;;  %v8414_v8 = vld [vmem:[#allocation9 + $0x148] sm:$0xff]   ;;  %v8417_v21 = vld [vmem:[#allocation9 + $0x150] sm:$0xff]   ;;  %s11924_s14 = sld [smem:[#allocation15_spill]]  ;;  %s6262_s11 = smul.u32 24, %s8792_s27 }
 0x314   : > { %v8412_v42 = vld [vmem:[#allocation9 + $0xc0] sm:$0xff]   ;;  %7940 = vmatprep.subr.bf16.mxu1 %v8411_v57  ;;  %v8415_v25 = vld [vmem:[#allocation9 + $0xc8] sm:$0xff]   ;;  %v8418_v58 = vld [vmem:[#allocation9 + $0xd0] sm:$0xff]   ;;  %s6270_s17 = sshll.u32 %s10824_s2, 4  ;;  %s11926_s20 = sld [smem:[#allocation77_spill]]  ;;  %s11377_s17 = int_to_ptr.vmem [resolvable:$true] %s6270_s17 }
 0x315   : > { %7389 = vmatpush3.bf16.msra.mxu0 %v8412_v42  ;;  %7941 = vmatpush3.bf16.msra.mxu1 %v8411_v57  ;;  %v8419_v11 = vld [vmem:[#allocation9 + $0x118] sm:$0xff]   ;;  %v8422_v50 = vld [vmem:[#allocation9 + $0x120] sm:$0xff]   ;;  %v8425_v43 = vld [vmem:[#allocation9 + $0x128] sm:$0xff]   ;;  %s11385_s19 = scalar_lea.sflag [#allocation6], %s310_s29  ;;  %s8682_s6 = scalar_lea.vmem %s11377_s17, 3072 }
 0x316   : > { %7390 = vmatprep.subr.bf16.mxu0 %v8413_v52  ;;  %7942 = vmatprep.subr.bf16.mxu1 %v8414_v8  ;;  %v8420_v28 = vld [vmem:[#allocation9 + $0x158] sm:$0xff]   ;;  %v8423_v61 = vld [vmem:[#allocation9 + $0x160] sm:$0xff]   ;;  %v8426_v22 = vld [vmem:[#allocation9 + $0x168] sm:$0xff]   ;;  %p8683_p3 = scmp.ne.s32.totalorder %s11377_s17, %s8682_s6  ;;  %s8822_s18 = smov [#allocation10]  }
 0x317   : > { %v8421_v33 = vld [vmem:[#allocation9 + $0xd8] sm:$0xff]   ;;  %v8424_v63 = vld [vmem:[#allocation9 + $0xe0] sm:$0xff]   ;;  %v8427_v46 = vld [vmem:[#allocation9 + $0xe8] sm:$0xff]   ;;  %s8686_s15 = sshll.u32 %s8822_s18, 4  ;;  %s8687_s15 = int_to_ptr.vmem [resolvable:$false] %s8686_s15 }
 0x318   : > { %v8428_v48 = vld [vmem:[#allocation9 + $0x130] sm:$0xff]   ;;  %v8431_v27 = vld [vmem:[#allocation9 + $0x138] sm:$0xff]   ;;  %v8434_v35 = vld [vmem:[#allocation3 + $0xc] sm:$0xff]   ;;  %s8688_s13 = scalar_lea.vmem %s8687_s15, 6144  ;;  %p8689_p11 = scmp.lt.s32.totalorder %s11377_s17, %s8687_s15 }
 0x319   : > { %7391 = vmatpush3.bf16.msra.mxu0 %v8415_v25  ;;  %7943 = vmatpush3.bf16.msra.mxu1 %v8414_v8  ;;  %v8429_v32 = vld [vmem:[#allocation9 + $0x170] sm:$0xff]   ;;  %v8432_v36 = vld [vmem:[#allocation9 + $0x178] sm:$0xff]   ;;  %v8435_v15 = vld [vmem:[#allocation3 + $0x14] sm:$0xff]   ;;  %v4012_v47 = vshrl.u32 %v8434_v35, 16  ;;  %v4014_v53 = vshll.u32 %v8434_v35, 16  ;;  %s8200_s24 = smul.u32 48, %s11924_s14  ;;  %p8690_p5 = scmp.lt.s32.totalorder %s8688_s13, %s8682_s6 }
 0x31a   : > { %7392 = vmatprep.subr.bf16.mxu0 %v8416_v59  ;;  %7944 = vmatprep.subr.bf16.mxu1 %v8417_v21  ;;  %v8430_v19 = vld [vmem:[#allocation9 + $0xf0] sm:$0xff]   ;;  %v8433_v30 = vld [vmem:[#allocation9 + $0xf8] sm:$0xff]   ;;  %v4019_v0 = vshll.u32 %v8435_v15, 16  ;;  %v8436_v38 = vld [vmem:[#allocation3 + $0xc] sm:$0xfe]   ;;  %v4023_v54 = vshrl.u32 %v8435_v15, 16 }
 0x31b   : > { %v8437_v26 = vld [vmem:[#allocation3 + $0x14] sm:$0xff]   ;;  %v4016_v9 = vrot.slane %v4014_v53, 1  ;;  %v8438_v4 = vld [vmem:[#allocation3 + $0xc] sm:$0xff]   ;;  %v4223_v45 = vrot.slane %v8436_v38, 1  ;;  %v8439_v56 = vld [vmem:[#allocation3 + $0x1c] sm:$0xff]   ;;  %s11356_s10 = sadd.s32 %s8200_s24, %s6262_s11  ;;  %p8691_p8 = por %p8690_p5, %p8689_p11 }
 0x31c   : > { %v4021_v7 = vrot.slane %v4019_v0, 1  ;;  %v4224_v51 = vrot.slane %v8437_v26, 1  ;;  %v8440_v31 = vld [vmem:[#allocation9 + $0x40] sm:$0xff]   ;;  %v4226_v34 = vrot.slane %v8439_v56, 1  ;;  %v8444_v3 = vld [vmem:[#allocation9 + $0x48] sm:$0xff]   ;;  %v8445_v18 = vld [vmem:[#allocation3 + $0x1c] sm:$0xff]  }
 0x31d   : > { %7393 = vmatpush3.bf16.msra.mxu0 %v8418_v58  ;;  %7945 = vmatpush3.bf16.msra.mxu1 %v8417_v21  ;;  %v4017_v5 = vor.u32 %v4016_v9, %v4012_v47  ;;  %v8441_v39 = vld [vmem:[#allocation9 + $0x1c0] sm:$0xff]   ;;  %v8446_v2 = vld [vmem:[#allocation3 + $0x24] sm:$0xff]   ;;  %v4027_v60 = vshll.u32 %v8445_v18, 16  ;;  %v8447_v23 = vld [vmem:[#allocation9 + $0x8] sm:$0xff]   ;;  %v4031_v20 = vshrl.u32 %v8445_v18, 16  ;;  %s6968_s27 = sshll.u32 %s11356_s10, 7 }
 0x31e   : > { %7394 = vmatprep.subr.bf16.mxu0 %v8419_v11  ;;  %7946 = vmatprep.subr.bf16.mxu1 %v8420_v28  ;;  %v4225_v40 = vsel %vm3681_vm10, %v4223_v45, %v4224_v51  ;;  %v8442_v10 = vld [vmem:[#allocation9] sm:$0xff]   ;;  %v4227_v13 = vsel %vm3681_vm10, %v4224_v51, %v4226_v34  ;;  %v4025_v16 = vor.u32 %v4023_v54, %v4021_v7  ;;  %v4228_v41 = vrot.slane %v8446_v2, 1  ;;  %v8448_v1 = vld [vmem:[#allocation3 + $0x14] sm:$0xff]   ;;  %v8450_v6 = vld [vmem:[#allocation9 + $0x50] sm:$0xff]   ;;  %s11375_s9 = scalar_lea.hbm %s11926_s20, %s6968_s27 }
 0x31f   : > { %v4022_v37 = vsel %vm3468_vm9, %v4017_v5, %v4021_v7  ;;  %7956 = vmatprep.mubr.bf16.mxu1 %v4225_v40  ;;  %v8443_v29 = vld [vmem:[#allocation9 + $0x180] sm:$0xff]   ;;  %v4029_v62 = vrot.slane %v4027_v60, 1  ;;  %v8451_v14 = vld [vmem:[#allocation9 + $0x1c8] sm:$0xff]   ;;  %v8452_v44 = vld [vmem:[#allocation9 + $0x10] sm:$0xff]  }
 0x320   : > { %4532 = vmatprep.mubr.bf16.mxu0 %v4022_v37  ;;  %v8449_v49 = vld [vmem:[#allocation3 + $0x2c] sm:$0xff]   ;;  %v4229_v12 = vsel %vm3681_vm10, %v4226_v34, %v4228_v41  ;;  %v8453_v57 = vld [vmem:[#allocation9 + $0x188] sm:$0xff]   ;;  %v8454_v42 = vld [vmem:[#allocation3 + $0x24] sm:$0xff]  }
 0x321   : > { %7395 = vmatpush3.bf16.msra.mxu0 %v8421_v33  ;;  %7947 = vmatpush3.bf16.msra.mxu1 %v8420_v28  ;;  %v4030_v17 = vsel %vm3468_vm9, %v4025_v16, %v4029_v62  ;;  %v4230_v24 = vrot.slane %v8449_v49, 1  ;;  %v8455_v52 = vld [vmem:[#allocation3 + $0x34] sm:$0xff]   ;;  %v4033_v8 = vor.u32 %v4031_v20, %v4029_v62  ;;  %v4035_v25 = vshll.u32 %v8454_v42, 16  ;;  %v8456_v59 = vld [vmem:[#allocation3 + $0x1c] sm:$0xff]   ;;  %v8458_v28 = vld [vmem:[#allocation9 + $0x58] sm:$0xff]  }
 0x322   : > { %7396 = vmatprep.subr.bf16.mxu0 %v8422_v50  ;;  %7948 = vmatprep.subr.bf16.mxu1 %v8423_v61  ;;  %v4232_v21 = vrot.slane %v8455_v52, 1  ;;  %v8457_v58 = vld [vmem:[#allocation3 + $0x3c] sm:$0xff]   ;;  %v8463_v35 = vld [vmem:[#allocation3 + $0x4c] sm:$0xff]   ;;  %v8468_v45 = vld [vmem:[#allocation9 + $0x68] sm:$0xff]  }
 0x323   : > { %v4231_v55 = vsel %vm3681_vm10, %v4228_v41, %v4230_v24  ;;  %v4037_v11 = vrot.slane %v4035_v25, 1  ;;  %v4234_v50 = vrot.slane %v8457_v58, 1  ;;  %v8464_v15 = vld [vmem:[#allocation9 + $0x60] sm:$0xff]   ;;  %v4238_v53 = vrot.slane %v8463_v35, 1  ;;  %v8465_v0 = vld [vmem:[#allocation9 + $0x1d0] sm:$0xff]   ;;  %v8469_v51 = vld [vmem:[#allocation3 + $0x34] sm:$0xff]  }
 0x324   : > { %v4233_v33 = vsel %vm3681_vm10, %v4230_v24, %v4232_v21  ;;  %v8466_v26 = vld [vmem:[#allocation9 + $0x20] sm:$0xff]   ;;  %v8470_v56 = vld [vmem:[#allocation3 + $0x54] sm:$0xff]   ;;  %v8475_v18 = vld [vmem:[#allocation9 + $0x1d8] sm:$0xff]   ;;  %v4055_v16 = vshrl.u32 %v8469_v51, 16 }
 0x325   : > { %7397 = vmatpush3.bf16.msra.mxu0 %v8424_v63  ;;  %7949 = vmatpush3.bf16.msra.mxu1 %v8423_v61  ;;  %v8459_v61 = vld [vmem:[#allocation9 + $0x18] sm:$0xff]   ;;  %v4038_v63 = vsel %vm3468_vm9, %v4033_v8, %v4037_v11  ;;  %v8471_v40 = vld [vmem:[#allocation9 + $0x28] sm:$0xff]   ;;  %v4240_v34 = vrot.slane %v8470_v56, 1  ;;  %v8476_v2 = vld [vmem:[#allocation9 + $0x30] sm:$0xff]  }
 0x326   : > { %7398 = vmatprep.subr.bf16.mxu0 %v8425_v43  ;;  %7950 = vmatprep.subr.bf16.mxu1 %v8426_v22  ;;  %v8460_v43 = vld [vmem:[#allocation3 + $0x2c] sm:$0xff]   ;;  %v8478_v41 = vld [vmem:[#allocation3 + $0x3c] sm:$0xff]   ;;  %v8497_v56 = vld [vmem:[#allocation9 + $0x1e8] sm:$0xff]  }
 0x327   : > { %v4047_v7 = vshrl.u32 %v8460_v43, 16  ;;  %v4059_v49 = vshll.u32 %v8478_v41, 16  ;;  %v4063_v52 = vshrl.u32 %v8478_v41, 16  ;;  %v8486_v58 = vld [vmem:[#allocation3 + $0x8] sm:$0xff]   ;;  %v8504_v41 = vld [vmem:[#allocation3 + $0x20] sm:$0xff]  }
 0x328   : > { %v3481_v35 = vshrl.u32 %v8486_v58, 16 }
 0x329   : > { %7399 = vmatpush3.bf16.msra.mxu0 %v8427_v46  ;;  %7951 = vmatpush3.bf16.msra.mxu1 %v8426_v22  ;;  %v4039_v22 = vshrl.u32 %v8454_v42, 16  ;;  %v4235_v46 = vsel %vm3681_vm10, %v4232_v21, %v4234_v50  ;;  %v4061_v24 = vrot.slane %v4059_v49, 1  ;;  %v8484_v42 = vld [vmem:[#allocation3 + $0x44] sm:$0xff]  }
 0x32a   : > { %7400 = vmatprep.subr.bf16.mxu0 %v8428_v48  ;;  %7952 = vmatprep.subr.bf16.mxu1 %v8429_v32  ;;  %v8461_v48 = vld [vmem:[#allocation3 + $0x44] sm:$0xff]  }
 0x32b   : > { %v4065_v25 = vor.u32 %v4063_v52, %v4061_v24  ;;  %v8485_v21 = vld [vmem:[#allocation3] sm:$0xff]  }
 0x32d   : > { %7401 = vmatpush3.bf16.msra.mxu0 %v8430_v19  ;;  %7953 = vmatpush3.bf16.msra.mxu1 %v8429_v32  ;;  %v4041_v32 = vor.u32 %v4039_v22, %v4037_v11  ;;  %v4043_v19 = vshll.u32 %v8460_v43, 16  ;;  %v8487_v11 = vld [vmem:[#allocation3 + $0x3c] sm:$0xff]   ;;  %v4071_v43 = vshrl.u32 %v8484_v42, 16 }
 0x32e   : > { %7402 = vmatprep.subr.bf16.mxu0 %v8431_v27  ;;  %7954 = vmatprep.subr.bf16.mxu1 %v8432_v36  ;;  %v8462_v27 = vld [vmem:[#allocation3 + $0x24] sm:$0xff]  }
 0x331   : > { %7403 = vmatpush3.bf16.msra.mxu0 %v8433_v30  ;;  %7955 = vmatpush3.bf16.msra.mxu1 %v8432_v36  ;;  %v4236_v36 = vrot.slane %v8461_v48, 1  ;;  %v4045_v30 = vrot.slane %v4043_v19, 1  ;;  %v8490_v19 = vld [vmem:[#allocation9 + $0x1e0] sm:$0xff]  }
 0x332   : > { %7496 = vmatprep.subr.bf16.mxu1 %v8440_v31  ;;  %7604 = vmatprep.subr.bf16.mxu0 %v8441_v39  ;;  %v4051_v31 = vshll.u32 %v8469_v51, 16  ;;  %v8472_v39 = vld [vmem:[#allocation3 + $0x2c] sm:$0xff]  }
 0x333   : > { %v4237_v47 = vsel %vm3681_vm10, %v4234_v50, %v4236_v36  ;;  %v4046_v38 = vsel %vm3468_vm9, %v4041_v32, %v4045_v30  ;;  %v4239_v9 = vsel %vm3681_vm10, %v4236_v36, %v4238_v53  ;;  %v4049_v5 = vor.u32 %v4047_v7, %v4045_v30  ;;  %v8489_v32 = vld [vmem:[#allocation9 + $0x80] sm:$0xff]  }
 0x334   : > { %4533 = vmatmul.mubr.bf16.vlgmr.msra.gmra.mrb[180].mxu0 %v8438_v4  ;;  %7957 = vmatmul.mubr.bf16.vlgmr.msra.gmra.mrb[180].mxu1 %v4227_v13  ;;  %v8467_v4 = vld [vmem:[#allocation9 + $0x190] sm:$0xff]   ;;  %v4053_v37 = vrot.slane %v4051_v31, 1  ;;  %v4241_v13 = vsel %vm3681_vm10, %v4238_v53, %v4240_v34  ;;  %v3472_v50 = vshll.u32 %v8485_v21, 16  ;;  %v8491_v36 = vld [vmem:[#allocation9 + $0x1a0] sm:$0xff]   ;;  %v8498_v31 = vld [vmem:[#allocation9 + $0x1a8] sm:$0xff]  }
 0x335   : > { %7497 = vmatpush3.bf16.msra.mxu1 %v8442_v10  ;;  %7605 = vmatpush3.bf16.msra.mxu0 %v8443_v29  ;;  %v8473_v10 = vld [vmem:[#allocation3 + $0x5c] sm:$0xff]   ;;  %v8492_v30 = vld [vmem:[#allocation3 + $0x4c] sm:$0xff]  }
 0x336   : > { %7498 = vmatprep.subr.bf16.mxu1 %v8444_v3  ;;  %7960 = vmatprep.mubr.bf16.mxu1 %v4229_v12  ;;  %v8474_v29 = vld [vmem:[#allocation9 + $0x70] sm:$0xff]   ;;  %v4054_v54 = vsel %vm3468_vm9, %v4049_v5, %v4053_v37  ;;  %v4242_v3 = vrot.slane %v8473_v10, 1  ;;  %v4057_v62 = vor.u32 %v4055_v16, %v4053_v37  ;;  %v8480_v12 = vld [vmem:[#allocation3 + $0x34] sm:$0xff]  }
 0x337   : > { %4540 = vmatprep.mubr.bf16.mxu0 %v4030_v17  ;;  %7606 = vmatprep.subr.bf16.mxu0 %v8451_v14  ;;  %v8481_v17 = vld [vmem:[#allocation3 + $0x6c] ss:$0 sps:$4 sm:$0x11]   ;;  %v8482_v14 = vld [vmem:[#allocation9 + $0x78] sm:$0xff]   ;;  %v8500_v10 = vld [vmem:[#allocation3 + $0x18] sm:$0xff]  }
 0x338   : > { %v4243_v60 = vsel %vm3681_vm10, %v4240_v34, %v4242_v3  ;;  %v4246_v20 = vrot.slane %v8481_v17, 1  ;;  %v3501_v17 = vshll.u32 %v8504_v41, 16 }
 0x339   : > { %7499 = vmatpush3.bf16.msra.mxu1 %v8447_v23  ;;  %7607 = vmatpush3.bf16.msra.mxu0 %v8453_v57  ;;  %v8477_v23 = vld [vmem:[#allocation9 + $0x198] sm:$0xff]   ;;  %v4062_v57 = vsel %vm3468_vm9, %v4057_v62, %v4061_v24  ;;  %v3497_v62 = vshrl.u32 %v8500_v10, 16 }
 0x33a   : > { %7500 = vmatprep.subr.bf16.mxu1 %v8450_v6  ;;  %7608 = vmatprep.subr.bf16.mxu0 %v8465_v0  ;;  %v4075_v0 = vshll.u32 %v8492_v30, 16 }
 0x33c   : > { %4541 = vmatmul.mubr.bf16.gmra.mrb[184].mxu0 %v8448_v1  ;;  %7961 = vmatmul.mubr.bf16.gmra.mrb[184].mxu1 %v4231_v55  ;;  %v8479_v1 = vld [vmem:[#allocation3 + $0x64] sm:$0xff]   ;;  %v4077_v7 = vrot.slane %v4075_v0, 1 }
 0x33d   : > { %7501 = vmatpush3.bf16.msra.mxu1 %v8452_v44  ;;  %7964 = vmatprep.mubr.bf16.mxu1 %v4233_v33  ;;  %v4244_v6 = vrot.slane %v8479_v1, 1  ;;  %v8483_v55 = vld [vmem:[#allocation9 + $0x38] sm:$0xff]   ;;  %v3470_v33 = vshrl.u32 %v8485_v21, 16  ;;  %v8509_v21 = vld [vmem:[#allocation9 + $0x1b0] sm:$0xff]  }
 0x33e   : > { %7502 = vmatprep.subr.bf16.mxu1 %v8458_v28  ;;  %4548 = vmatprep.mubr.bf16.mxu0 %v4038_v63  ;;  %v8488_v63 = vld [vmem:[#allocation3] sm:$0xff]  }
 0x33f   : > { %7609 = vmatpush3.bf16.msra.mxu0 %v8467_v4  ;;  %v4245_v44 = vsel %vm3681_vm10, %v4242_v3, %v4244_v6  ;;  %v4247_v8 = vsel %vm3681_vm10, %v4244_v6, %v4246_v20  ;;  %v8495_v4 = vld [vmem:[#allocation3 + $0x8] sm:$0xff]  }
 0x340   : > { %7610 = vmatprep.subr.bf16.mxu0 %v8475_v18  ;;  %v3493_v18 = vshll.u32 %v8500_v10, 16  ;;  %v8523_v10 = vld [vmem:[#allocation3 + $0x20] sm:$0xff]  }
 0x341   : > { %7503 = vmatpush3.bf16.msra.mxu1 %v8459_v61  ;;  %v3477_v61 = vshll.u32 %v8486_v58, 16  ;;  %v3505_v58 = vshrl.u32 %v8504_v41, 16 }
 0x342   : > { %7504 = vmatprep.subr.bf16.mxu1 %v8464_v15  ;;  %v3495_v1 = vrot.slane %v3493_v18, 1 }
 0x343   : > { %7611 = vmatpush3.bf16.msra.mxu0 %v8477_v23  ;;  %v3479_v48 = vrot.slane %v3477_v61, 1  ;;  %v8512_v61 = vld [vmem:[#allocation3 + $0x5c] sm:$0xff]  }
 0x344   : > { %4549 = vmatmul.mubr.bf16.gmra.mrb[188].mxu0 %v8456_v59  ;;  %7965 = vmatmul.mubr.bf16.gmra.mrb[188].mxu1 %v4235_v46  ;;  %v4067_v59 = vshll.u32 %v8484_v42, 16  ;;  %v3474_v46 = vrot.slane %v3472_v50, 1  ;;  %v8507_v42 = vld [vmem:[#allocation9 + $0x90] sm:$0xff]  }
 0x345   : > { %7968 = vmatprep.mubr.bf16.mxu1 %v4237_v47  ;;  %4556 = vmatprep.mubr.bf16.mxu0 %v4046_v38  ;;  %v8493_v47 = vld [vmem:[#allocation3 + $0x10] sm:$0xff]   ;;  %v8494_v38 = vld [vmem:[#allocation3 + $0x44] sm:$0xff]  }
 0x346   : > { %7505 = vmatpush3.bf16.msra.mxu1 %v8466_v26  ;;  %v4069_v28 = vrot.slane %v4067_v59, 1  ;;  %7612 = vmatprep.subr.bf16.mxu0 %v8490_v19  ;;  %v3483_v26 = vor.u32 %v3481_v35, %v3479_v48  ;;  %v3489_v37 = vshrl.u32 %v8493_v47, 16  ;;  %v8515_v19 = vld [vmem:[#allocation9 + $0x1f8] sm:$0xff]   ;;  %v8517_v35 = vld [vmem:[#allocation3 + $0x6c] ss:$0 sps:$4 sm:$0x11]  }
 0x347   : > { %7506 = vmatprep.subr.bf16.mxu1 %v8468_v45  ;;  %7613 = vmatpush3.bf16.msra.mxu0 %v8491_v36  ;;  %v8496_v45 = vld [vmem:[#allocation9 + $0x88] sm:$0xff]   ;;  %v8516_v36 = vld [vmem:[#allocation9 + $0x1b8] sm:$0xff]  }
 0x348   : > { %v4070_v22 = vsel %vm3468_vm9, %v4065_v25, %v4069_v28  ;;  %v4073_v53 = vor.u32 %v4071_v43, %v4069_v28  ;;  %7614 = vmatprep.subr.bf16.mxu0 %v8497_v56  ;;  %v8508_v25 = vld [vmem:[#allocation9 + $0x1f0] sm:$0xff]   ;;  %v8511_v28 = vld [vmem:[#allocation3 + $0x28] sm:$0xff]  }
 0x349   : > { %v3509_v43 = vshll.u32 %v8511_v28, 16  ;;  %v3513_v0 = vshrl.u32 %v8511_v28, 16  ;;  %v8521_v56 = vld [vmem:[#allocation3 + $0x38] sm:$0xff]   ;;  %v8535_v28 = vld [vmem:[#allocation3 + $0x30] sm:$0xff]  }
 0x34a   : > { %7507 = vmatpush3.bf16.msra.mxu1 %v8471_v40  ;;  %v4078_v5 = vsel %vm3468_vm9, %v4073_v53, %v4077_v7  ;;  %v4079_v40 = vshrl.u32 %v8492_v30, 16  ;;  %v4107_v53 = vshll.u32 %v8517_v35, 16 }
 0x34b   : > { %7508 = vmatprep.subr.bf16.mxu1 %v8474_v29  ;;  %7615 = vmatpush3.bf16.msra.mxu0 %v8498_v31  ;;  %v8522_v31 = vld [vmem:[#allocation3 + $0x18] sm:$0xff]  }
 0x34c   : > { %4557 = vmatmul.mubr.bf16.gmra.mrb[192].mxu0 %v8462_v27  ;;  %7969 = vmatmul.mubr.bf16.gmra.mrb[192].mxu1 %v4239_v9  ;;  %v3475_v27 = vor.u32 %v3474_v46, %v3470_v33  ;;  %v3485_v9 = vshll.u32 %v8493_v47, 16  ;;  %v8518_v47 = vld [vmem:[#allocation3 + $0x30] sm:$0xff]  }
 0x34d   : > { %7972 = vmatprep.mubr.bf16.mxu1 %v4241_v13  ;;  %4564 = vmatprep.mubr.bf16.mxu0 %v4054_v54  ;;  %v4081_v13 = vor.u32 %v4079_v40, %v4077_v7  ;;  %v8501_v54 = vld [vmem:[#allocation3 + $0x4c] sm:$0xff]  }
 0x34e   : > { %7509 = vmatpush3.bf16.msra.mxu1 %v8476_v2  ;;  %v3480_v15 = vsel %vm3468_vm9, %v3475_v27, %v3479_v48  ;;  %v3487_v51 = vrot.slane %v3485_v9, 1  ;;  %v8502_v2 = vld [vmem:[#allocation3 + $0x10] sm:$0xff]   ;;  %7616 = vmatprep.subr.bf16.mxu0 %v8508_v25  ;;  %v8514_v48 = vld [vmem:[#allocation9 + $0x98] sm:$0xff]  }
 0x34f   : > { %7510 = vmatprep.subr.bf16.mxu1 %v8482_v14  ;;  %v3499_v14 = vor.u32 %v3497_v62, %v3495_v1  ;;  %7617 = vmatpush3.bf16.msra.mxu0 %v8509_v21  ;;  %v8519_v9 = vld [vmem:[#allocation3 + $0x64] sm:$0xff]  }
 0x350   : > { %v3488_v34 = vsel %vm3468_vm9, %v3483_v26, %v3487_v51  ;;  %v3491_v3 = vor.u32 %v3489_v37, %v3487_v51  ;;  %7618 = vmatprep.subr.bf16.mxu0 %v8515_v19  ;;  %v3517_v26 = vshll.u32 %v8518_v47, 16  ;;  %v3525_v37 = vshll.u32 %v8521_v56, 16  ;;  %v8534_v21 = vld [vmem:[#allocation3 + $0x48] sm:$0xff]   ;;  %v8538_v19 = vld [vmem:[#allocation3 + $0x50] sm:$0xff]  }
 0x352   : > { %7511 = vmatpush3.bf16.msra.mxu1 %v8483_v55  ;;  %v3496_v24 = vsel %vm3468_vm9, %v3491_v3, %v3495_v1  ;;  %v3503_v55 = vrot.slane %v3501_v17, 1  ;;  %v3519_v51 = vrot.slane %v3517_v26, 1  ;;  %v8525_v3 = vld [vmem:[#allocation9 + $0xa0] sm:$0xff]   ;;  %v3527_v18 = vrot.slane %v3525_v37, 1  ;;  %v8545_v37 = vld [vmem:[#allocation3 + $0x40] sm:$0xff]  }
 0x353   : > { %7980 = vmatprep.subr.bf16.mxu1 %v8489_v32  ;;  %7619 = vmatpush3.bf16.msra.mxu0 %v8516_v36  ;;  %v10869_v1 = vld [vmem:[#allocation9 + $0x200] sm:$0xff]   ;;  %v5368_v17 = vshrl.u32 %v8523_v10, 16  ;;  %v8539_v36 = vld [vmem:[#allocation3 + $0x38] sm:$0xff]  }
 0x354   : > { %4565 = vmatmul.mubr.bf16.gmra.mrb[196].mxu0 %v8472_v39  ;;  %7973 = vmatmul.mubr.bf16.gmra.mrb[196].mxu1 %v4243_v60  ;;  %v8499_v39 = vld [vmem:[#allocation3 + $0x54] sm:$0xff]   ;;  %v8503_v60 = vld [vmem:[#allocation3 + $0x5c] sm:$0xff]  }
 0x355   : > { %7976 = vmatprep.mubr.bf16.mxu1 %v4245_v44  ;;  %4572 = vmatprep.mubr.bf16.mxu0 %v4062_v57  ;;  %v4083_v29 = vshll.u32 %v8499_v39, 16  ;;  %v4087_v23 = vshrl.u32 %v8499_v39, 16  ;;  %v4091_v6 = vshll.u32 %v8503_v60, 16  ;;  %v8505_v44 = vld [vmem:[#allocation3 + $0x54] sm:$0xff]   ;;  %v4095_v59 = vshrl.u32 %v8503_v60, 16 }
 0x356   : > { %v8506_v57 = vld [vmem:[#allocation3 + $0x18] sm:$0xff]   ;;  %8020 = vmatprep.subr.bf16.mxu0 %v10869_v1 }
 0x357   : > { %v4085_v16 = vrot.slane %v4083_v29, 1  ;;  %v4093_v20 = vrot.slane %v4091_v6, 1  ;;  %v10866_v29 = vld [vmem:[#allocation3 + $0x30] sm:$0xff]   ;;  %v8526_v60 = vld [vmem:[#allocation3 + $0x18] sm:$0xff]   ;;  %v8529_v6 = vld [vmem:[#allocation3 + $0x28] sm:$0xff]  }
 0x359   : > { %v4086_v49 = vsel %vm3468_vm9, %v4081_v13, %v4085_v16  ;;  %v4097_v33 = vor.u32 %v4095_v59, %v4093_v20  ;;  %v5357_v13 = vshrl.u32 %v8522_v31, 16 }
 0x35c   : > { %4573 = vmatmul.mubr.bf16.gmra.mrb[200].mxu0 %v8480_v12  ;;  %7977 = vmatmul.mubr.bf16.gmra.mrb[200].mxu1 %v4247_v8  ;;  %v4089_v12 = vor.u32 %v4087_v23, %v4085_v16  ;;  %v3504_v8 = vsel %vm3468_vm9, %v3499_v14, %v3503_v55 }
 0x35d   : > { %4580 = vmatprep.mubr.bf16.mxu0 %v4070_v22  ;;  %4934 = vmatprep.mubr.bf16.mxu1 %v3480_v15  ;;  %v8513_v22 = vld [vmem:[#allocation3 + $0x20] sm:$0xff]  }
 0x35e   : > { %v4094_v52 = vsel %vm3468_vm9, %v4089_v12, %v4093_v20  ;;  %v3529_v12 = vshrl.u32 %v8521_v56, 16  ;;  %v10873_v20 = vld [vmem:[#allocation3 + $0x38] sm:$0xff]   ;;  %v10890_v56 = vld [vmem:[#allocation3 + $0x30] sm:$0xff]  }
 0x360   : > { %v3531_v14 = vor.u32 %v3529_v12, %v3527_v18  ;;  %v8550_v12 = vld [vmem:[#allocation3 + $0x60] ss:$0 sps:$4 sm:$0x11]  }
 0x364   : > { %4581 = vmatmul.mubr.bf16.gmra.mrb[204].mxu0 %v8487_v11  ;;  %4935 = vmatmul.mubr.bf16.vlgmr.msra.gmra.mrb[204].mxu1 %v8488_v63  ;;  %v8510_v11 = vld [vmem:[#allocation3 + $0x64] sm:$0xff]   ;;  %v3507_v63 = vor.u32 %v3505_v58, %v3503_v55 }
 0x365   : > { %7981 = vmatpush3.bf16.msra.mxu1 %v8489_v32  ;;  %4588 = vmatprep.mubr.bf16.mxu0 %v4078_v5  ;;  %v4099_v50 = vshll.u32 %v8510_v11, 16  ;;  %v3511_v32 = vrot.slane %v3509_v43, 1  ;;  %v4103_v15 = vshrl.u32 %v8510_v11, 16  ;;  %v3521_v5 = vshrl.u32 %v8518_v47, 16  ;;  %v10879_v43 = vld [vmem:[#allocation3 + $0x40] sm:$0xff]  }
 0x366   : > { %7982 = vmatprep.subr.bf16.mxu1 %v8496_v45  ;;  %4942 = vmatprep.mubr.bf16.mxu1 %v3488_v34 }
 0x367   : > { %v4101_v46 = vrot.slane %v4099_v50, 1  ;;  %v3512_v30 = vsel %vm3468_vm9, %v3507_v63, %v3511_v32  ;;  %v3515_v7 = vor.u32 %v3513_v0, %v3511_v32  ;;  %v3523_v39 = vor.u32 %v3521_v5, %v3519_v51  ;;  %v10877_v50 = vld [vmem:[#allocation9 + $0x208] sm:$0xff]  }
 0x368   : > { %v3541_v63 = vshll.u32 %v8534_v21, 16  ;;  %v5388_v0 = vshll.u32 %v8539_v36, 16 }
 0x369   : > { %7983 = vmatpush3.bf16.msra.mxu1 %v8496_v45  ;;  %v4102_v27 = vsel %vm3468_vm9, %v4097_v33, %v4101_v46  ;;  %v8520_v45 = vld [vmem:[#allocation3 + $0x28] sm:$0xff]   ;;  %v3520_v34 = vsel %vm3468_vm9, %v3515_v7, %v3519_v51  ;;  %v3528_v23 = vsel %vm3468_vm9, %v3523_v39, %v3527_v18  ;;  %v5376_v33 = vshrl.u32 %v8529_v6, 16  ;;  %v8541_v51 = vld [vmem:[#allocation9 + $0xb0] sm:$0xff]  }
 0x36a   : > { %7984 = vmatprep.subr.bf16.mxu1 %v8507_v42  ;;  %v3543_v32 = vrot.slane %v3541_v63, 1  ;;  %v8544_v39 = vld [vmem:[#allocation3 + $0x58] sm:$0xff]  }
 0x36b   : > { %v10900_v18 = vld [vmem:[#allocation3 + $0x38] sm:$0xff]  }
 0x36c   : > { %4589 = vmatmul.mubr.bf16.gmra.mrb[208].mxu0 %v8494_v38  ;;  %4943 = vmatmul.mubr.bf16.gmra.mrb[208].mxu1 %v8495_v4  ;;  %v4105_v38 = vor.u32 %v4103_v15, %v4101_v46  ;;  %v4109_v4 = vrot.slane %v4107_v53, 1  ;;  %v5380_v46 = vshll.u32 %v8535_v28, 16  ;;  %v3549_v53 = vshll.u32 %v8538_v19, 16 }
 0x36d   : > { %4596 = vmatprep.mubr.bf16.mxu0 %v4086_v49  ;;  %4950 = vmatprep.mubr.bf16.mxu1 %v3496_v24  ;;  %v8528_v49 = vld [vmem:[#allocation3 + $0x40] sm:$0xff]  }
 0x36e   : > { %7985 = vmatpush3.bf16.msra.mxu1 %v8507_v42  ;;  %v4110_v40 = vsel %vm3468_vm9, %v4105_v38, %v4109_v4  ;;  %v8531_v42 = vld [vmem:[#allocation3 + $0x20] sm:$0xff]   ;;  %v3537_v58 = vshrl.u32 %v8528_v49, 16  ;;  %v5382_v35 = vrot.slane %v5380_v46, 1  ;;  %v3553_v4 = vshrl.u32 %v8538_v19, 16  ;;  %v10919_v46 = vld [vmem:[#allocation3 + $0x48] sm:$0xff]  }
 0x36f   : > { %7986 = vmatprep.subr.bf16.mxu1 %v8514_v48  ;;  %v3551_v7 = vrot.slane %v3549_v53, 1  ;;  %v8562_v53 = vld [vmem:[#allocation3 + $0x20] sm:$0xff]  }
 0x372   : > { %7987 = vmatpush3.bf16.msra.mxu1 %v8514_v48  ;;  %v10881_v48 = vld [vmem:[#allocation3 + $0x28] sm:$0xff]  }
 0x373   : > { %7988 = vmatprep.subr.bf16.mxu1 %v8525_v3 }
 0x374   : > { %4597 = vmatmul.mubr.bf16.gmra.mrb[212].mxu0 %v8501_v54  ;;  %4951 = vmatmul.mubr.bf16.gmra.mrb[212].mxu1 %v8502_v2  ;;  %v5359_v54 = vshll.u32 %v8522_v31, 16  ;;  %v5364_v2 = vshll.u32 %v8523_v10, 16  ;;  %v3555_v10 = vor.u32 %v3553_v4, %v3551_v7 }
 0x375   : > { %4604 = vmatprep.mubr.bf16.mxu0 %v4094_v52  ;;  %4958 = vmatprep.mubr.bf16.mxu1 %v3504_v8  ;;  %v8532_v8 = vld [vmem:[#allocation9 + $0xa8] sm:$0xff]  }
 0x376   : > { %v5361_v16 = vrot.slane %v5359_v54, 1  ;;  %v5366_v41 = vrot.slane %v5364_v2, 1  ;;  %7989 = vmatpush3.bf16.msra.mxu1 %v8525_v3  ;;  %v5396_v3 = vshll.u32 %v8545_v37, 16 }
 0x377   : > { %7990 = vmatprep.subr.bf16.mxu1 %v8532_v8 }
 0x378   : > { %v5362_v62 = vor.u32 %v5361_v16, %v5357_v13  ;;  %v5370_v55 = vor.u32 %v5368_v17, %v5366_v41  ;;  %v3557_v13 = vshll.u32 %v8544_v39, 16  ;;  %v8548_v16 = vld [vmem:[#allocation9 + $0xb8] sm:$0xff]  }
 0x37a   : > { %v5367_v24 = vsel %vm3468_vm9, %v5362_v62, %v5366_v41  ;;  %7991 = vmatpush3.bf16.msra.mxu1 %v8532_v8  ;;  %v3559_v2 = vrot.slane %v3557_v13, 1  ;;  %v3561_v41 = vshrl.u32 %v8544_v39, 16  ;;  %v8551_v62 = vld [vmem:[#allocation3 + $0x48] sm:$0xff]  }
 0x37b   : > { %7992 = vmatprep.subr.bf16.mxu1 %v8541_v51 }
 0x37c   : > { %4605 = vmatmul.mubr.bf16.gmra.mrb[216].mxu0 %v8505_v44  ;;  %4959 = vmatmul.mubr.bf16.gmra.mrb[216].mxu1 %v8506_v57  ;;  %v3533_v44 = vshll.u32 %v8528_v49, 16  ;;  %v5372_v57 = vshll.u32 %v8529_v6, 16  ;;  %v3560_v49 = vsel %vm3468_vm9, %v3555_v10, %v3559_v2  ;;  %v5400_v6 = vshrl.u32 %v8545_v37, 16  ;;  %v8567_v10 = vld [vmem:[#allocation3 + $0x30] sm:$0xff]  }
 0x37d   : > { %4612 = vmatprep.mubr.bf16.mxu0 %v4102_v27  ;;  %4966 = vmatprep.mubr.bf16.mxu1 %v3512_v30  ;;  %v3545_v27 = vshrl.u32 %v8534_v21, 16  ;;  %v5384_v30 = vshrl.u32 %v8535_v28, 16  ;;  %v8554_v21 = vld [vmem:[#allocation3] sm:$0xfe]  }
 0x37e   : > { %v3535_v52 = vrot.slane %v3533_v44, 1  ;;  %v5374_v25 = vrot.slane %v5372_v57, 1  ;;  %7993 = vmatpush3.bf16.msra.mxu1 %v8541_v51  ;;  %v3563_v44 = vor.u32 %v3561_v41, %v3559_v2  ;;  %v10912_v57 = vld [vmem:[#allocation3 + $0x40] sm:$0xff]   ;;  %v3682_v63 = vrot.slane %v8554_v21, 1  ;;  %v8570_v41 = vld [vmem:[#allocation3 + $0x68] sm:$0xff]  }
 0x37f   : > { %v3547_v47 = vor.u32 %v3545_v27, %v3543_v32  ;;  %v5386_v26 = vor.u32 %v5384_v30, %v5382_v35  ;;  %7994 = vmatprep.subr.bf16.mxu1 %v8548_v16  ;;  %v10924_v27 = vld [vmem:[#allocation9 + $0x220] sm:$0xff]   ;;  %v3693_v2 = vrot.slane %v8567_v10, 1  ;;  %v8583_v10 = vld [vmem:[#allocation3 + $0x18] sm:$0xfe]  }
 0x380   : > { %v3536_v59 = vsel %vm3468_vm9, %v3531_v14, %v3535_v52  ;;  %v5375_v11 = vsel %vm3468_vm9, %v5370_v55, %v5374_v25  ;;  %v10909_v14 = vld [vmem:[#allocation3 + $0x58] sm:$0xff]  }
 0x381   : > { %v3552_v5 = vsel %vm3468_vm9, %v3547_v47, %v3551_v7  ;;  %v3689_v7 = vrot.slane %v8562_v53, 1  ;;  %v8580_v53 = vld [vmem:[#allocation3 + $0x78] ss:$0 sps:$4 sm:$0x11]  }
 0x382   : > { %7995 = vmatpush3.bf16.msra.mxu1 %v8548_v16  ;;  %v8569_v16 = vld [vmem:[#allocation3 + $0x38] sm:$0xff]  }
 0x383   : > { %8060 = vmatprep.subr.bf16.mxu1 %v10869_v1 }
 0x384   : > { %4613 = vmatmul.mubr.bf16.gmra.mrb[220].mxu0 %v8512_v61  ;;  %4967 = vmatmul.mubr.bf16.gmra.mrb[220].mxu1 %v8513_v22  ;;  %v3539_v61 = vor.u32 %v3537_v58, %v3535_v52  ;;  %v5378_v22 = vor.u32 %v5376_v33, %v5374_v25  ;;  %v8555_v52 = vld [vmem:[#allocation3 + $0x8] sm:$0xff]   ;;  %v8556_v25 = vld [vmem:[#allocation3 + $0x50] sm:$0xff]  }
 0x385   : > { %4620 = vmatprep.mubr.bf16.mxu0 %v4110_v40  ;;  %4974 = vmatprep.mubr.bf16.mxu1 %v3520_v34  ;;  %v10894_v40 = vld [vmem:[#allocation9 + $0x210] sm:$0xff]   ;;  %v5392_v34 = vshrl.u32 %v8539_v36, 16  ;;  %v3683_v58 = vrot.slane %v8555_v52, 1  ;;  %v5412_v33 = vshll.u32 %v8556_v25, 16  ;;  %v5416_v36 = vshrl.u32 %v8556_v25, 16  ;;  %v8574_v25 = vld [vmem:[#allocation3 + $0x48] sm:$0xff]  }
 0x386   : > { %v3544_v15 = vsel %vm3468_vm9, %v3539_v61, %v3543_v32  ;;  %v5383_v38 = vsel %vm3468_vm9, %v5378_v22, %v5382_v35  ;;  %v8557_v61 = vld [vmem:[#allocation3 + $0x10] sm:$0xff]  }
 0x387   : > { %v5414_v32 = vrot.slane %v5412_v33, 1  ;;  %v3685_v19 = vrot.slane %v8557_v61, 1 }
 0x389   : > { %v10930_v30 = vsel %vm3681_vm10, %v3683_v58, %v3685_v19 }
 0x38c   : > { %4621 = vmatmul.mubr.bf16.gmra.mrb[224].mxu0 %v8519_v9  ;;  %4975 = vmatmul.mubr.bf16.gmra.mrb[224].mxu1 %v8520_v45  ;;  %v10886_v9 = vld [vmem:[#allocation3 + $0x48] sm:$0xff]   ;;  %v5390_v45 = vrot.slane %v5388_v0, 1  ;;  %v5418_v0 = vor.u32 %v5416_v36, %v5414_v32  ;;  %v8579_v36 = vld [vmem:[#allocation3 + $0x58] sm:$0xff]  }
 0x38d   : > { %5877 = vmatprep.mubr.bf16.mxu0 %v5367_v24  ;;  %4982 = vmatprep.mubr.bf16.mxu1 %v3528_v23  ;;  %v10904_v23 = vld [vmem:[#allocation9 + $0x218] sm:$0xff]   ;;  %v5404_v24 = vshll.u32 %v8551_v62, 16 }
 0x38e   : > { %v5391_v31 = vsel %vm3468_vm9, %v5386_v26, %v5390_v45  ;;  %v5394_v54 = vor.u32 %v5392_v34, %v5390_v45  ;;  %v10935_v26 = vld [vmem:[#allocation3 + $0x50] sm:$0xff]  }
 0x38f   : > { %v10940_v45 = vld [vmem:[#allocation9 + $0x228] sm:$0xff]  }
 0x394   : > { %5878 = vmatmul.mubr.bf16.vlgmr.msra.gmra.mrb[228].mxu0 %v8526_v60  ;;  %4983 = vmatmul.mubr.bf16.gmra.mrb[228].mxu1 %v10866_v29  ;;  %v10898_v29 = vld [vmem:[#allocation3 + $0x50] sm:$0xff]   ;;  %v5398_v60 = vrot.slane %v5396_v3, 1 }
 0x395   : > { %8021 = vmatpush3.bf16.msra.mxu0 %v10869_v1  ;;  %5885 = vmatprep.mubr.bf16.mxu0 %v5375_v11  ;;  %v5408_v11 = vshrl.u32 %v8551_v62, 16 }
 0x396   : > { %8022 = vmatprep.subr.bf16.mxu0 %v10877_v50  ;;  %4990 = vmatprep.mubr.bf16.mxu1 %v3536_v59  ;;  %v5399_v17 = vsel %vm3468_vm9, %v5394_v54, %v5398_v60  ;;  %v5402_v55 = vor.u32 %v5400_v6, %v5398_v60 }
 0x399   : > { %8023 = vmatpush3.bf16.msra.mxu0 %v10877_v50 }
 0x39a   : > { %8024 = vmatprep.subr.bf16.mxu0 %v10894_v40 }
 0x39c   : > { %5886 = vmatmul.mubr.bf16.gmra.mrb[232].mxu0 %v8531_v42  ;;  %4991 = vmatmul.mubr.bf16.gmra.mrb[232].mxu1 %v10873_v20  ;;  %v3565_v20 = vshll.u32 %v8550_v12, 16  ;;  %v5406_v42 = vrot.slane %v5404_v24, 1  ;;  %v8571_v24 = vld [vmem:[#allocation3 + $0x40] sm:$0xff]  }
 0x39d   : > { %5893 = vmatprep.mubr.bf16.mxu0 %v5383_v38  ;;  %8025 = vmatpush3.bf16.msra.mxu0 %v10894_v40  ;;  %v3697_v52 = vrot.slane %v8571_v24, 1  ;;  %v8588_v24 = vld [vmem:[#allocation3 + $0x58] sm:$0xff]  }
 0x39e   : > { %4998 = vmatprep.mubr.bf16.mxu1 %v3544_v15  ;;  %8026 = vmatprep.subr.bf16.mxu0 %v10904_v23  ;;  %v3567_v8 = vrot.slane %v3565_v20, 1  ;;  %v5407_v59 = vsel %vm3468_vm9, %v5402_v55, %v5406_v42  ;;  %v5410_v22 = vor.u32 %v5408_v11, %v5406_v42  ;;  %v8561_v15 = vld [vmem:[#allocation3 + $0x58] sm:$0xff]   ;;  %v10967_v55 = vld [vmem:[#allocation3 + $0x60] sm:$0xff]   ;;  %v8576_v11 = vld [vmem:[#allocation3 + $0x50] sm:$0xff]  }
 0x39f   : > { %v5420_v38 = vshll.u32 %v8561_v15, 16  ;;  %v5424_v34 = vshrl.u32 %v8561_v15, 16  ;;  %v10988_v15 = vld [vmem:[#allocation3 + $0x70] sm:$0xff]  }
 0x3a0   : > { %v3568_v28 = vsel %vm3468_vm9, %v3563_v44, %v3567_v8  ;;  %v10927_v35 = vsel %vm3468_vm9, %v5410_v22, %v5414_v32  ;;  %v10969_v8 = vld [vmem:[#allocation9 + $0x230] sm:$0xff]   ;;  %v3701_v22 = vrot.slane %v8576_v11, 1  ;;  %v10985_v32 = vld [vmem:[#allocation9 + $0x238] sm:$0xff]  }
 0x3a1   : > { %8027 = vmatpush3.bf16.msra.mxu0 %v10904_v23  ;;  %v5422_v51 = vrot.slane %v5420_v38, 1  ;;  %v8581_v38 = vld [vmem:[#allocation3 + $0x60] ss:$0 sps:$4 sm:$0x11]  }
 0x3a2   : > { %8028 = vmatprep.subr.bf16.mxu0 %v10924_v27  ;;  %v8593_v11 = vld [vmem:[#allocation3 + $0x40] sm:$0xff]  }
 0x3a3   : > { %v10948_v39 = vsel %vm3468_vm9, %v5418_v0, %v5422_v51  ;;  %v5426_v13 = vor.u32 %v5424_v34, %v5422_v51  ;;  %v8584_v0 = vld [vmem:[#allocation3 + $0x20] sm:$0xff]   ;;  %v5452_v51 = vshll.u32 %v8580_v53, 16  ;;  %v8585_v34 = vld [vmem:[#allocation3 + $0x48] sm:$0xff]  }
 0x3a4   : > { %5894 = vmatmul.mubr.bf16.gmra.mrb[236].mxu0 %v10881_v48  ;;  %4999 = vmatmul.mubr.bf16.gmra.mrb[236].mxu1 %v10879_v43  ;;  %v10922_v48 = vsel %vm3681_vm10, %v3682_v63, %v3683_v58  ;;  %v8560_v43 = vld [vmem:[#allocation3 + $0x18] sm:$0xff]   ;;  %v8575_v58 = vld [vmem:[#allocation3 + $0x70] sm:$0xff]   ;;  %v10982_v63 = vld [vmem:[#allocation3 + $0x68] sm:$0xff]  }
 0x3a5   : > { %5901 = vmatprep.mubr.bf16.mxu0 %v5391_v31  ;;  %5006 = vmatprep.mubr.bf16.mxu1 %v3552_v5  ;;  %v3687_v47 = vrot.slane %v8560_v43, 1  ;;  %v8565_v5 = vld [vmem:[#allocation3 + $0x28] sm:$0xff]   ;;  %v5444_v61 = vshll.u32 %v8575_v58, 16  ;;  %v5448_v43 = vshrl.u32 %v8575_v58, 16 }
 0x3a6   : > { %8029 = vmatpush3.bf16.msra.mxu0 %v10924_v27  ;;  %v3691_v37 = vrot.slane %v8565_v5, 1  ;;  %v5569_v5 = vrot.slane %v8584_v0, 1 }
 0x3a7   : > { %v10938_v4 = vsel %vm3681_vm10, %v3685_v19, %v3687_v47  ;;  %v10944_v31 = vsel %vm3681_vm10, %v3687_v47, %v3689_v7  ;;  %8030 = vmatprep.subr.bf16.mxu0 %v10940_v45  ;;  %v5446_v19 = vrot.slane %v5444_v61, 1  ;;  %v8594_v61 = vld [vmem:[#allocation3 + $0x70] sm:$0xff]  }
 0x3a8   : > { %v10954_v3 = vsel %vm3681_vm10, %v3689_v7, %v3691_v37  ;;  %v10958_v62 = vsel %vm3681_vm10, %v3691_v37, %v3693_v2  ;;  %v5454_v37 = vrot.slane %v5452_v51, 1 }
 0x3a9   : > { %v5450_v7 = vor.u32 %v5448_v43, %v5446_v19  ;;  %v5589_v43 = vrot.slane %v8594_v61, 1 }
 0x3aa   : > { %8031 = vmatpush3.bf16.msra.mxu0 %v10940_v45 }
 0x3ab   : > { %8032 = vmatprep.subr.bf16.mxu0 %v10969_v8 }
 0x3ac   : > { %5902 = vmatmul.mubr.bf16.gmra.mrb[240].mxu0 %v10890_v56  ;;  %5007 = vmatmul.mubr.bf16.gmra.mrb[240].mxu1 %v10886_v9  ;;  %v8566_v56 = vld [vmem:[#allocation3 + $0x60] sm:$0xff]   ;;  %v10951_v9 = vld [vmem:[#allocation3 + $0x58] sm:$0xff]  }
 0x3ad   : > { %5909 = vmatprep.mubr.bf16.mxu0 %v5399_v17  ;;  %5014 = vmatprep.mubr.bf16.mxu1 %v3560_v49  ;;  %v5428_v54 = vshll.u32 %v8566_v56, 16  ;;  %v3695_v49 = vrot.slane %v8569_v16, 1  ;;  %v5432_v12 = vshrl.u32 %v8566_v56, 16  ;;  %v5436_v17 = vshll.u32 %v8570_v41, 16 }
 0x3ae   : > { %8033 = vmatpush3.bf16.msra.mxu0 %v10969_v8  ;;  %v3705_v56 = vrot.slane %v8581_v38, 1  ;;  %v5579_v16 = vrot.slane %v8585_v34, 1 }
 0x3af   : > { %v5430_v60 = vrot.slane %v5428_v54, 1  ;;  %v10965_v44 = vsel %vm3681_vm10, %v3693_v2, %v3695_v49  ;;  %v5438_v42 = vrot.slane %v5436_v17, 1  ;;  %v10975_v21 = vsel %vm3681_vm10, %v3695_v49, %v3697_v52  ;;  %8034 = vmatprep.subr.bf16.mxu0 %v10985_v32 }
 0x3b0   : > { %v11008_v54 = vsel %vm3468_vm9, %v5450_v7, %v5454_v37  ;;  %v5568_v2 = vrot.slane %v8583_v10, 1 }
 0x3b1   : > { %v10961_v6 = vsel %vm3468_vm9, %v5426_v13, %v5430_v60  ;;  %v5434_v20 = vor.u32 %v5432_v12, %v5430_v60  ;;  %v8586_v13 = vld [vmem:[#allocation3 + $0x50] sm:$0xff]  }
 0x3b2   : > { %8035 = vmatpush3.bf16.msra.mxu0 %v10985_v32  ;;  %v5581_v60 = vrot.slane %v8586_v13, 1  ;;  %v5570_v49 = vsel %vm3681_vm10, %v5568_v2, %v5569_v5 }
 0x3b4   : > { %5910 = vmatmul.mubr.bf16.gmra.mrb[244].mxu0 %v10900_v18  ;;  %5015 = vmatmul.mubr.bf16.gmra.mrb[244].mxu1 %v10898_v29  ;;  %v5440_v18 = vshrl.u32 %v8570_v41, 16  ;;  %v3699_v29 = vrot.slane %v8574_v25, 1  ;;  %v8587_v41 = vld [vmem:[#allocation3 + $0x28] sm:$0xff]   ;;  %v5582_v12 = vsel %vm3681_vm10, %v5579_v16, %v5581_v60 }
 0x3b5   : > { %5917 = vmatprep.mubr.bf16.mxu0 %v5407_v59  ;;  %5022 = vmatprep.mubr.bf16.mxu1 %v3568_v28  ;;  %v10972_v59 = vsel %vm3468_vm9, %v5434_v20, %v5438_v42  ;;  %v5571_v17 = vrot.slane %v8587_v41, 1 }
 0x3b6   : > { %v10980_v28 = vsel %vm3681_vm10, %v3697_v52, %v3699_v29  ;;  %v5442_v33 = vor.u32 %v5440_v18, %v5438_v42  ;;  %v10992_v47 = vsel %vm3681_vm10, %v3699_v29, %v3701_v22  ;;  %v5583_v18 = vrot.slane %v8588_v24, 1  ;;  %v8590_v42 = vld [vmem:[#allocation3 + $0x60] sm:$0xff]   ;;  %v8591_v52 = vld [vmem:[#allocation3 + $0x38] sm:$0xff]   ;;  %v8592_v29 = vld [vmem:[#allocation3 + $0x68] sm:$0xff]  }
 0x3b7   : > { %v5572_v20 = vsel %vm3681_vm10, %v5569_v5, %v5571_v17  ;;  %v5585_v25 = vrot.slane %v8590_v42, 1 }
 0x3bc   : > { %5918 = vmatmul.mubr.bf16.gmra.mrb[248].mxu0 %v10912_v57  ;;  %5023 = vmatmul.mubr.bf16.gmra.mrb[248].mxu1 %v10909_v14  ;;  %v10997_v57 = vsel %vm3468_vm9, %v5442_v33, %v5446_v19  ;;  %v5587_v33 = vrot.slane %v8592_v29, 1  ;;  %v5577_v19 = vrot.slane %v8593_v11, 1 }
 0x3bd   : > { %5925 = vmatprep.mubr.bf16.mxu0 %v10927_v35  ;;  %7996 = vmatprep.mubr.bf16.mxu1 %v10922_v48  ;;  %v3703_v35 = vrot.slane %v8579_v36, 1  ;;  %v8595_v36 = vld [vmem:[#allocation3 + $0x78] ss:$0 sps:$4 sm:$0x11]  }
 0x3be   : > { %v5580_v53 = vsel %vm3681_vm10, %v5577_v19, %v5579_v16  ;;  %v5591_v0 = vrot.slane %v8595_v36, 1 }
 0x3bf   : > { %v11001_v14 = vsel %vm3681_vm10, %v3701_v22, %v3703_v35  ;;  %v11004_v48 = vsel %vm3681_vm10, %v3703_v35, %v3705_v56 }
 0x3c0   : > { %v5592_v35 = vsel %vm3681_vm10, %v5589_v43, %v5591_v0 }
 0x3c4   : > { %5926 = vmatmul.mubr.bf16.gmra.mrb[252].mxu0 %v10919_v46  ;;  %7997 = vmatmul.mubr.bf16.vlgmr.msra.gmra.mrb[180].mxu1 %v10930_v30  ;;  %v8589_v46 = vld [vmem:[#allocation3 + $0x30] sm:$0xff]   ;;  %v5584_v30 = vsel %vm3681_vm10, %v5581_v60, %v5583_v18 }
 0x3c5   : > { %5933 = vmatprep.mubr.bf16.mxu0 %v10948_v39  ;;  %8068 = vmatpush3.bf16.msra.mxu1 %v10869_v1  ;;  %v5573_v39 = vrot.slane %v8589_v46, 1  ;;  %v5575_v1 = vrot.slane %v8591_v52, 1 }
 0x3c6   : > { %8000 = vmatprep.mubr.bf16.mxu1 %v10938_v4  ;;  %8061 = vmatprep.subr.bf16.mxu1 %v10877_v50  ;;  %v5586_v4 = vsel %vm3681_vm10, %v5583_v18, %v5585_v25 }
 0x3c7   : > { %v5574_v58 = vsel %vm3681_vm10, %v5571_v17, %v5573_v39  ;;  %v5576_v22 = vsel %vm3681_vm10, %v5573_v39, %v5575_v1 }
 0x3c9   : > { %8069 = vmatpush3.bf16.msra.mxu1 %v10877_v50  ;;  %v5588_v50 = vsel %vm3681_vm10, %v5585_v25, %v5587_v33 }
 0x3ca   : > { %8062 = vmatprep.subr.bf16.mxu1 %v10894_v40 }
 0x3cc   : > { %5934 = vmatmul.mubr.bf16.gmra.mrb[0].mxu0 %v10935_v26  ;;  %8001 = vmatmul.mubr.bf16.gmra.mrb[184].mxu1 %v10944_v31  ;;  %v5578_v26 = vsel %vm3681_vm10, %v5575_v1, %v5577_v19 }
 0x3cd   : > { %5941 = vmatprep.mubr.bf16.mxu0 %v10961_v6  ;;  %8070 = vmatpush3.bf16.msra.mxu1 %v10894_v40  ;;  %v5590_v6 = vsel %vm3681_vm10, %v5587_v33, %v5589_v43 }
 0x3ce   : > { %8004 = vmatprep.mubr.bf16.mxu1 %v10954_v3  ;;  %8063 = vmatprep.subr.bf16.mxu1 %v10904_v23 }
 0x3d1   : > { %8071 = vmatpush3.bf16.msra.mxu1 %v10904_v23 }
 0x3d2   : > { %8064 = vmatprep.subr.bf16.mxu1 %v10924_v27 }
 0x3d4   : > { %5942 = vmatmul.mubr.bf16.gmra.mrb[4].mxu0 %v10951_v9  ;;  %8005 = vmatmul.mubr.bf16.gmra.mrb[188].mxu1 %v10958_v62 }
 0x3d5   : > { %5949 = vmatprep.mubr.bf16.mxu0 %v10972_v59  ;;  %8008 = vmatprep.mubr.bf16.mxu1 %v10965_v44 }
 0x3d6   : > { %8072 = vmatpush3.bf16.msra.mxu1 %v10924_v27 }
 0x3d7   : > { %8065 = vmatprep.subr.bf16.mxu1 %v10940_v45 }
 0x3da   : > { %8073 = vmatpush3.bf16.msra.mxu1 %v10940_v45 }
 0x3db   : > { %8066 = vmatprep.subr.bf16.mxu1 %v10969_v8 }
 0x3dc   : > { %5950 = vmatmul.mubr.bf16.gmra.mrb[8].mxu0 %v10967_v55  ;;  %8009 = vmatmul.mubr.bf16.gmra.mrb[192].mxu1 %v10975_v21 }
 0x3dd   : > { %5957 = vmatprep.mubr.bf16.mxu0 %v10997_v57  ;;  %8012 = vmatprep.mubr.bf16.mxu1 %v10980_v28 }
 0x3de   : > { %8074 = vmatpush3.bf16.msra.mxu1 %v10969_v8 }
 0x3df   : > { %8067 = vmatprep.subr.bf16.mxu1 %v10985_v32 }
 0x3e2   : > { %8075 = vmatpush3.bf16.msra.mxu1 %v10985_v32 }
 0x3e4   : > { %5958 = vmatmul.mubr.bf16.gmra.mrb[12].mxu0 %v10982_v63  ;;  %8013 = vmatmul.mubr.bf16.gmra.mrb[196].mxu1 %v10992_v47 }
 0x3e5   : > { %5965 = vmatprep.mubr.bf16.mxu0 %v11008_v54  ;;  %8016 = vmatprep.mubr.bf16.mxu1 %v11001_v14 }
 0x3ec   : > { %5966 = vmatmul.mubr.bf16.gmra.mrb[16].mxu0 %v10988_v15  ;;  %8017 = vmatmul.mubr.bf16.gmra.mrb[200].mxu1 %v11004_v48 }
 0x3ed   : > { %8036 = vmatprep.mubr.bf16.mxu0 %v5570_v49  ;;  %8048 = vmatprep.mubr.bf16.mxu1 %v5582_v12 }
 0x3f4   : > { %8037 = vmatmul.mubr.bf16.vlgmr.msra.gmra.mrb[20].mxu0 %v5572_v20  ;;  %8049 = vmatmul.mubr.bf16.vlgmr.msra.gmra.mrb[192].mxu1 %v5584_v30 }
 0x3f5   : > { %8040 = vmatprep.mubr.bf16.mxu0 %v5574_v58  ;;  %8052 = vmatprep.mubr.bf16.mxu1 %v5586_v4 }
 0x3fc   : > { %8041 = vmatmul.mubr.bf16.gmra.mrb[24].mxu0 %v5576_v22  ;;  %8053 = vmatmul.mubr.bf16.gmra.mrb[196].mxu1 %v5588_v50 }
 0x3fd   : > { %8044 = vmatprep.mubr.bf16.mxu0 %v5578_v26  ;;  %8056 = vmatprep.mubr.bf16.mxu1 %v5590_v6 }
 0x404   : > { %8045 = vmatmul.mubr.bf16.gmra.mrb[28].mxu0 %v5580_v53  ;;  %8057 = vmatmul.mubr.bf16.gmra.mrb[200].mxu1 %v5592_v35 }
 0x407   : > { %v7404_v40 = vpop.f32.mrb[180].mxu0 }
 0x408   : > { %v7405_v23 = vpop.f32.mrb[181].mxu0 }
 0x409   : > { %v7406_v27 = vadd.f32 %v7405_v23, %v7404_v40  ;;  %v7407_v45 = vpop.f32.mrb[182].mxu0 }
 0x40a   : > { %v7408_v31 = vpop.f32.mrb[183].mxu0 }
 0x40b   : > { %v7409_v9 = vadd.f32 %v7408_v31, %v7407_v45 }
 0x40f   : > { %v7410_v3 = vpop.f32.mrb[184].mxu0 }
 0x410   : > { %v7411_v62 = vpop.f32.mrb[185].mxu0 }
 0x411   : > { %v7412_v44 = vadd.f32 %v7411_v62, %v7410_v3  ;;  %v7413_v55 = vpop.f32.mrb[186].mxu0 }
 0x412   : > { %v7414_v8 = vpop.f32.mrb[187].mxu0 }
 0x413   : > { %v7415_v59 = vadd.f32 %v7414_v8, %v7413_v55 }
 0x417   : > { %v7416_v21 = vpop.f32.mrb[188].mxu0 }
 0x418   : > { %v7417_v28 = vpop.f32.mrb[189].mxu0 }
 0x419   : > { %v7418_v63 = vadd.f32 %v7417_v28, %v7416_v21  ;;  %v7419_v32 = vpop.f32.mrb[190].mxu0 }
 0x41a   : > { %v7420_v15 = vpop.f32.mrb[191].mxu0 }
 0x41b   : > { %v7421_v47 = vadd.f32 %v7420_v15, %v7419_v32 }
 0x41f   : > { %v7422_v57 = vpop.f32.mrb[192].mxu0 }
 0x420   : > { %v7423_v38 = vpop.f32.mrb[193].mxu0 }
 0x421   : > { %v11058_v7 = vadd.f32 %v7423_v38, %v7422_v57  ;;  %v7425_v51 = vpop.f32.mrb[194].mxu0 }
 0x422   : > { %v7426_v5 = vpop.f32.mrb[195].mxu0 }
 0x423   : > { %v11060_v14 = vadd.f32 %v7426_v5, %v7425_v51 }
 0x427   : > { %v7428_v56 = vpop.f32.mrb[196].mxu0 }
 0x428   : > { %v7429_v34 = vpop.f32.mrb[197].mxu0 }
 0x429   : > { %v11062_v37 = vadd.f32 %v7429_v34, %v7428_v56  ;;  %v7431_v10 = vpop.f32.mrb[198].mxu0 }
 0x42a   : > { %v7432_v13 = vpop.f32.mrb[199].mxu0 }
 0x42b   : > { %v11064_v48 = vadd.f32 %v7432_v13, %v7431_v10 }
 0x42f   : > { %v7434_v54 = vpop.f32.mrb[200].mxu0 }
 0x430   : > { %v7435_v2 = vpop.f32.mrb[201].mxu0 }
 0x431   : > { %v11066_v16 = vadd.f32 %v7435_v2, %v7434_v54  ;;  %v7437_v60 = vpop.f32.mrb[202].mxu0 }
 0x432   : > { %v7438_v41 = vpop.f32.mrb[203].mxu0 }
 0x433   : > { %v11068_v49 = vadd.f32 %v7438_v41, %v7437_v60 }
 0x437   : > { %v7440_v12 = vpop.f32.mrb[204].mxu0  ;;  %v7512_v24 = vpop.f32.mrb[204].mxu1 }
 0x438   : > { %v7441_v17 = vpop.f32.mrb[205].mxu0  ;;  %v7513_v18 = vpop.f32.mrb[205].mxu1 }
 0x439   : > { %v11070_v46 = vadd.f32 %v7441_v17, %v7440_v12  ;;  %v7443_v20 = vpop.f32.mrb[206].mxu0  ;;  %v7514_v39 = vadd.f32 %v7513_v18, %v7512_v24  ;;  %v7515_v52 = vpop.f32.mrb[206].mxu1 }
 0x43a   : > { %v7444_v42 = vpop.f32.mrb[207].mxu0  ;;  %v7516_v25 = vpop.f32.mrb[207].mxu1 }
 0x43b   : > { %v11072_v30 = vadd.f32 %v7444_v42, %v7443_v20  ;;  %v7517_v29 = vadd.f32 %v7516_v25, %v7515_v52  ;;  %v11074_v58 = vadd.f32 %v7514_v39, %v7406_v27 }
 0x43d   : > { %v11076_v11 = vadd.f32 %v7517_v29, %v7409_v9 }
 0x43f   : > { %v7446_v1 = vpop.f32.mrb[208].mxu0  ;;  %v7518_v33 = vpop.f32.mrb[208].mxu1 }
 0x440   : > { %v7447_v4 = vpop.f32.mrb[209].mxu0  ;;  %v7519_v19 = vpop.f32.mrb[209].mxu1 }
 0x441   : > { %v11078_v61 = vadd.f32 %v7447_v4, %v7446_v1  ;;  %v7449_v22 = vpop.f32.mrb[210].mxu0  ;;  %v7520_v50 = vadd.f32 %v7519_v19, %v7518_v33  ;;  %v7521_v43 = vpop.f32.mrb[210].mxu1 }
 0x442   : > { %v7450_v36 = vpop.f32.mrb[211].mxu0  ;;  %v7522_v53 = vpop.f32.mrb[211].mxu1 }
 0x443   : > { %v11080_v26 = vadd.f32 %v7450_v36, %v7449_v22  ;;  %v7523_v0 = vadd.f32 %v7522_v53, %v7521_v43  ;;  %v11082_v6 = vadd.f32 %v7520_v50, %v7412_v44 }
 0x445   : > { %v11084_v40 = vadd.f32 %v7523_v0, %v7415_v59 }
 0x447   : > { %v7452_v35 = vpop.f32.mrb[212].mxu0  ;;  %v7524_v27 = vpop.f32.mrb[212].mxu1 }
 0x448   : > { %v7453_v23 = vpop.f32.mrb[213].mxu0  ;;  %v7525_v9 = vpop.f32.mrb[213].mxu1 }
 0x449   : > { %v11086_v45 = vadd.f32 %v7453_v23, %v7452_v35  ;;  %v7455_v31 = vpop.f32.mrb[214].mxu0  ;;  %v7526_v62 = vadd.f32 %v7525_v9, %v7524_v27  ;;  %v7527_v55 = vpop.f32.mrb[214].mxu1 }
 0x44a   : > { %v7456_v3 = vpop.f32.mrb[215].mxu0  ;;  %v7528_v21 = vpop.f32.mrb[215].mxu1 }
 0x44b   : > { %v11088_v8 = vadd.f32 %v7456_v3, %v7455_v31  ;;  %v7529_v28 = vadd.f32 %v7528_v21, %v7527_v55  ;;  %v11090_v32 = vadd.f32 %v7526_v62, %v7418_v63 }
 0x44d   : > { %v11092_v15 = vadd.f32 %v7529_v28, %v7421_v47 }
 0x44f   : > { %v7458_v44 = vpop.f32.mrb[216].mxu0  ;;  %v7530_v57 = vpop.f32.mrb[216].mxu1 }
 0x450   : > { %v7459_v59 = vpop.f32.mrb[217].mxu0  ;;  %v7531_v5 = vpop.f32.mrb[217].mxu1 }
 0x451   : > { %v11094_v38 = vadd.f32 %v7459_v59, %v7458_v44  ;;  %v7461_v51 = vpop.f32.mrb[218].mxu0  ;;  %v7532_v34 = vadd.f32 %v7531_v5, %v7530_v57  ;;  %v7533_v10 = vpop.f32.mrb[218].mxu1 }
 0x452   : > { %v7462_v56 = vpop.f32.mrb[219].mxu0  ;;  %v7534_v54 = vpop.f32.mrb[219].mxu1 }
 0x453   : > { %v11096_v13 = vadd.f32 %v7462_v56, %v7461_v51  ;;  %v7535_v2 = vadd.f32 %v7534_v54, %v7533_v10  ;;  %v11099_v60 = vadd.f32 %v7532_v34, %v11058_v7 }
 0x455   : > { %v11102_v47 = vadd.f32 %v7535_v2, %v11060_v14 }
 0x457   : > { %v7464_v63 = vpop.f32.mrb[220].mxu0  ;;  %v7536_v12 = vpop.f32.mrb[220].mxu1 }
 0x458   : > { %v7465_v41 = vpop.f32.mrb[221].mxu0  ;;  %v7537_v20 = vpop.f32.mrb[221].mxu1 }
 0x459   : > { %v11104_v17 = vadd.f32 %v7465_v41, %v7464_v63  ;;  %v7467_v24 = vpop.f32.mrb[222].mxu0  ;;  %v7538_v42 = vadd.f32 %v7537_v20, %v7536_v12  ;;  %v7539_v39 = vpop.f32.mrb[222].mxu1 }
 0x45a   : > { %v7468_v18 = vpop.f32.mrb[223].mxu0  ;;  %v7540_v25 = vpop.f32.mrb[223].mxu1 }
 0x45b   : > { %v11106_v52 = vadd.f32 %v7468_v18, %v7467_v24  ;;  %v7541_v29 = vadd.f32 %v7540_v25, %v7539_v39  ;;  %v11109_v7 = vadd.f32 %v7538_v42, %v11062_v37 }
 0x45d   : > { %v11112_v14 = vadd.f32 %v7541_v29, %v11064_v48 }
 0x45f   : > { %v7470_v1 = vpop.f32.mrb[224].mxu0  ;;  %v7542_v33 = vpop.f32.mrb[224].mxu1 }
 0x460   : > { %v7471_v4 = vpop.f32.mrb[225].mxu0  ;;  %v7543_v36 = vpop.f32.mrb[225].mxu1 }
 0x461   : > { %v11114_v22 = vadd.f32 %v7471_v4, %v7470_v1  ;;  %v7473_v19 = vpop.f32.mrb[226].mxu0  ;;  %v7544_v43 = vadd.f32 %v7543_v36, %v7542_v33  ;;  %v7545_v53 = vpop.f32.mrb[226].mxu1 }
 0x462   : > { %v7474_v50 = vpop.f32.mrb[227].mxu0  ;;  %v7546_v35 = vpop.f32.mrb[227].mxu1 }
 0x463   : > { %v11116_v0 = vadd.f32 %v7474_v50, %v7473_v19  ;;  %v7547_v23 = vadd.f32 %v7546_v35, %v7545_v53  ;;  %v11119_v37 = vadd.f32 %v7544_v43, %v11066_v16 }
 0x465   : > { %v11122_v48 = vadd.f32 %v7547_v23, %v11068_v49 }
 0x467   : > { %v7620_v27 = vpop.f32.mrb[228].mxu0  ;;  %v7548_v9 = vpop.f32.mrb[228].mxu1 }
 0x468   : > { %v7621_v31 = vpop.f32.mrb[229].mxu0  ;;  %v7549_v55 = vpop.f32.mrb[229].mxu1 }
 0x469   : > { %v11124_v3 = vadd.f32 %v7621_v31, %v7620_v27  ;;  %v7623_v62 = vpop.f32.mrb[230].mxu0  ;;  %v7550_v28 = vadd.f32 %v7549_v55, %v7548_v9  ;;  %v7551_v44 = vpop.f32.mrb[230].mxu1 }
 0x46a   : > { %v7624_v21 = vpop.f32.mrb[231].mxu0  ;;  %v7552_v57 = vpop.f32.mrb[231].mxu1 }
 0x46b   : > { %v11126_v59 = vadd.f32 %v7624_v21, %v7623_v62  ;;  %v11129_v51 = vadd.f32 %v7550_v28, %v11070_v46  ;;  %v7553_v16 = vadd.f32 %v7552_v57, %v7551_v44 }
 0x46d   : > { %v11132_v5 = vadd.f32 %v7553_v16, %v11072_v30 }
 0x46f   : > { %v7626_v49 = vpop.f32.mrb[232].mxu0  ;;  %v7554_v34 = vpop.f32.mrb[232].mxu1 }
 0x470   : > { %v7627_v56 = vpop.f32.mrb[233].mxu0  ;;  %v7555_v2 = vpop.f32.mrb[233].mxu1 }
 0x471   : > { %v11134_v10 = vadd.f32 %v7627_v56, %v7626_v49  ;;  %v7629_v54 = vpop.f32.mrb[234].mxu0  ;;  %v7556_v41 = vadd.f32 %v7555_v2, %v7554_v34  ;;  %v7557_v12 = vpop.f32.mrb[234].mxu1 }
 0x472   : > { %v7630_v63 = vpop.f32.mrb[235].mxu0  ;;  %v7558_v20 = vpop.f32.mrb[235].mxu1 }
 0x473   : > { %v11136_v24 = vadd.f32 %v7630_v63, %v7629_v54  ;;  %v11139_v46 = vadd.f32 %v7556_v41, %v11078_v61  ;;  %v7559_v18 = vadd.f32 %v7558_v20, %v7557_v12 }
 0x475   : > { %v11142_v30 = vadd.f32 %v7559_v18, %v11080_v26 }
 0x477   : > { %v7632_v42 = vpop.f32.mrb[236].mxu0  ;;  %v7560_v25 = vpop.f32.mrb[236].mxu1 }
 0x478   : > { %v7633_v39 = vpop.f32.mrb[237].mxu0  ;;  %v7561_v4 = vpop.f32.mrb[237].mxu1 }
 0x479   : > { %v11144_v29 = vadd.f32 %v7633_v39, %v7632_v42  ;;  %v7635_v1 = vpop.f32.mrb[238].mxu0  ;;  %v7562_v19 = vadd.f32 %v7561_v4, %v7560_v25  ;;  %v7563_v36 = vpop.f32.mrb[238].mxu1 }
 0x47a   : > { %v7636_v33 = vpop.f32.mrb[239].mxu0  ;;  %v7564_v43 = vpop.f32.mrb[239].mxu1 }
 0x47b   : > { %v11146_v50 = vadd.f32 %v7636_v33, %v7635_v1  ;;  %v11149_v61 = vadd.f32 %v7562_v19, %v11086_v45  ;;  %v7565_v53 = vadd.f32 %v7564_v43, %v7563_v36 }
 0x47d   : > { %v11152_v26 = vadd.f32 %v7565_v53, %v11088_v8 }
 0x47f   : > { %v7638_v35 = vpop.f32.mrb[240].mxu0  ;;  %v7566_v27 = vpop.f32.mrb[240].mxu1 }
 0x480   : > { %v7639_v23 = vpop.f32.mrb[241].mxu0  ;;  %v7567_v62 = vpop.f32.mrb[241].mxu1 }
 0x481   : > { %v11154_v31 = vadd.f32 %v7639_v23, %v7638_v35  ;;  %v7641_v9 = vpop.f32.mrb[242].mxu0  ;;  %v7568_v21 = vadd.f32 %v7567_v62, %v7566_v27  ;;  %v7569_v28 = vpop.f32.mrb[242].mxu1 }
 0x482   : > { %v7642_v55 = vpop.f32.mrb[243].mxu0  ;;  %v7570_v57 = vpop.f32.mrb[243].mxu1 }
 0x483   : > { %v11156_v44 = vadd.f32 %v7642_v55, %v7641_v9  ;;  %v11159_v45 = vadd.f32 %v7568_v21, %v11094_v38  ;;  %v7571_v16 = vadd.f32 %v7570_v57, %v7569_v28 }
 0x485   : > { %v11162_v8 = vadd.f32 %v7571_v16, %v11096_v13 }
 0x487   : > { %v7644_v49 = vpop.f32.mrb[244].mxu0  ;;  %v7572_v34 = vpop.f32.mrb[244].mxu1 }
 0x488   : > { %v7645_v56 = vpop.f32.mrb[245].mxu0  ;;  %v7573_v63 = vpop.f32.mrb[245].mxu1 }
 0x489   : > { %v11164_v54 = vadd.f32 %v7645_v56, %v7644_v49  ;;  %v7647_v2 = vpop.f32.mrb[246].mxu0  ;;  %v7574_v12 = vadd.f32 %v7573_v63, %v7572_v34  ;;  %v7575_v20 = vpop.f32.mrb[246].mxu1 }
 0x48a   : > { %v7648_v41 = vpop.f32.mrb[247].mxu0  ;;  %v7576_v42 = vpop.f32.mrb[247].mxu1 }
 0x48b   : > { %v11166_v18 = vadd.f32 %v7648_v41, %v7647_v2  ;;  %v11169_v38 = vadd.f32 %v7574_v12, %v11104_v17  ;;  %v7577_v39 = vadd.f32 %v7576_v42, %v7575_v20 }
 0x48d   : > { %v11172_v13 = vadd.f32 %v7577_v39, %v11106_v52 }
 0x48f   : > { %v7650_v25 = vpop.f32.mrb[248].mxu0  ;;  %v7578_v4 = vpop.f32.mrb[248].mxu1 }
 0x490   : > { %v7651_v1 = vpop.f32.mrb[249].mxu0  ;;  %v7579_v36 = vpop.f32.mrb[249].mxu1 }
 0x491   : > { %v11174_v33 = vadd.f32 %v7651_v1, %v7650_v25  ;;  %v7653_v19 = vpop.f32.mrb[250].mxu0  ;;  %v7580_v53 = vadd.f32 %v7579_v36, %v7578_v4  ;;  %v7581_v35 = vpop.f32.mrb[250].mxu1 }
 0x492   : > { %v7654_v43 = vpop.f32.mrb[251].mxu0  ;;  %v7582_v27 = vpop.f32.mrb[251].mxu1 }
 0x493   : > { %v11176_v23 = vadd.f32 %v7654_v43, %v7653_v19  ;;  %v11179_v17 = vadd.f32 %v7580_v53, %v11114_v22  ;;  %v7583_v9 = vadd.f32 %v7582_v27, %v7581_v35 }
 0x495   : > { %v11182_v52 = vadd.f32 %v7583_v9, %v11116_v0 }
 0x497   : > { %v7656_v62 = vpop.f32.mrb[252].mxu0  ;;  %v7998_v21 = vpop.f32.mrb[180].mxu1 }
 0x498   : > { %v7657_v55 = vpop.f32.mrb[253].mxu0  ;;  %v8077_v16 = vadd.f32 %v11082_v6, %v7998_v21  ;;  %v5065_v49 = vpop.f32.mrb[181].mxu1 }
 0x499   : > { %v7658_v28 = vadd.f32 %v7657_v55, %v7656_v62  ;;  %v7659_v57 = vpop.f32.mrb[254].mxu0  ;;  %v8081_v34 = vadd.f32 %v11074_v58, %v5065_v49  ;;  %v7999_v2 = vpop.f32.mrb[182].mxu1 }
 0x49a   : > { %v7660_v56 = vpop.f32.mrb[255].mxu0  ;;  %v8085_v41 = vadd.f32 %v11084_v40, %v7999_v2  ;;  %v5068_v0 = vpop.f32.mrb[183].mxu1  ;;  %v11191_v12 = vadd.f32 %v8077_v16, %v11134_v10 }
 0x49b   : > { %v7661_v63 = vadd.f32 %v7660_v56, %v7659_v57  ;;  %v11187_v22 = vadd.f32 %v11129_v51, %v7658_v28  ;;  %v8089_v20 = vadd.f32 %v11076_v11, %v5068_v0  ;;  %v11195_v42 = vadd.f32 %v8081_v34, %v11124_v3 }
 0x49c   : > { %v11201_v58 = vadd.f32 %v8085_v41, %v11136_v24 }
 0x49d   : > { %v11198_v6 = vadd.f32 %v11132_v5, %v7661_v63  ;;  %v11204_v51 = vadd.f32 %v8089_v20, %v11126_v59 }
 0x49f   : > { %v7662_v39 = vpop.f32.mrb[0].mxu0  ;;  %v8002_v25 = vpop.f32.mrb[184].mxu1 }
 0x4a0   : > { %v7663_v40 = vpop.f32.mrb[1].mxu0  ;;  %v8093_v4 = vadd.f32 %v11099_v60, %v8002_v25  ;;  %v5081_v11 = vpop.f32.mrb[185].mxu1 }
 0x4a1   : > { %v7664_v1 = vadd.f32 %v7663_v40, %v7662_v39  ;;  %v7665_v10 = vpop.f32.mrb[2].mxu0  ;;  %v8097_v3 = vadd.f32 %v11090_v32, %v5081_v11  ;;  %v8003_v36 = vpop.f32.mrb[186].mxu1 }
 0x4a2   : > { %v7666_v19 = vpop.f32.mrb[3].mxu0  ;;  %v8101_v24 = vadd.f32 %v11102_v47, %v8003_v36  ;;  %v5084_v53 = vpop.f32.mrb[187].mxu1  ;;  %v11211_v59 = vadd.f32 %v8093_v4, %v11154_v31 }
 0x4a3   : > { %v7667_v5 = vadd.f32 %v7666_v19, %v7665_v10  ;;  %v8125_v43 = vadd.f32 %v11139_v46, %v7664_v1  ;;  %v8105_v35 = vadd.f32 %v11092_v15, %v5084_v53  ;;  %v11218_v60 = vadd.f32 %v8097_v3, %v11144_v29  ;;  %v6945_v53 = vld [vmem:[%s9105_s12 + $0x41] sm:$0xff] }
 0x4a4   : > { %v11221_v32 = vadd.f32 %v8101_v24, %v11156_v44 }
 0x4a5   : > { %v11215_v27 = vadd.f32 %v11142_v30, %v7667_v5  ;;  %v11224_v46 = vadd.f32 %v8105_v35, %v11146_v50 }
 0x4a7   : > { %v7668_v9 = vpop.f32.mrb[4].mxu0  ;;  %v8006_v62 = vpop.f32.mrb[188].mxu1 }
 0x4a8   : > { %v7669_v47 = vpop.f32.mrb[5].mxu0  ;;  %v8109_v21 = vadd.f32 %v11119_v37, %v8006_v62  ;;  %v5097_v15 = vpop.f32.mrb[189].mxu1  ;;  %v6943_v62 = vld [vmem:[%s9105_s12 + $0x31] sm:$0xff] }
 0x4a9   : > { %v7670_v55 = vadd.f32 %v7669_v47, %v7668_v9  ;;  %v7671_v31 = vpop.f32.mrb[6].mxu0  ;;  %v8113_v30 = vadd.f32 %v11109_v7, %v5097_v15  ;;  %v8007_v57 = vpop.f32.mrb[190].mxu1  ;;  %v6957_v15 = vld [vmem:[%s9105_s12 + $0xa1] sm:$0xff] }
 0x4aa   : > { %v7672_v28 = vpop.f32.mrb[7].mxu0  ;;  %v8117_v44 = vadd.f32 %v11122_v48, %v8007_v57  ;;  %v5100_v49 = vpop.f32.mrb[191].mxu1  ;;  %v11233_v50 = vadd.f32 %v8109_v21, %v11174_v33 }
 0x4ab   : > { %v7673_v29 = vadd.f32 %v7672_v28, %v7671_v31  ;;  %v11229_v16 = vadd.f32 %v11149_v61, %v7670_v55  ;;  %v8121_v56 = vadd.f32 %v11112_v14, %v5100_v49  ;;  %v11240_v37 = vadd.f32 %v8113_v30, %v11164_v54  ;;  %v6946_v30 = vld [vmem:[%s9105_s12 + $0x49] sm:$0xff] }
 0x4ac   : > { %v11243_v7 = vadd.f32 %v8117_v44, %v11176_v23  ;;  %v6955_v44 = vld [vmem:[%s9105_s12 + $0x91] sm:$0xff] }
 0x4ad   : > { %v11237_v34 = vadd.f32 %v11152_v26, %v7673_v29  ;;  %v11246_v61 = vadd.f32 %v8121_v56, %v11166_v18  ;;  %v6944_v56 = vld [vmem:[%s9105_s12 + $0x39] sm:$0xff] }
 0x4af   : > { %v7674_v2 = vpop.f32.mrb[8].mxu0 }
 0x4b0   : > { %v7675_v48 = vpop.f32.mrb[9].mxu0 }
 0x4b1   : > { %v7676_v63 = vadd.f32 %v7675_v48, %v7674_v2  ;;  %v7677_v41 = vpop.f32.mrb[10].mxu0 }
 0x4b2   : > { %v7678_v33 = vpop.f32.mrb[11].mxu0 }
 0x4b3   : > { %v7679_v0 = vadd.f32 %v7678_v33, %v7677_v41  ;;  %v11249_v14 = vadd.f32 %v11159_v45, %v7676_v63 }
 0x4b5   : > { %v11252_v26 = vadd.f32 %v11162_v8, %v7679_v0 }
 0x4b7   : > { %v7680_v54 = vpop.f32.mrb[12].mxu0 }
 0x4b8   : > { %v7681_v20 = vpop.f32.mrb[13].mxu0 }
 0x4b9   : > { %v7682_v39 = vadd.f32 %v7681_v20, %v7680_v54  ;;  %v7683_v23 = vpop.f32.mrb[14].mxu0 }
 0x4ba   : > { %v7684_v40 = vpop.f32.mrb[15].mxu0 }
 0x4bb   : > { %v7685_v25 = vadd.f32 %v7684_v40, %v7683_v23  ;;  %v11255_v18 = vadd.f32 %v11169_v38, %v7682_v39  ;;  %v11269_v38 = vld [vmem:[%s11451_s5] ss:$0 sm:$0xff] }
 0x4bc   : > { %v6956_v39 = vld [vmem:[%s9105_s12 + $0x99] sm:$0xff] }
 0x4bd   : > { %v11258_v1 = vadd.f32 %v11172_v13, %v7685_v25 }
 0x4bf   : > { %v7686_v10 = vpop.f32.mrb[16].mxu0 }
 0x4c0   : > { %v7687_v4 = vpop.f32.mrb[17].mxu0 }
 0x4c1   : > { %v7688_v45 = vadd.f32 %v7687_v4, %v7686_v10  ;;  %v7689_v11 = vpop.f32.mrb[18].mxu0 }
 0x4c2   : > { %v7690_v8 = vpop.f32.mrb[19].mxu0 }
 0x4c3   : > { %v7691_v19 = vadd.f32 %v7690_v8, %v7689_v11  ;;  %v11261_v3 = vadd.f32 %v11179_v17, %v7688_v45 }
 0x4c5   : > { %v11264_v36 = vadd.f32 %v11182_v52, %v7691_v19 }
 0x4c7   : > { %v8038_v5 = vpop.f32.mrb[20].mxu0  ;;  %v8050_v35 = vpop.f32.mrb[192].mxu1 }
 0x4c8   : > { %v8079_v13 = vadd.f32 %v11191_v12, %v8038_v5  ;;  %v6008_v24 = vpop.f32.mrb[21].mxu0  ;;  %v8126_v52 = vadd.f32 %v8125_v43, %v8050_v35  ;;  %v6056_v55 = vpop.f32.mrb[193].mxu1 }
 0x4c9   : > { %v8083_v9 = vadd.f32 %v11195_v42, %v6008_v24  ;;  %v8039_v17 = vpop.f32.mrb[22].mxu0  ;;  %v8129_v28 = vadd.f32 %v11187_v22, %v6056_v55  ;;  %v8051_v57 = vpop.f32.mrb[194].mxu1  ;;  %v6958_v22 = vld [vmem:[%s9105_s12 + $0xa9] sm:$0xff]  ;;  %v6949_v24 = vld [vmem:[%s9105_s12 + $0x61] sm:$0xff] }
 0x4ca   : > { %v6160_v47 = vadd.f32 %v8079_v13, %v11269_v38  ;;  %v8087_v31 = vadd.f32 %v11201_v58, %v8039_v17  ;;  %v6011_v21 = vpop.f32.mrb[23].mxu0  ;;  %v6172_v43 = vadd.f32 %v8126_v52, %v11269_v38  ;;  %v8132_v58 = vadd.f32 %v11215_v27, %v8051_v57  ;;  %v6059_v2 = vpop.f32.mrb[195].mxu1  ;;  %v6947_v52 = vld [vmem:[%s9105_s12 + $0x51] sm:$0xff] }
 0x4cb   : > { %v6158_v12 = vadd.f32 %v8083_v9, %v11269_v38  ;;  %v8091_v42 = vadd.f32 %v11204_v51, %v6011_v21  ;;  %v6170_v63 = vadd.f32 %v8129_v28, %v11269_v38  ;;  %v8135_v51 = vadd.f32 %v11198_v6, %v6059_v2  ;;  %v6961_v21 = vld [vmem:[%s9105_s12 + $0xc1] sm:$0xff]  ;;  %v6950_v28 = vld [vmem:[%s9105_s12 + $0x69] sm:$0xff] }
 0x4cc   : > { %v6184_v29 = vadd.f32 %v6945_v53, %v6160_v47  ;;  %v6161_v49 = vadd.f32 %v8087_v31, %v11269_v38  ;;  %v6196_v0 = vadd.f32 %v6957_v15, %v6172_v43  ;;  %v6173_v20 = vadd.f32 %v8132_v58, %v11269_v38 }
 0x4cd   : > { %v6182_v48 = vadd.f32 %v6943_v62, %v6158_v12  ;;  %v6159_v41 = vadd.f32 %v8091_v42, %v11269_v38  ;;  %v6194_v23 = vadd.f32 %v6955_v44, %v6170_v63  ;;  %v6171_v25 = vadd.f32 %v8135_v51, %v11269_v38  ;;  %v6959_v42 = vld [vmem:[%s9105_s12 + $0xb1] sm:$0xff]  ;;  %v6948_v44 = vld [vmem:[%s9105_s12 + $0x59] sm:$0xff] }
 0x4ce   : > { %v6208_v33 = vmax.f32 %v6184_v29, 0.0  ;;  %v6185_v54 = vadd.f32 %v6946_v30, %v6161_v49  ;;  %v6220_v4 = vmax.f32 %v6196_v0, 0.0  ;;  %v6197_v6 = vadd.f32 %v6958_v22, %v6173_v20 }
 0x4cf   : > { %v6206_v27 = vmax.f32 %v6182_v48, 0.0  ;;  %v6183_v40 = vadd.f32 %v6944_v56, %v6159_v41  ;;  %v8042_v10 = vpop.f32.mrb[24].mxu0  ;;  %v6218_v19 = vmax.f32 %v6194_v23, 0.0  ;;  %v6195_v13 = vadd.f32 %v6956_v39, %v6171_v25  ;;  %v8054_v53 = vpop.f32.mrb[196].mxu1  ;;  %v6962_v56 = vld [vmem:[%s9105_s12 + $0xc9] sm:$0xff]  ;;  %v6960_v41 = vld [vmem:[%s9105_s12 + $0xb9] sm:$0xff] }
 0x4d0   : > { %6232 = vst [vmem:[%s10824_s2 + $0x10] sm:$0xff] %v6208_v33  ;;  %v6209_v45 = vmax.f32 %v6185_v54, 0.0  ;;  %v8095_v11 = vadd.f32 %v11211_v59, %v8042_v10  ;;  %v6024_v8 = vpop.f32.mrb[25].mxu0  ;;  %6244 = vst [vmem:[%s10824_s2 + $0x70] sm:$0xff] %v6220_v4  ;;  %v6221_v17 = vmax.f32 %v6197_v6, 0.0  ;;  %v8138_v47 = vadd.f32 %v11249_v14, %v8054_v53  ;;  %v6072_v62 = vpop.f32.mrb[197].mxu1 }
 0x4d1   : > { %6230 = vst [vmem:[%s10824_s2] sm:$0xff] %v6206_v27  ;;  %v6207_v5 = vmax.f32 %v6183_v40, 0.0  ;;  %v8099_v35 = vadd.f32 %v11218_v60, %v6024_v8  ;;  %v8043_v9 = vpop.f32.mrb[26].mxu0  ;;  %6242 = vst [vmem:[%s10824_s2 + $0x60] sm:$0xff] %v6218_v19  ;;  %v6219_v60 = vmax.f32 %v6195_v13, 0.0  ;;  %v8141_v12 = vadd.f32 %v11229_v16, %v6072_v62  ;;  %v8055_v30 = vpop.f32.mrb[198].mxu1  ;;  %v6951_v13 = vld [vmem:[%s9105_s12 + $0x71] sm:$0xff] }
 0x4d2   : > { %6233 = vst [vmem:[%s10824_s2 + $0x18] sm:$0xff] %v6209_v45  ;;  %v6164_v59 = vadd.f32 %v8095_v11, %v11269_v38  ;;  %v8103_v55 = vadd.f32 %v11221_v32, %v8043_v9  ;;  %v6027_v31 = vpop.f32.mrb[27].mxu0  ;;  %6245 = vst [vmem:[%s10824_s2 + $0x78] sm:$0xff] %v6221_v17  ;;  %v6176_v32 = vadd.f32 %v8138_v47, %v11269_v38  ;;  %v6075_v49 = vpop.f32.mrb[199].mxu1  ;;  %v6953_v45 = vld [vmem:[%s9105_s12 + $0x81] sm:$0xff] }
 0x4d3   : > { %6231 = vst [vmem:[%s10824_s2 + $0x8] sm:$0xff] %v6207_v5  ;;  %v6162_v15 = vadd.f32 %v8099_v35, %v11269_v38  ;;  %v8107_v14 = vadd.f32 %v11224_v46, %v6027_v31  ;;  %v8144_v43 = vadd.f32 %v11252_v26, %v8055_v30  ;;  %6243 = vst [vmem:[%s10824_s2 + $0x68] sm:$0xff] %v6219_v60  ;;  %v6965_v9 = vld [vmem:[%s9105_s12 + $0xe1] sm:$0xff] }
 0x4d4   : > { %v6188_v57 = vadd.f32 %v6949_v24, %v6164_v59  ;;  %v6165_v29 = vadd.f32 %v8103_v55, %v11269_v38  ;;  %v6174_v16 = vadd.f32 %v8141_v12, %v11269_v38  ;;  %v8147_v2 = vadd.f32 %v11237_v34, %v6075_v49  ;;  %v6963_v55 = vld [vmem:[%s9105_s12 + $0xd1] sm:$0xff]  ;;  %v6966_v12 = vld [vmem:[%s9105_s12 + $0xe9] sm:$0xff] }
 0x4d5   : > { %v6186_v58 = vadd.f32 %v6947_v52, %v6162_v15  ;;  %v6163_v46 = vadd.f32 %v8107_v14, %v11269_v38  ;;  %v6200_v63 = vadd.f32 %v6961_v21, %v6176_v32  ;;  %v6177_v26 = vadd.f32 %v8144_v43, %v11269_v38  ;;  %v6952_v21 = vld [vmem:[%s9105_s12 + $0x79] sm:$0xff] }
 0x4d6   : > { %v6212_v48 = vmax.f32 %v6188_v57, 0.0  ;;  %v6189_v22 = vadd.f32 %v6950_v28, %v6165_v29  ;;  %v6198_v33 = vadd.f32 %v6959_v42, %v6174_v16  ;;  %v6175_v54 = vadd.f32 %v8147_v2, %v11269_v38  ;;  %v6964_v42 = vld [vmem:[%s9105_s12 + $0xd9] sm:$0xff] }
 0x4d7   : > { %v6210_v51 = vmax.f32 %v6186_v58, 0.0  ;;  %v6187_v0 = vadd.f32 %v6948_v44, %v6163_v46  ;;  %v8046_v20 = vpop.f32.mrb[28].mxu0  ;;  %v6224_v34 = vmax.f32 %v6200_v63, 0.0  ;;  %v6201_v27 = vadd.f32 %v6962_v56, %v6177_v26  ;;  %v8058_v6 = vpop.f32.mrb[200].mxu1 }
 0x4d8   : > { %6236 = vst [vmem:[%s10824_s2 + $0x30] sm:$0xff] %v6212_v48  ;;  %v6213_v39 = vmax.f32 %v6189_v22, 0.0  ;;  %v8111_v23 = vadd.f32 %v11233_v50, %v8046_v20  ;;  %v6040_v40 = vpop.f32.mrb[29].mxu0  ;;  %v6222_v25 = vmax.f32 %v6198_v33, 0.0  ;;  %v6199_v4 = vadd.f32 %v6960_v41, %v6175_v54  ;;  %v6088_v24 = vpop.f32.mrb[201].mxu1 }
 0x4d9   : > { %6234 = vst [vmem:[%s10824_s2 + $0x20] sm:$0xff] %v6210_v51  ;;  %v6211_v10 = vmax.f32 %v6187_v0, 0.0  ;;  %v8115_v11 = vadd.f32 %v11240_v37, %v6040_v40  ;;  %v8047_v8 = vpop.f32.mrb[30].mxu0  ;;  %6248 = vst [vmem:[%s10824_s2 + $0x90] sm:$0xff] %v6224_v34  ;;  %v6225_v19 = vmax.f32 %v6201_v27, 0.0  ;;  %v8150_v5 = vadd.f32 %v11261_v3, %v8058_v6  ;;  %v6954_v3 = vld [vmem:[%s9105_s12 + $0x89] sm:$0xff] }
 0x4da   : > { %6237 = vst [vmem:[%s10824_s2 + $0x38] sm:$0xff] %v6213_v39  ;;  %v6168_v50 = vadd.f32 %v8111_v23, %v11269_v38  ;;  %v8119_v53 = vadd.f32 %v11243_v7, %v8047_v8  ;;  %v6043_v35 = vpop.f32.mrb[31].mxu0  ;;  %6246 = vst [vmem:[%s10824_s2 + $0x80] sm:$0xff] %v6222_v25  ;;  %v6223_v37 = vmax.f32 %v6199_v4, 0.0  ;;  %v8153_v59 = vadd.f32 %v11255_v18, %v6088_v24  ;;  %v8059_v47 = vpop.f32.mrb[202].mxu1  ;;  %s11925_s12 = sld [smem:[#allocation17_spill]] }
 0x4db   : > { %6235 = vst [vmem:[%s10824_s2 + $0x28] sm:$0xff] %v6211_v10  ;;  %v6166_v17 = vadd.f32 %v8115_v11, %v11269_v38  ;;  %v8123_v52 = vadd.f32 %v11246_v61, %v6043_v35  ;;  %6249 = vst [vmem:[%s10824_s2 + $0x98] sm:$0xff] %v6225_v19  ;;  %v6180_v62 = vadd.f32 %v8150_v5, %v11269_v38  ;;  %v6091_v15 = vpop.f32.mrb[203].mxu1 }
 0x4dc   : > { %v6192_v7 = vadd.f32 %v6953_v45, %v6168_v50  ;;  %v6169_v31 = vadd.f32 %v8119_v53, %v11269_v38  ;;  %v8156_v60 = vadd.f32 %v11264_v36, %v8059_v47  ;;  %6247 = vst [vmem:[%s10824_s2 + $0x88] sm:$0xff] %v6223_v37  ;;  %v6178_v18 = vadd.f32 %v8153_v59, %v11269_v38 }
 0x4dd   : > { %v6190_v61 = vadd.f32 %v6951_v13, %v6166_v17  ;;  %v6167_v28 = vadd.f32 %v8123_v52, %v11269_v38  ;;  %v8159_v30 = vadd.f32 %v11258_v1, %v6091_v15  ;;  %v6204_v14 = vadd.f32 %v6965_v9, %v6180_v62 }
 0x4de   : > { %v6216_v36 = vmax.f32 %v6192_v7, 0.0  ;;  %v6193_v57 = vadd.f32 %v6954_v3, %v6169_v31  ;;  %v6181_v32 = vadd.f32 %v8156_v60, %v11269_v38  ;;  %v6202_v43 = vadd.f32 %v6963_v55, %v6178_v18 }
 0x4df   : > { %v6214_v29 = vmax.f32 %v6190_v61, 0.0  ;;  %v6191_v44 = vadd.f32 %v6952_v21, %v6167_v28  ;;  %v6179_v49 = vadd.f32 %v8159_v30, %v11269_v38  ;;  %v6228_v1 = vmax.f32 %v6204_v14, 0.0 }
 0x4e0   : > { %6240 = vst [vmem:[%s10824_s2 + $0x50] sm:$0xff] %v6216_v36  ;;  %v6217_v58 = vmax.f32 %v6193_v57, 0.0  ;;  %v6205_v16 = vadd.f32 %v6966_v12, %v6181_v32  ;;  %v6226_v56 = vmax.f32 %v6202_v43, 0.0  ;;  %p11927_p13 = scmp.ne.s32.totalorder %s11925_s12, 0 }
 0x4e1   : > { %6238 = vst [vmem:[%s10824_s2 + $0x40] sm:$0xff] %v6214_v29  ;;  %v6215_v46 = vmax.f32 %v6191_v44, 0.0  ;;  %v6203_v2 = vadd.f32 %v6964_v42, %v6179_v49  ;;  %6252 = vst [vmem:[%s10824_s2 + $0xb0] sm:$0xff] %v6228_v1 }
 0x4e2   : > { %6241 = vst [vmem:[%s10824_s2 + $0x58] sm:$0xff] %v6217_v58  ;;  %v6229_v48 = vmax.f32 %v6205_v16, 0.0  ;;  %6250 = vst [vmem:[%s10824_s2 + $0xa0] sm:$0xff] %v6226_v56  ;;  %p8684_p7 = pnand %p8683_p3, %p11927_p13 }
 0x4e3   : > { %6239 = vst [vmem:[%s10824_s2 + $0x48] sm:$0xff] %v6215_v46  ;;  %v6227_v38 = vmax.f32 %v6203_v2, 0.0 }
 0x4e4   : > { %6253 = vst [vmem:[%s10824_s2 + $0xb8] sm:$0xff] %v6229_v48  ;;  %p8685_p9 = pneg %p8684_p7 }
 0x4e5   : > { %6251 = vst [vmem:[%s10824_s2 + $0xa8] sm:$0xff] %v6227_v38 }
 0x4e6   : > { %p8692_p12 = pnand %p8691_p8, %p8685_p9 }
 0x4e8   : > { %8695 = shalt.err (!%p8692_p12)
}
 0x4e9   : > { %s8696_s29 = scalar_lea.hbm %s11375_s9, 3072  ;;  %s8700_s11 = scalar_lea.hbm %s11926_s20, 12288 }
 0x4ea   : > { %p8697_p2 = scmp.ne.s32.totalorder %s11375_s9, %s8696_s29  ;;  %p8701_p0 = scmp.lt.u32.totalorder %s11375_s9, %s11926_s20 }
 0x4eb   : > { %p8702_p4 = scmp.lt.u32.totalorder %s8700_s11, %s8696_s29  ;;  %p8704_p3 = scmp.lt.u32.totalorder %s8696_s29, %s11375_s9 }
 0x4ec   : > { %p8698_p6 = pnand %p8697_p2, %p11927_p13 }
 0x4ed   : > { %p8703_p1 = por %p8702_p4, %p8701_p0 }
 0x4ee   : > { %p8699_p10 = pneg %p8698_p6 }
 0x4ef   : > { %p8705_p7 = por %p8704_p3, %p8703_p1 }
 0x4f1   : > { %p8706_p9 = pnand %p8705_p7, %p8699_p10 }
 0x4f3   : > { %8709 = shalt.err (!%p8706_p9)
}
 0x4f4   : > { %s8823_s27 = smov 128   ;;  %s8824_s16 = smov 8  }
 0x4f5   : > { %8211 = dma.vmem_to_hbm [thread:$0]  (%p11927_p13), %s11377_s17, 3072, %s11375_s9, %s11385_s19, %s8823_s27, %s8823_s27, %s8824_s16  }
 0x4f6 PF: > { %s11928_s8 = sld [smem:[#allocation14_spill]]  ;;  %s11929_s6 = sld [smem:[#allocation18_spill]] }
 0x4f7   : > { %p8233_p11 = scmp.ge.s32.totalorder %s8808_s7, 2 }
 0x4fc   : > { %s6285_s18 = sand.u32 1, %s11928_s8   ;;  %p11930_p5 = scmp.ne.s32.totalorder %s11929_s6, 0 }
 0x4fd   : > { %s6286_s15 = scalar_lea.sflag [#allocation6], %s6285_s18 }
 0x4fe   : > { %p8225_p8 = pnand %p8233_p11, %p11930_p5 }
 0x500   : > { %8763 = dma.done.wait (!%p8225_p8), %s6286_s15, 3072  }
 0x501   : > { %8765 = vsyncadd (!%p8225_p8), %s6286_s15, 4294964224  ;;  %s23_s7 = sadd.s32 1, %s8808_s7   ;;  %s11931_s27 = sld [smem:[#allocation16_spill]] }
 0x502   : > { %p20_p12 = scmp.ge.s32.totalorder %s23_s7, 6   ;;  %s11932_s29 = sld [smem:[#allocation19_spill]] }
 0x503   : > { %s11933_s17 = smov %s11947_s21  ;;  %s11934_s21 = smov %s8772_s22 }
 0x504   : > { %s11935_s22 = smov %s8776_s23  ;;  %s11936_s23 = smov %s9035_s4 }
 0x505   : > { %s11937_s24 = smov %s8784_s25  ;;  %s11938_s25 = smov %s8788_s26 }
 0x506   : > { %s11939_s26 = smov %s9030_s28  ;;  %s11940_s28 = smov %s8804_s30 }
 0x507   : > { %s11941_s30 = smov %s11933_s17  ;;  %22 = sbr.rel (!%p20_p12) target bundleno = 14 (0xe), region = 114 }
 0x50e   :  { %6291 = vsyncpa [#allocation5], 1 }
 0x50f   :  { %6293 = vsyncpa [#allocation5 + $0x1], 1 }
 0x510   :  { %6294 = vsyncpa [#allocation8], 1 }
 0x511   :  { %6295 = vsyncpa [#allocation6], 1 }
 0x512   :  { %6297 = vsyncpa [#allocation6 + $0x1], 1 }

</bundles_post_ra>
